<compile_context>
chip_gen: v6e
topology: v6e:2x2x1
jax: 0.10.0
libtpu: 0.0.40
codegen_flags: <defaults>
</compile_context>

<pallas_src>
import functools
import math

import numpy as np
import jax
import jax.numpy as jnp
from jax.experimental import pallas as pl
from jax.experimental.pallas import tpu as pltpu

LRELU_SLOPE = 0.2
FC1_PAD = 128            # lane-dense padded width of fc1 hidden (real width 64)
FC2_PAD = 128            # lane-dense padded width of the final (nout-wide) output
MAX_BLOCK_SAMPLES = 256  # samples per grid step (conv-1 rows per block = 8 * this)


def _round_up(x, m):
    return ((x + m - 1) // m) * m


def _bit_reverse_perm(n):
    """Bit-reversal permutation of range(n); n must be a power of two."""
    if n <= 1:
        return np.zeros((max(n, 1),), dtype=np.int32)
    bits = n.bit_length() - 1
    return np.array([int(f"{i:0{bits}b}"[::-1], 2) for i in range(n)], dtype=np.int32)


# ----------------------------------------------------------------------------
# Fused critic kernel
# ----------------------------------------------------------------------------
def _critic_kernel(*refs, num_conv, slope):
    """refs = (x, [conv_w, conv_b] * num_conv, fc1_w, fc1_b, fc2_w, fc2_b, out).

    x block is (tpairs*bs, 2*z_dim) bf16, laid out time-pair-major / sample-minor
    with the time-pair axis bit-reversed, so every stride-2 conv after the first
    pairs row r with row r + m/2 (contiguous half slices).  Conv weights are
    stacked as (2*c_in, c_out) = [tap0; tap1].  Matmul operands are bf16;
    accumulation, bias add and LeakyReLU run in f32.
    """
    x_ref = refs[0]
    conv_refs = refs[1:1 + 2 * num_conv]
    fc1_w_ref, fc1_b_ref, fc2_w_ref, fc2_b_ref = refs[1 + 2 * num_conv:-1]
    o_ref = refs[-1]

    h = x_ref[...]                                          # (m, 2*z_dim) bf16, pairs pre-packed
    for i in range(num_conv):
        if i > 0:
            # Pack consecutive-time pairs along lanes: rows (r, r + m/2).
            half = h.shape[0] // 2
            h = jnp.concatenate([h[:half], h[half:]], axis=-1)   # (m/2, 2*c_in) bf16
        w = conv_refs[2 * i][...]                           # (2*c_in, c_out) bf16
        b = conv_refs[2 * i + 1][...]                       # (1, c_out)      f32
        y = jnp.dot(h, w, preferred_element_type=jnp.float32) + b
        h = jnp.maximum(y, slope * y).astype(jnp.bfloat16)  # LeakyReLU (f32), bf16 for next dot

    # fc1 (lane-padded to FC1_PAD) + LeakyReLU
    y = jnp.dot(h, fc1_w_ref[...], preferred_element_type=jnp.float32) + fc1_b_ref[...]
    h = jnp.maximum(y, slope * y).astype(jnp.bfloat16)
    # fc2, lane-padded to FC2_PAD columns (host slices [:, :nout])
    o = jnp.dot(h, fc2_w_ref[...], preferred_element_type=jnp.float32) + fc2_b_ref[...]
    o_ref[...] = o.astype(o_ref.dtype)


def _fused_critic(x_host, params, *, block_samples, tpairs):
    """x_host: (n_blocks * tpairs * block_samples, 2*z_dim) bf16 (block-local
    time-pair-major / sample-minor layout).  Returns (n_blocks*block_samples, FC2_PAD) f32."""
    rows_per_block = tpairs * block_samples
    total_rows, in_width = x_host.shape
    n_blocks = total_rows // rows_per_block
    num_conv = len(params["conv_w"])

    flat_inputs = [x_host]
    in_specs = [pl.BlockSpec((rows_per_block, in_width), lambda i: (i, 0))]
    for w, b in zip(params["conv_w"], params["conv_b"]):
        flat_inputs += [w, b]
        in_specs += [pl.BlockSpec(w.shape, lambda i: (0, 0)),   # weights: VMEM-resident
                     pl.BlockSpec(b.shape, lambda i: (0, 0))]
    for name in ("fc1_w", "fc1_b", "fc2_w", "fc2_b"):
        arr = params[name]
        flat_inputs.append(arr)
        in_specs.append(pl.BlockSpec(arr.shape, lambda i: (0, 0)))

    kern = functools.partial(_critic_kernel, num_conv=num_conv, slope=LRELU_SLOPE)
    return pl.pallas_call(
        kern,
        grid=(n_blocks,),
        out_shape=jax.ShapeDtypeStruct((n_blocks * block_samples, FC2_PAD), jnp.float32),
        in_specs=in_specs,
        out_specs=pl.BlockSpec((block_samples, FC2_PAD), lambda i: (i, 0)),
        compiler_params=pltpu.CompilerParams(
            dimension_semantics=("parallel",),            # megacore sharding on v7x
            vmem_limit_bytes=32 * 1024 * 1024,            # ~3 MB weights + <~8 MB acts/buffers
        ),
    )(*flat_inputs)


# ----------------------------------------------------------------------------
# Parameter construction (matches the PyTorch __init__ shapes / init scheme)
# ----------------------------------------------------------------------------
def _xavier_normal(key, shape, fan_in, fan_out, gain):
    std = gain * math.sqrt(2.0 / (fan_in + fan_out))
    return std * jax.random.normal(key, shape, dtype=jnp.float32)


def init_params(key, z_dim, nout=1):
    gain = math.sqrt(2.0 / (1.0 + LRELU_SLOPE ** 2))  # calculate_gain('leaky_relu', 0.2)
    conv_dims = [(z_dim, 128), (128, 256), (256, 512), (512, 1024)]
    keys = jax.random.split(key, 2 * len(conv_dims) + 4)
    ki = 0
    conv_w, conv_b = [], []
    for c_in, c_out in conv_dims:
        # torch Conv1d weight (c_out, c_in, 2): xavier fan_in = c_in*2, fan_out = c_out*2.
        # Stored stacked as (2*c_in, c_out) = [tap0^T ; tap1^T] for the pair-packed matmul.
        w = _xavier_normal(keys[ki], (2 * c_in, c_out), c_in * 2, c_out * 2, gain); ki += 1
        bound = 1.0 / math.sqrt(c_in * 2)  # torch default conv bias init
        b = jax.random.uniform(keys[ki], (1, c_out), jnp.float32, -bound, bound); ki += 1
        conv_w.append(w.astype(jnp.bfloat16))
        conv_b.append(b)
    # Linear(1024, 64), output lane-padded to FC1_PAD
    fc1_w = _xavier_normal(keys[ki], (1024, 64), 1024, 64, gain); ki += 1
    bound = 1.0 / math.sqrt(1024)
    fc1_b = jax.random.uniform(keys[ki], (1, 64), jnp.float32, -bound, bound); ki += 1
    # Linear(64, nout), padded to a lane-dense (FC1_PAD, FC2_PAD) slab
    fc2_w = _xavier_normal(keys[ki], (64, nout), 64, nout, gain); ki += 1
    bound = 1.0 / math.sqrt(64)
    fc2_b = jax.random.uniform(keys[ki], (1, nout), jnp.float32, -bound, bound); ki += 1
    return {
        "conv_w": conv_w,
        "conv_b": conv_b,
        "fc1_w": jnp.zeros((1024, FC1_PAD), jnp.float32).at[:, :64].set(fc1_w).astype(jnp.bfloat16),
        "fc1_b": jnp.zeros((1, FC1_PAD), jnp.float32).at[:, :64].set(fc1_b),
        "fc2_w": jnp.zeros((FC1_PAD, FC2_PAD), jnp.float32).at[:64, :nout].set(fc2_w).astype(jnp.bfloat16),
        "fc2_b": jnp.zeros((1, FC2_PAD), jnp.float32).at[:, :nout].set(fc2_b),
    }


# ----------------------------------------------------------------------------
# Forward
# ----------------------------------------------------------------------------
def shuffle_time(x, key):
    # TODO(synk): utils.shuffle_time source not provided; implemented as an
    # independent permutation of the time axis per batch element.
    B, T, _ = x.shape
    perms = jax.vmap(lambda k: jax.random.permutation(k, T))(jax.random.split(key, B))
    return jnp.take_along_axis(x, perms[:, :, None], axis=1)


@functools.partial(jax.jit, static_argnums=(3,))
def forward(joint_samples, params, shuffle_key, nout=1):
    B, T, Z = joint_samples.shape
    num_conv = len(params["conv_w"])
    assert T == 2 ** num_conv, "4 stride-2 convs require T == 16"
    marginal_samples = shuffle_time(joint_samples, shuffle_key)

    # Single fused pass for both critics -> weights stream HBM->VMEM once.
    x_all = jnp.concatenate([joint_samples, marginal_samples], axis=0).astype(jnp.bfloat16)
    S = 2 * B
    tpairs = T // 2

    # Host-side pair packing for conv 1: (S, T, Z) -> (S, T/2, 2Z).
    xp = x_all.reshape(S, tpairs, 2 * Z)
    # Bit-reversed pair order -> every later conv pairs contiguous halves in-kernel.
    xp = xp[:, _bit_reverse_perm(tpairs), :]

    # Sample blocking (multiple of 16 so all bf16 sublane slices stay tile-aligned).
    bs = min(MAX_BLOCK_SAMPLES, _round_up(S, 16))
    s_pad = _round_up(S, bs)
    if s_pad != S:
        xp = jnp.pad(xp, ((0, s_pad - S), (0, 0), (0, 0)))
    nb = s_pad // bs
    # Block-local time-pair-major / sample-minor layout: row (j, s) -> j*bs + s.
    x_host = (xp.reshape(nb, bs, tpairs, 2 * Z)
                .transpose(0, 2, 1, 3)
                .reshape(nb * tpairs * bs, 2 * Z))

    out = _fused_critic(x_host, params, block_samples=bs, tpairs=tpairs)  # (s_pad, FC2_PAD)
    vals = out[:S, :nout]                                                 # (2B, nout)
    f_true = jnp.squeeze(vals[:B])                                        # matches torch .squeeze()
    f_false = jnp.squeeze(vals[B:])
    return f_true, f_false


if __name__ == "__main__":
    B, T, Z_DIM, NOUT = 2, 16, 8, 1   # T must be 16 so 4 stride-2 convs reduce it to 1

    key = jax.random.PRNGKey(0)
    k_data, k_params, k_shuffle = jax.random.split(key, 3)

    joint_samples = jax.random.normal(k_data, (B, T, Z_DIM), dtype=jnp.float32)
    params = init_params(k_params, Z_DIM, NOUT)

    f_true, f_false = forward(joint_samples, params, k_shuffle, NOUT)
    jax.block_until_ready((f_true, f_false))

    assert f_true.shape == (B,) and f_false.shape == (B,)
    print("KERNEL_OK")
</pallas_src>

<mosaic_0001>
module attributes {stable_mosaic.version = 11 : i64} {
  func.func @_critic_kernel(%arg0: i32, %arg1: memref<128x16xbf16, #tpu.memory_space<vmem>>, %arg2: memref<16x128xbf16, #tpu.memory_space<vmem>>, %arg3: memref<1x128xf32, #tpu.memory_space<vmem>>, %arg4: memref<256x256xbf16, #tpu.memory_space<vmem>>, %arg5: memref<1x256xf32, #tpu.memory_space<vmem>>, %arg6: memref<512x512xbf16, #tpu.memory_space<vmem>>, %arg7: memref<1x512xf32, #tpu.memory_space<vmem>>, %arg8: memref<1024x1024xbf16, #tpu.memory_space<vmem>>, %arg9: memref<1x1024xf32, #tpu.memory_space<vmem>>, %arg10: memref<1024x128xbf16, #tpu.memory_space<vmem>>, %arg11: memref<1x128xf32, #tpu.memory_space<vmem>>, %arg12: memref<128x128xbf16, #tpu.memory_space<vmem>>, %arg13: memref<1x128xf32, #tpu.memory_space<vmem>>, %arg14: memref<16x128xf32, #tpu.memory_space<vmem>>) attributes {dimension_semantics = [#tpu.dimension_semantics<parallel>], iteration_bounds = array<i64: 1>, scalar_prefetch = 0 : i64, scratch_operands = 0 : i64, tpu.core_type = #tpu.core_type<tc>, window_params = [{transform_indices = @transform_0, window_bounds = array<i64: 128, 16>}, {pipeline_mode = #tpu.pipeline_mode<synchronous>, transform_indices = @transform_1, window_bounds = array<i64: 16, 128>}, {pipeline_mode = #tpu.pipeline_mode<synchronous>, transform_indices = @transform_2, window_bounds = array<i64: 1, 128>}, {pipeline_mode = #tpu.pipeline_mode<synchronous>, transform_indices = @transform_3, window_bounds = array<i64: 256, 256>}, {pipeline_mode = #tpu.pipeline_mode<synchronous>, transform_indices = @transform_4, window_bounds = array<i64: 1, 256>}, {pipeline_mode = #tpu.pipeline_mode<synchronous>, transform_indices = @transform_5, window_bounds = array<i64: 512, 512>}, {pipeline_mode = #tpu.pipeline_mode<synchronous>, transform_indices = @transform_6, window_bounds = array<i64: 1, 512>}, {pipeline_mode = #tpu.pipeline_mode<synchronous>, transform_indices = @transform_7, window_bounds = array<i64: 1024, 1024>}, {pipeline_mode = #tpu.pipeline_mode<synchronous>, transform_indices = @transform_8, window_bounds = array<i64: 1, 1024>}, {pipeline_mode = #tpu.pipeline_mode<synchronous>, transform_indices = @transform_9, window_bounds = array<i64: 1024, 128>}, {pipeline_mode = #tpu.pipeline_mode<synchronous>, transform_indices = @transform_10, window_bounds = array<i64: 1, 128>}, {pipeline_mode = #tpu.pipeline_mode<synchronous>, transform_indices = @transform_11, window_bounds = array<i64: 128, 128>}, {pipeline_mode = #tpu.pipeline_mode<synchronous>, transform_indices = @transform_12, window_bounds = array<i64: 1, 128>}, {transform_indices = @transform_13, window_bounds = array<i64: 16, 128>}]} {
    %c0 = arith.constant 0 : index
    %c0_0 = arith.constant 0 : index
    %0 = vector.load %arg1[%c0, %c0_0] : memref<128x16xbf16, #tpu.memory_space<vmem>>, vector<128x16xbf16>
    %c0_1 = arith.constant 0 : index
    %c0_2 = arith.constant 0 : index
    %1 = vector.load %arg2[%c0_1, %c0_2] : memref<16x128xbf16, #tpu.memory_space<vmem>>, vector<16x128xbf16>
    %c0_3 = arith.constant 0 : index
    %c0_4 = arith.constant 0 : index
    %2 = vector.load %arg3[%c0_3, %c0_4] : memref<1x128xf32, #tpu.memory_space<vmem>>, vector<1x128xf32>
    %cst = arith.constant dense<0.000000e+00> : vector<128x128xf32>
    %3 = tpu.matmul %0, %1, %cst {dimension_numbers = #tpu.dot_dimension_numbers<[1], [0], [0], [1], [0, 0, 1, 1], [], []>} : vector<128x16xbf16>, vector<16x128xbf16>, vector<128x128xf32> -> vector<128x128xf32>
    %4 = vector.broadcast %2 : vector<1x128xf32> to vector<128x128xf32>
    %5 = arith.addf %3, %4 : vector<128x128xf32>
    %cst_5 = arith.constant 2.000000e-01 : f32
    %6 = vector.broadcast %cst_5 : f32 to vector<128x128xf32>
    %7 = arith.mulf %6, %5 : vector<128x128xf32>
    %8 = arith.maximumf %5, %7 : vector<128x128xf32>
    %9 = arith.truncf %8 : vector<128x128xf32> to vector<128x128xbf16>
    %10 = vector.extract_strided_slice %9 {offsets = [0, 0], sizes = [64, 128], strides = [1, 1]} : vector<128x128xbf16> to vector<64x128xbf16>
    %11 = vector.extract_strided_slice %9 {offsets = [64, 0], sizes = [64, 128], strides = [1, 1]} : vector<128x128xbf16> to vector<64x128xbf16>
    %12 = tpu.concatenate %10, %11 in 1 : vector<64x128xbf16>, vector<64x128xbf16> -> vector<64x256xbf16>
    %c0_6 = arith.constant 0 : index
    %c0_7 = arith.constant 0 : index
    %13 = vector.load %arg4[%c0_6, %c0_7] : memref<256x256xbf16, #tpu.memory_space<vmem>>, vector<256x256xbf16>
    %c0_8 = arith.constant 0 : index
    %c0_9 = arith.constant 0 : index
    %14 = vector.load %arg5[%c0_8, %c0_9] : memref<1x256xf32, #tpu.memory_space<vmem>>, vector<1x256xf32>
    %cst_10 = arith.constant dense<0.000000e+00> : vector<64x256xf32>
    %15 = tpu.matmul %12, %13, %cst_10 {dimension_numbers = #tpu.dot_dimension_numbers<[1], [0], [0], [1], [0, 0, 1, 1], [], []>} : vector<64x256xbf16>, vector<256x256xbf16>, vector<64x256xf32> -> vector<64x256xf32>
    %16 = vector.broadcast %14 : vector<1x256xf32> to vector<64x256xf32>
    %17 = arith.addf %15, %16 : vector<64x256xf32>
    %cst_11 = arith.constant 2.000000e-01 : f32
    %18 = vector.broadcast %cst_11 : f32 to vector<64x256xf32>
    %19 = arith.mulf %18, %17 : vector<64x256xf32>
    %20 = arith.maximumf %17, %19 : vector<64x256xf32>
    %21 = arith.truncf %20 : vector<64x256xf32> to vector<64x256xbf16>
    %22 = vector.extract_strided_slice %21 {offsets = [0, 0], sizes = [32, 256], strides = [1, 1]} : vector<64x256xbf16> to vector<32x256xbf16>
    %23 = vector.extract_strided_slice %21 {offsets = [32, 0], sizes = [32, 256], strides = [1, 1]} : vector<64x256xbf16> to vector<32x256xbf16>
    %24 = tpu.concatenate %22, %23 in 1 : vector<32x256xbf16>, vector<32x256xbf16> -> vector<32x512xbf16>
    %c0_12 = arith.constant 0 : index
    %c0_13 = arith.constant 0 : index
    %25 = vector.load %arg6[%c0_12, %c0_13] : memref<512x512xbf16, #tpu.memory_space<vmem>>, vector<512x512xbf16>
    %c0_14 = arith.constant 0 : index
    %c0_15 = arith.constant 0 : index
    %26 = vector.load %arg7[%c0_14, %c0_15] : memref<1x512xf32, #tpu.memory_space<vmem>>, vector<1x512xf32>
    %cst_16 = arith.constant dense<0.000000e+00> : vector<32x512xf32>
    %27 = tpu.matmul %24, %25, %cst_16 {dimension_numbers = #tpu.dot_dimension_numbers<[1], [0], [0], [1], [0, 0, 1, 1], [], []>} : vector<32x512xbf16>, vector<512x512xbf16>, vector<32x512xf32> -> vector<32x512xf32>
    %28 = vector.broadcast %26 : vector<1x512xf32> to vector<32x512xf32>
    %29 = arith.addf %27, %28 : vector<32x512xf32>
    %cst_17 = arith.constant 2.000000e-01 : f32
    %30 = vector.broadcast %cst_17 : f32 to vector<32x512xf32>
    %31 = arith.mulf %30, %29 : vector<32x512xf32>
    %32 = arith.maximumf %29, %31 : vector<32x512xf32>
    %33 = arith.truncf %32 : vector<32x512xf32> to vector<32x512xbf16>
    %34 = vector.extract_strided_slice %33 {offsets = [0, 0], sizes = [16, 512], strides = [1, 1]} : vector<32x512xbf16> to vector<16x512xbf16>
    %35 = vector.extract_strided_slice %33 {offsets = [16, 0], sizes = [16, 512], strides = [1, 1]} : vector<32x512xbf16> to vector<16x512xbf16>
    %36 = tpu.concatenate %34, %35 in 1 : vector<16x512xbf16>, vector<16x512xbf16> -> vector<16x1024xbf16>
    %c0_18 = arith.constant 0 : index
    %c0_19 = arith.constant 0 : index
    %37 = vector.load %arg8[%c0_18, %c0_19] : memref<1024x1024xbf16, #tpu.memory_space<vmem>>, vector<1024x1024xbf16>
    %c0_20 = arith.constant 0 : index
    %c0_21 = arith.constant 0 : index
    %38 = vector.load %arg9[%c0_20, %c0_21] : memref<1x1024xf32, #tpu.memory_space<vmem>>, vector<1x1024xf32>
    %cst_22 = arith.constant dense<0.000000e+00> : vector<16x1024xf32>
    %39 = tpu.matmul %36, %37, %cst_22 {dimension_numbers = #tpu.dot_dimension_numbers<[1], [0], [0], [1], [0, 0, 1, 1], [], []>} : vector<16x1024xbf16>, vector<1024x1024xbf16>, vector<16x1024xf32> -> vector<16x1024xf32>
    %40 = vector.broadcast %38 : vector<1x1024xf32> to vector<16x1024xf32>
    %41 = arith.addf %39, %40 : vector<16x1024xf32>
    %cst_23 = arith.constant 2.000000e-01 : f32
    %42 = vector.broadcast %cst_23 : f32 to vector<16x1024xf32>
    %43 = arith.mulf %42, %41 : vector<16x1024xf32>
    %44 = arith.maximumf %41, %43 : vector<16x1024xf32>
    %45 = arith.truncf %44 : vector<16x1024xf32> to vector<16x1024xbf16>
    %c0_24 = arith.constant 0 : index
    %c0_25 = arith.constant 0 : index
    %46 = vector.load %arg10[%c0_24, %c0_25] : memref<1024x128xbf16, #tpu.memory_space<vmem>>, vector<1024x128xbf16>
    %cst_26 = arith.constant dense<0.000000e+00> : vector<16x128xf32>
    %47 = tpu.matmul %45, %46, %cst_26 {dimension_numbers = #tpu.dot_dimension_numbers<[1], [0], [0], [1], [0, 0, 1, 1], [], []>} : vector<16x1024xbf16>, vector<1024x128xbf16>, vector<16x128xf32> -> vector<16x128xf32>
    %c0_27 = arith.constant 0 : index
    %c0_28 = arith.constant 0 : index
    %48 = vector.load %arg11[%c0_27, %c0_28] : memref<1x128xf32, #tpu.memory_space<vmem>>, vector<1x128xf32>
    %49 = vector.broadcast %48 : vector<1x128xf32> to vector<16x128xf32>
    %50 = arith.addf %47, %49 : vector<16x128xf32>
    %cst_29 = arith.constant 2.000000e-01 : f32
    %51 = vector.broadcast %cst_29 : f32 to vector<16x128xf32>
    %52 = arith.mulf %51, %50 : vector<16x128xf32>
    %53 = arith.maximumf %50, %52 : vector<16x128xf32>
    %54 = arith.truncf %53 : vector<16x128xf32> to vector<16x128xbf16>
    %c0_30 = arith.constant 0 : index
    %c0_31 = arith.constant 0 : index
    %55 = vector.load %arg12[%c0_30, %c0_31] : memref<128x128xbf16, #tpu.memory_space<vmem>>, vector<128x128xbf16>
    %cst_32 = arith.constant dense<0.000000e+00> : vector<16x128xf32>
    %56 = tpu.matmul %54, %55, %cst_32 {dimension_numbers = #tpu.dot_dimension_numbers<[1], [0], [0], [1], [0, 0, 1, 1], [], []>} : vector<16x128xbf16>, vector<128x128xbf16>, vector<16x128xf32> -> vector<16x128xf32>
    %c0_33 = arith.constant 0 : index
    %c0_34 = arith.constant 0 : index
    %57 = vector.load %arg13[%c0_33, %c0_34] : memref<1x128xf32, #tpu.memory_space<vmem>>, vector<1x128xf32>
    %58 = vector.broadcast %57 : vector<1x128xf32> to vector<16x128xf32>
    %59 = arith.addf %56, %58 : vector<16x128xf32>
    %c0_35 = arith.constant 0 : index
    %c0_36 = arith.constant 0 : index
    %60 = vector.load %arg14[%c0_35, %c0_36] : memref<16x128xf32, #tpu.memory_space<vmem>>, vector<16x128xf32>
    tpu.vector_store %arg14[%c0_35, %c0_36], %59 {strides = array<i32>} : memref<16x128xf32, #tpu.memory_space<vmem>>, vector<16x128xf32>,
    return
  }
  func.func @transform_0(%arg0: i32) -> (i32, i32) {
    %c0_i32 = arith.constant 0 : i32
    %c0_i32_0 = arith.constant 0 : i32
    return %arg0, %c0_i32 : i32, i32
  }
  func.func @transform_1(%arg0: i32) -> (i32, i32) {
    %c0_i32 = arith.constant 0 : i32
    %c0_i32_0 = arith.constant 0 : i32
    %c0_i32_1 = arith.constant 0 : i32
    return %c0_i32, %c0_i32_0 : i32, i32
  }
  func.func @transform_2(%arg0: i32) -> (i32, i32) {
    %c0_i32 = arith.constant 0 : i32
    %c0_i32_0 = arith.constant 0 : i32
    %c0_i32_1 = arith.constant 0 : i32
    return %c0_i32, %c0_i32_0 : i32, i32
  }
  func.func @transform_3(%arg0: i32) -> (i32, i32) {
    %c0_i32 = arith.constant 0 : i32
    %c0_i32_0 = arith.constant 0 : i32
    %c0_i32_1 = arith.constant 0 : i32
    return %c0_i32, %c0_i32_0 : i32, i32
  }
  func.func @transform_4(%arg0: i32) -> (i32, i32) {
    %c0_i32 = arith.constant 0 : i32
    %c0_i32_0 = arith.constant 0 : i32
    %c0_i32_1 = arith.constant 0 : i32
    return %c0_i32, %c0_i32_0 : i32, i32
  }
  func.func @transform_5(%arg0: i32) -> (i32, i32) {
    %c0_i32 = arith.constant 0 : i32
    %c0_i32_0 = arith.constant 0 : i32
    %c0_i32_1 = arith.constant 0 : i32
    return %c0_i32, %c0_i32_0 : i32, i32
  }
  func.func @transform_6(%arg0: i32) -> (i32, i32) {
    %c0_i32 = arith.constant 0 : i32
    %c0_i32_0 = arith.constant 0 : i32
    %c0_i32_1 = arith.constant 0 : i32
    return %c0_i32, %c0_i32_0 : i32, i32
  }
  func.func @transform_7(%arg0: i32) -> (i32, i32) {
    %c0_i32 = arith.constant 0 : i32
    %c0_i32_0 = arith.constant 0 : i32
    %c0_i32_1 = arith.constant 0 : i32
    return %c0_i32, %c0_i32_0 : i32, i32
  }
  func.func @transform_8(%arg0: i32) -> (i32, i32) {
    %c0_i32 = arith.constant 0 : i32
    %c0_i32_0 = arith.constant 0 : i32
    %c0_i32_1 = arith.constant 0 : i32
    return %c0_i32, %c0_i32_0 : i32, i32
  }
  func.func @transform_9(%arg0: i32) -> (i32, i32) {
    %c0_i32 = arith.constant 0 : i32
    %c0_i32_0 = arith.constant 0 : i32
    %c0_i32_1 = arith.constant 0 : i32
    return %c0_i32, %c0_i32_0 : i32, i32
  }
  func.func @transform_10(%arg0: i32) -> (i32, i32) {
    %c0_i32 = arith.constant 0 : i32
    %c0_i32_0 = arith.constant 0 : i32
    %c0_i32_1 = arith.constant 0 : i32
    return %c0_i32, %c0_i32_0 : i32, i32
  }
  func.func @transform_11(%arg0: i32) -> (i32, i32) {
    %c0_i32 = arith.constant 0 : i32
    %c0_i32_0 = arith.constant 0 : i32
    %c0_i32_1 = arith.constant 0 : i32
    return %c0_i32, %c0_i32_0 : i32, i32
  }
  func.func @transform_12(%arg0: i32) -> (i32, i32) {
    %c0_i32 = arith.constant 0 : i32
    %c0_i32_0 = arith.constant 0 : i32
    %c0_i32_1 = arith.constant 0 : i32
    return %c0_i32, %c0_i32_0 : i32, i32
  }
  func.func @transform_13(%arg0: i32) -> (i32, i32) {
    %c0_i32 = arith.constant 0 : i32
    %c0_i32_0 = arith.constant 0 : i32
    return %arg0, %c0_i32 : i32, i32
  }
}

</mosaic_0001>

<bundles_post_ra>
// kernel: forward.1
= control target key start
LH: loop header
LB: loop body
LE: loop exit
PB: predicated region body
PF: predicated region fallthrough
CT: control target
= control target key end

     0   :  { %18 = vsyncpa [#allocation3], 0  ;;  %s8416_s0 = inlined_call_operand.vmem [shape: bf16[128,16], index: 0, kind: input, shape index: {}]   ;;  %s8417_s1 = inlined_call_operand.hbm [shape: bf16[16,128], index: 1, kind: input, shape index: {}]   ;;  %s8418_s2 = inlined_call_operand.hbm [shape: f32[1,128], index: 2, kind: input, shape index: {}]   ;;  %s8419_s3 = inlined_call_operand.hbm [shape: bf16[256,256], index: 3, kind: input, shape index: {}]   ;;  %s8420_s4 = inlined_call_operand.hbm [shape: f32[1,256], index: 4, kind: input, shape index: {}]   ;;  %s8421_s5 = inlined_call_operand.hbm [shape: bf16[512,512], index: 5, kind: input, shape index: {}]   ;;  %s8422_s6 = inlined_call_operand.hbm [shape: f32[1,512], index: 6, kind: input, shape index: {}]   ;;  %s8423_s7 = inlined_call_operand.hbm [shape: bf16[1024,1024], index: 7, kind: input, shape index: {}]   ;;  %s8424_s8 = inlined_call_operand.hbm [shape: f32[1,1024], index: 8, kind: input, shape index: {}]   ;;  %s8425_s9 = inlined_call_operand.hbm [shape: bf16[1024,128], index: 9, kind: input, shape index: {}]   ;;  %s8426_s10 = inlined_call_operand.hbm [shape: f32[1,128], index: 10, kind: input, shape index: {}]   ;;  %s8427_s11 = inlined_call_operand.hbm [shape: bf16[128,128], index: 11, kind: input, shape index: {}]   ;;  %s8428_s12 = inlined_call_operand.hbm [shape: f32[1,128], index: 12, kind: input, shape index: {}]   ;;  %s8429_s13 = inlined_call_operand.vmem [shape: f32[16,128], index: 13, kind: output, shape index: {}]  }
   0x1   :  { %19 = vsyncpa [#allocation5], 0 }
   0x2   :  { %20 = vsyncpa [#allocation8], 0 }
   0x3   :  { %21 = vsyncpa [#allocation11], 0 }
   0x4   :  { %22 = vsyncpa [#allocation14], 0 }
   0x5   :  { %23 = vsyncpa [#allocation17], 0 }
   0x6   :  { %24 = vsyncpa [#allocation20], 0  ;;  %s7948_s25 = smov [#allocation4]   ;;  %s7949_s27 = smov [#allocation7]  }
   0x7   :  { %s45_s26 = sshll.u32 %s7948_s25, 4  ;;  %s67_s28 = sshll.u32 %s7949_s27, 4  ;;  %s46_s26 = int_to_ptr.vmem [resolvable:$true] %s45_s26  ;;  %s68_s28 = int_to_ptr.vmem [resolvable:$true] %s67_s28 }
   0x8   :  { %s7702_s29 = scalar_lea.vmem %s46_s26, 16  ;;  %s7706_s30 = scalar_lea.vmem %s46_s26, 32 }
   0x9   :  { %p7703_p0 = scmp.ne.s32.totalorder %s46_s26, %s7702_s29  ;;  %p7707_p1 = scmp.lt.s32.totalorder %s46_s26, %s46_s26 }
   0xa   :  { %p7708_p2 = scmp.lt.s32.totalorder %s7706_s30, %s7702_s29 }
   0xc   :  { %p7709_p3 = por %p7708_p2, %p7707_p1 }
   0xe   :  { %p7710_p4 = pnand %p7709_p3, %p7703_p0 }
  0x10   :  { %7713 = shalt.err (!%p7710_p4)
}
  0x11   :  { %48 = dma.hbm_to_vmem [thread:$0]  %s8418_s2, 16, %s46_s26, [#allocation5]  }
  0x12   :  { %s7722_s16 = scalar_lea.vmem %s68_s28, 32  ;;  %p7727_p6 = scmp.lt.s32.totalorder %s68_s28, %s68_s28 }
  0x13   :  { %p7723_p5 = scmp.ne.s32.totalorder %s68_s28, %s7722_s16  ;;  %p7728_p7 = scmp.lt.s32.totalorder %s7722_s16, %s7722_s16 }
  0x15   :  { %p7729_p8 = por %p7728_p7, %p7727_p6 }
  0x17   :  { %p7730_p9 = pnand %p7729_p8, %p7723_p5 }
  0x19   :  { %7733 = shalt.err (!%p7730_p9)
}
  0x1a   :  { %70 = dma.hbm_to_vmem [thread:$0]  %s8420_s4, 32, %s68_s28, [#allocation8]  }
  0x1b   :  { %s7950_s19 = smov [#allocation10]   ;;  %s7951_s21 = smov [#allocation13]  }
  0x1c   :  { %s89_s20 = sshll.u32 %s7950_s19, 4  ;;  %s111_s22 = sshll.u32 %s7951_s21, 4  ;;  %s90_s20 = int_to_ptr.vmem [resolvable:$true] %s89_s20  ;;  %s112_s22 = int_to_ptr.vmem [resolvable:$true] %s111_s22 }
  0x1d   :  { %s7742_s23 = scalar_lea.vmem %s90_s20, 64  ;;  %p7747_p11 = scmp.lt.s32.totalorder %s90_s20, %s90_s20 }
  0x1e   :  { %p7743_p10 = scmp.ne.s32.totalorder %s90_s20, %s7742_s23  ;;  %p7748_p12 = scmp.lt.s32.totalorder %s7742_s23, %s7742_s23 }
  0x20   :  { %p7749_p13 = por %p7748_p12, %p7747_p11 }
  0x22   :  { %p7750_p0 = pnand %p7749_p13, %p7743_p10 }
  0x24   :  { %7753 = shalt.err (!%p7750_p0)
}
  0x25   :  { %92 = dma.hbm_to_vmem [thread:$0]  %s8422_s6, 64, %s90_s20, [#allocation11]  }
  0x26   :  { %s7762_s25 = scalar_lea.vmem %s112_s22, 128  ;;  %p7767_p2 = scmp.lt.s32.totalorder %s112_s22, %s112_s22 }
  0x27   :  { %p7763_p1 = scmp.ne.s32.totalorder %s112_s22, %s7762_s25  ;;  %p7768_p3 = scmp.lt.s32.totalorder %s7762_s25, %s7762_s25 }
  0x29   :  { %p7769_p4 = por %p7768_p3, %p7767_p2 }
  0x2b   :  { %p7770_p5 = pnand %p7769_p4, %p7763_p1 }
  0x2d   :  { %7773 = shalt.err (!%p7770_p5)
}
  0x2e   :  { %114 = dma.hbm_to_vmem [thread:$0]  %s8424_s8, 128, %s112_s22, [#allocation14]  }
  0x2f   :  { %s7952_s27 = smov [#allocation16]   ;;  %s7953_s29 = smov [#allocation2]  }
  0x30   :  { %s133_s28 = sshll.u32 %s7952_s27, 4  ;;  %s32_s30 = sshll.u32 %s7953_s29, 4  ;;  %s134_s28 = int_to_ptr.vmem [resolvable:$true] %s133_s28  ;;  %s33_s30 = int_to_ptr.vmem [resolvable:$true] %s32_s30 }
  0x31   :  { %s7782_s14 = scalar_lea.vmem %s134_s28, 16  ;;  %s7786_s6 = scalar_lea.vmem %s134_s28, 32 }
  0x32   :  { %p7783_p6 = scmp.ne.s32.totalorder %s134_s28, %s7782_s14  ;;  %p7787_p7 = scmp.lt.s32.totalorder %s134_s28, %s134_s28 }
  0x33   :  { %p7788_p8 = scmp.lt.s32.totalorder %s7786_s6, %s7782_s14 }
  0x35   :  { %p7789_p9 = por %p7788_p8, %p7787_p7 }
  0x37   :  { %p7790_p10 = pnand %p7789_p9, %p7783_p6 }
  0x39   :  { %7793 = shalt.err (!%p7790_p10)
}
  0x3a   :  { %136 = dma.hbm_to_vmem [thread:$0]  %s8426_s10, 16, %s134_s28, [#allocation17]  }
  0x3b   :  { %s7802_s17 = scalar_lea.vmem %s33_s30, 128  ;;  %p7807_p12 = scmp.lt.s32.totalorder %s33_s30, %s33_s30 }
  0x3c   :  { %p7803_p11 = scmp.ne.s32.totalorder %s33_s30, %s7802_s17  ;;  %p7808_p13 = scmp.lt.s32.totalorder %s7802_s17, %s7802_s17 }
  0x3e   :  { %p7809_p0 = por %p7808_p13, %p7807_p12 }
  0x40   :  { %p7810_p1 = pnand %p7809_p0, %p7803_p11 }
  0x42   :  { %7813 = shalt.err (!%p7810_p1)
}
  0x43   :  { %s7954_s8 = smov 64   ;;  %s7955_s18 = smov 4  }
  0x44   :  { %38 = dma.hbm_to_vmem [thread:$0]  %s8417_s1, 128, %s33_s30, [#allocation3], %s7954_s8, %s7954_s8, %s7955_s18  }
  0x45   :  { %s7956_s21 = smov [#allocation6]  }
  0x46   :  { %s54_s22 = sshll.u32 %s7956_s21, 4  ;;  %s55_s22 = int_to_ptr.vmem [resolvable:$true] %s54_s22 }
  0x47   :  { %s7822_s10 = scalar_lea.vmem %s55_s22, 4096  ;;  %p7827_p3 = scmp.lt.s32.totalorder %s55_s22, %s55_s22 }
  0x48   :  { %p7823_p2 = scmp.ne.s32.totalorder %s55_s22, %s7822_s10  ;;  %p7828_p4 = scmp.lt.s32.totalorder %s7822_s10, %s7822_s10 }
  0x4a   :  { %p7829_p5 = por %p7828_p4, %p7827_p3 }
  0x4c   :  { %p7830_p6 = pnand %p7829_p5, %p7823_p2 }
  0x4e   :  { %7833 = shalt.err (!%p7830_p6)
}
  0x4f   :  { %s7957_s23 = smov 128   ;;  %s7958_s2 = smov 8  }
  0x50   :  { %60 = dma.hbm_to_vmem [thread:$0]  %s8419_s3, 4096, %s55_s22, [#allocation5], %s7957_s23, %s7957_s23, %s7958_s2  }
  0x51   :  { %s7959_s4 = smov [#allocation9]  }
  0x52   :  { %s76_s26 = sshll.u32 %s7959_s4, 4  ;;  %s77_s26 = int_to_ptr.vmem [resolvable:$true] %s76_s26 }
  0x53   :  { %s7842_s1 = scalar_lea.vmem %s77_s26, 16384  ;;  %p7847_p8 = scmp.lt.s32.totalorder %s77_s26, %s77_s26 }
  0x54   :  { %p7843_p7 = scmp.ne.s32.totalorder %s77_s26, %s7842_s1  ;;  %p7848_p9 = scmp.lt.s32.totalorder %s7842_s1, %s7842_s1 }
  0x56   :  { %p7849_p10 = por %p7848_p9, %p7847_p8 }
  0x58   :  { %p7850_p11 = pnand %p7849_p10, %p7843_p7 }
  0x5a   :  { %7853 = shalt.err (!%p7850_p11)
}
  0x5b   :  { %s7960_s27 = smov 256   ;;  %s7961_s28 = smov 16  }
  0x5c   :  { %82 = dma.hbm_to_vmem [thread:$0]  %s8421_s5, 16384, %s77_s26, [#allocation8], %s7960_s27, %s7960_s27, %s7961_s28  }
  0x5d   :  { %s7962_s14 = smov [#allocation12]  }
  0x5e   :  { %s98_s6 = sshll.u32 %s7962_s14, 4  ;;  %s99_s6 = int_to_ptr.vmem [resolvable:$true] %s98_s6 }
  0x5f   :  { %s7862_s3 = scalar_lea.vmem %s99_s6, 65536  ;;  %p7867_p13 = scmp.lt.s32.totalorder %s99_s6, %s99_s6 }
  0x60   :  { %p7863_p12 = scmp.ne.s32.totalorder %s99_s6, %s7862_s3  ;;  %p7868_p0 = scmp.lt.s32.totalorder %s7862_s3, %s7862_s3 }
  0x62   :  { %p7869_p1 = por %p7868_p0, %p7867_p13 }
  0x64   :  { %p7870_p2 = pnand %p7869_p1, %p7863_p12 }
  0x66   :  { %7873 = shalt.err (!%p7870_p2)
}
  0x67   :  { %s7963_s15 = smov 512   ;;  %s7964_s16 = smov 32  }
  0x68   :  { %104 = dma.hbm_to_vmem [thread:$0]  %s8423_s7, 65536, %s99_s6, [#allocation11], %s7963_s15, %s7963_s15, %s7964_s16  }
  0x69   :  { %s7965_s20 = smov [#allocation15]   ;;  %s7966_s5 = smov [#allocation18]  }
  0x6a   :  { %s120_s21 = sshll.u32 %s7965_s20, 4  ;;  %s142_s22 = sshll.u32 %s7966_s5, 4  ;;  %s121_s21 = int_to_ptr.vmem [resolvable:$true] %s120_s21  ;;  %s143_s22 = int_to_ptr.vmem [resolvable:$true] %s142_s22 }
  0x6b   :  { %s7882_s10 = scalar_lea.vmem %s121_s21, 8192  ;;  %p7887_p4 = scmp.lt.s32.totalorder %s121_s21, %s121_s21 }
  0x6c   :  { %p7883_p3 = scmp.ne.s32.totalorder %s121_s21, %s7882_s10  ;;  %p7888_p5 = scmp.lt.s32.totalorder %s7882_s10, %s7882_s10 }
  0x6e   :  { %p7889_p6 = por %p7888_p5, %p7887_p4 }
  0x70   :  { %p7890_p7 = pnand %p7889_p6, %p7883_p3 }
  0x72   :  { %7893 = shalt.err (!%p7890_p7)
}
  0x73   :  { %126 = dma.hbm_to_vmem [thread:$0]  %s8425_s9, 8192, %s121_s21, [#allocation14], %s7954_s8, %s7954_s8, %s7955_s18  }
  0x74   :  { %s7902_s7 = scalar_lea.vmem %s143_s22, 1024  ;;  %p7907_p9 = scmp.lt.s32.totalorder %s143_s22, %s143_s22 }
  0x75   :  { %p7903_p8 = scmp.ne.s32.totalorder %s143_s22, %s7902_s7  ;;  %p7908_p10 = scmp.lt.s32.totalorder %s7902_s7, %s7902_s7 }
  0x77   :  { %p7909_p11 = por %p7908_p10, %p7907_p9 }
  0x79   :  { %p7910_p12 = pnand %p7909_p11, %p7903_p8 }
  0x7b   :  { %7913 = shalt.err (!%p7910_p12)
}
  0x7c   :  { %148 = dma.hbm_to_vmem [thread:$0]  %s8427_s11, 1024, %s143_s22, [#allocation17], %s7954_s8, %s7954_s8, %s7955_s18  }
  0x7d   :  { %s7967_s4 = smov [#allocation19]  }
  0x7e   :  { %s155_s26 = sshll.u32 %s7967_s4, 4  ;;  %s156_s26 = int_to_ptr.vmem [resolvable:$true] %s155_s26 }
  0x7f   :  { %s7922_s1 = scalar_lea.vmem %s156_s26, 16  ;;  %s7926_s9 = scalar_lea.vmem %s156_s26, 32 }
  0x80   :  { %p7923_p13 = scmp.ne.s32.totalorder %s156_s26, %s7922_s1  ;;  %p7927_p0 = scmp.lt.s32.totalorder %s156_s26, %s156_s26 }
  0x81   :  { %p7928_p1 = scmp.lt.s32.totalorder %s7926_s9, %s7922_s1 }
  0x83   :  { %p7929_p2 = por %p7928_p1, %p7927_p0 }
  0x85   :  { %p7930_p3 = pnand %p7929_p2, %p7923_p13 }
  0x87   :  { %7933 = shalt.err (!%p7930_p3)
}
  0x88   :  { %158 = dma.hbm_to_vmem [thread:$0]  %s8428_s12, 16, %s156_s26, [#allocation20]  }
  0x89   :  { %7934 = dma.done.wait [#allocation3], 128  }
  0x8a   :  { %7935 = vsyncadd [#allocation3], 4294967168 }
  0x8b   :  { %7936 = dma.done.wait [#allocation5], 4112  }
  0x8c   :  { %7937 = vsyncadd [#allocation5], 4294963184 }
  0x8d   :  { %7938 = dma.done.wait [#allocation8], 16416  }
  0x8e   :  { %7939 = vsyncadd [#allocation8], 4294950880 }
  0x8f   :  { %7940 = dma.done.wait [#allocation11], 65600  }
  0x90   :  { %7941 = vsyncadd [#allocation11], 4294901696 }
  0x91   :  { %7942 = dma.done.wait [#allocation14], 8320  }
  0x92   :  { %7943 = vsyncadd [#allocation14], 4294958976 }
  0x93   :  { %7944 = dma.done.wait [#allocation17], 1040  }
  0x94   :  { %7945 = vsyncadd [#allocation17], 4294966256 }
  0x95   :  { %7946 = dma.done.wait [#allocation20], 16  }
  0x96   :  { %7947 = vsyncadd [#allocation20], 4294967280  ;;  %v7373_v0 = vld [vmem:[#allocation2] sm:$0xff]   ;;  %vm267_vm0 = vcmask 130048   ;;  %v7375_v2 = vld [vmem:[%s8416_s0 + $0x8] sm:$0xff]   ;;  %vm7969_vm1 = vmmov 0  }
  0x97   :  { %v7374_v1 = vld [vmem:[%s8416_s0] sm:$0xff]   ;;  %7313 = vmatprep.subr.bf16.mxu0 %v7373_v0  ;;  %v7376_v3 = vld [vmem:[%s8416_s0 + $0x10] sm:$0xff]   ;;  %v7377_v4 = vld [vmem:[%s8416_s0 + $0x18] sm:$0xff]  }
  0x98   :  { %7314 = vmatpush3.bf16.msra.mxu0 %v7373_v0  ;;  %7315 = vmatprep.mubr.msk.bf16.mxu0 %vm267_vm0, %v7374_v1  ;;  %v7382_v5 = vld [vmem:[#allocation6 + $0x74] ss:$8 sps:$4 sm:$0xff]   ;;  %v7384_v6 = vld [vmem:[#allocation6 + $0x70] ss:$8 sps:$4 sm:$0xff]   ;;  %v7385_v8 = vld [vmem:[#allocation6 + $0x64] ss:$8 sps:$4 sm:$0xff]  }
  0x99   :  { %v7378_v7 = vld [vmem:[%s8416_s0 + $0x20] sm:$0xff]   ;;  %633 = vmatprep.subr.bf16.mxu1 %v7382_v5  ;;  %v7387_v9 = vld [vmem:[#allocation6 + $0x60] ss:$8 sps:$4 sm:$0xff]   ;;  %v7391_v13 = vld [vmem:[#allocation6 + $0x44] ss:$8 sps:$4 sm:$0xff]  }
  0x9a   :  { %634 = vmatpush1.bf16.msra.mxu1 %v7384_v6  ;;  %v7388_v10 = vld [vmem:[#allocation6 + $0x54] ss:$8 sps:$4 sm:$0xff]   ;;  %v7390_v12 = vld [vmem:[#allocation6 + $0x50] ss:$8 sps:$4 sm:$0xff]   ;;  %v7380_v14 = vld [vmem:[%s8416_s0 + $0x30] sm:$0xff]  }
  0x9b   :  { %7316 = vmatmul.mubr.msk.bf16.vlgmr.msra.gmra.mxu0 %vm267_vm0, %v7375_v2  ;;  %635 = vmatprep.subr.bf16.mxu1 %v7385_v8  ;;  %v7379_v11 = vld [vmem:[%s8416_s0 + $0x28] sm:$0xff]   ;;  %v7396_v17 = vld [vmem:[#allocation6 + $0x30] ss:$8 sps:$4 sm:$0xff]  }
  0x9c   :  { %7319 = vmatprep.mubr.msk.bf16.mxu0 %vm267_vm0, %v7376_v3  ;;  %v7393_v15 = vld [vmem:[#allocation6 + $0x40] ss:$8 sps:$4 sm:$0xff]   ;;  %v7394_v16 = vld [vmem:[#allocation6 + $0x34] ss:$8 sps:$4 sm:$0xff]   ;;  %v7397_v18 = vld [vmem:[#allocation6 + $0x24] ss:$8 sps:$4 sm:$0xff]  }
  0x9d   :  { %v7381_v19 = vld [vmem:[%s8416_s0 + $0x38] sm:$0xff]   ;;  %v7399_v20 = vld [vmem:[#allocation6 + $0x20] ss:$8 sps:$4 sm:$0xff]  }
  0x9e   :  { %636 = vmatpush1.bf16.msra.mxu1 %v7387_v9  ;;  %v7400_v21 = vld [vmem:[#allocation6 + $0x14] ss:$8 sps:$4 sm:$0xff]   ;;  %v7402_v22 = vld [vmem:[#allocation6 + $0x10] ss:$8 sps:$4 sm:$0xff]   ;;  %v7403_v23 = vld [vmem:[#allocation6 + $0x4] ss:$8 sps:$4 sm:$0xff]  }
  0x9f   :  { %637 = vmatprep.subr.bf16.mxu1 %v7388_v10  ;;  %v7405_v24 = vld [vmem:[#allocation6] ss:$8 sps:$4 sm:$0xff]   ;;  %v7406_v25 = vld [vmem:[#allocation6 + $0xf4] ss:$8 sps:$4 sm:$0xff]   ;;  %v7408_v26 = vld [vmem:[#allocation6 + $0xf0] ss:$8 sps:$4 sm:$0xff]  }
  0xa0   :  { %v7409_v27 = vld [vmem:[#allocation6 + $0xe4] ss:$8 sps:$4 sm:$0xff]   ;;  %v7411_v28 = vld [vmem:[#allocation6 + $0xe0] ss:$8 sps:$4 sm:$0xff]   ;;  %v7412_v29 = vld [vmem:[#allocation6 + $0xd4] ss:$8 sps:$4 sm:$0xff]  }
  0xa1   :  { %v7414_v30 = vld [vmem:[#allocation6 + $0xd0] ss:$8 sps:$4 sm:$0xff]   ;;  %v7415_v31 = vld [vmem:[#allocation6 + $0xc4] ss:$8 sps:$4 sm:$0xff]   ;;  %v7417_v32 = vld [vmem:[#allocation6 + $0xc0] ss:$8 sps:$4 sm:$0xff]  }
  0xa2   :  { %638 = vmatpush1.bf16.msra.mxu1 %v7390_v12  ;;  %v7418_v33 = vld [vmem:[#allocation6 + $0xb4] ss:$8 sps:$4 sm:$0xff]   ;;  %v7420_v34 = vld [vmem:[#allocation6 + $0xb0] ss:$8 sps:$4 sm:$0xff]   ;;  %v7421_v35 = vld [vmem:[#allocation6 + $0xa4] ss:$8 sps:$4 sm:$0xff]  }
  0xa3   :  { %7320 = vmatmul.mubr.msk.bf16.gmra.mxu0 %vm267_vm0, %v7377_v4  ;;  %639 = vmatprep.subr.bf16.mxu1 %v7391_v13  ;;  %v7423_v36 = vld [vmem:[#allocation6 + $0xa0] ss:$8 sps:$4 sm:$0xff]   ;;  %v7424_v37 = vld [vmem:[#allocation6 + $0x94] ss:$8 sps:$4 sm:$0xff]   ;;  %v7426_v38 = vld [vmem:[#allocation6 + $0x90] ss:$8 sps:$4 sm:$0xff]  }
  0xa4   :  { %7323 = vmatprep.mubr.msk.bf16.mxu0 %vm267_vm0, %v7378_v7  ;;  %v7427_v39 = vld [vmem:[#allocation6 + $0x84] ss:$8 sps:$4 sm:$0xff]   ;;  %v7429_v40 = vld [vmem:[#allocation6 + $0x80] ss:$8 sps:$4 sm:$0xff]   ;;  %v8121_v13 = vld [vmem:[#allocation4] ss:$0 sm:$0xff] }
  0xa5   :  { %v7430_v41 = vld [vmem:[#allocation9 + $0xe0] ss:$16 sps:$4 sm:$0xff]   ;;  %v7432_v42 = vld [vmem:[#allocation9 + $0xe4] ss:$16 sps:$4 sm:$0xff]  }
  0xa6   :  { %640 = vmatpush1.bf16.msra.mxu1 %v7393_v15  ;;  %v7435_v43 = vld [vmem:[#allocation9 + $0xc4] ss:$16 sps:$4 sm:$0xff]   ;;  %1536 = vmatprep.subr.bf16.mxu0 %v7432_v42  ;;  %v7433_v44 = vld [vmem:[#allocation9 + $0xc0] ss:$16 sps:$4 sm:$0xff]  }
  0xa7   :  { %641 = vmatprep.subr.bf16.mxu1 %v7394_v16  ;;  %1537 = vmatpush1.bf16.msra.mxu0 %v7430_v41  ;;  %v7447_v45 = vld [vmem:[#allocation9 + $0x2e4] ss:$16 sps:$4 sm:$0xff]   ;;  %v7436_v47 = vld [vmem:[#allocation9 + $0xa0] ss:$16 sps:$4 sm:$0xff]  }
  0xa8   :  { %1538 = vmatprep.subr.bf16.mxu0 %v7435_v43  ;;  %v7438_v46 = vld [vmem:[#allocation9 + $0xa4] ss:$16 sps:$4 sm:$0xff]   ;;  %v7439_v49 = vld [vmem:[#allocation9 + $0x80] ss:$16 sps:$4 sm:$0xff]  }
  0xa9   :  { %v7441_v48 = vld [vmem:[#allocation9 + $0x84] ss:$16 sps:$4 sm:$0xff]   ;;  %v7442_v51 = vld [vmem:[#allocation9 + $0x60] ss:$16 sps:$4 sm:$0xff]  }
  0xaa   :  { %642 = vmatpush1.bf16.msra.mxu1 %v7396_v17  ;;  %v7444_v50 = vld [vmem:[#allocation9 + $0x64] ss:$16 sps:$4 sm:$0xff]   ;;  %v7448_v53 = vld [vmem:[#allocation9 + $0x40] ss:$16 sps:$4 sm:$0xff]  }
  0xab   :  { %7324 = vmatmul.mubr.msk.bf16.gmra.mxu0 %vm267_vm0, %v7379_v11  ;;  %643 = vmatprep.subr.bf16.mxu1 %v7397_v18  ;;  %v7450_v52 = vld [vmem:[#allocation9 + $0x44] ss:$16 sps:$4 sm:$0xff]   ;;  %v7454_v55 = vld [vmem:[#allocation9 + $0x20] ss:$16 sps:$4 sm:$0xff]  }
  0xac   :  { %7327 = vmatprep.mubr.msk.bf16.mxu0 %vm267_vm0, %v7380_v14  ;;  %1539 = vmatpush1.bf16.msra.mxu0 %v7433_v44  ;;  %v7456_v54 = vld [vmem:[#allocation9 + $0x24] ss:$16 sps:$4 sm:$0xff]   ;;  %v7460_v57 = vld [vmem:[#allocation9] ss:$16 sps:$4 sm:$0xff]  }
  0xad   :  { %1540 = vmatprep.subr.bf16.mxu0 %v7438_v46  ;;  %v7462_v56 = vld [vmem:[#allocation9 + $0x4] ss:$16 sps:$4 sm:$0xff]   ;;  %v7466_v59 = vld [vmem:[#allocation9 + $0x1e0] ss:$16 sps:$4 sm:$0xff]  }
  0xae   :  { %644 = vmatpush1.bf16.msra.mxu1 %v7399_v20  ;;  %v7468_v58 = vld [vmem:[#allocation9 + $0x1e4] ss:$16 sps:$4 sm:$0xff]   ;;  %v7472_v61 = vld [vmem:[#allocation9 + $0x1c0] ss:$16 sps:$4 sm:$0xff]  }
  0xaf   :  { %645 = vmatprep.subr.bf16.mxu1 %v7400_v21  ;;  %v7474_v60 = vld [vmem:[#allocation9 + $0x1c4] ss:$16 sps:$4 sm:$0xff]   ;;  %v7478_v63 = vld [vmem:[#allocation9 + $0x1a0] ss:$16 sps:$4 sm:$0xff]  }
  0xb0   :  { %1541 = vmatpush1.bf16.msra.mxu0 %v7436_v47  ;;  %v7480_v62 = vld [vmem:[#allocation9 + $0x1a4] ss:$16 sps:$4 sm:$0xff]   ;;  %v7484_v1 = vld [vmem:[#allocation9 + $0x180] ss:$16 sps:$4 sm:$0xff]  }
  0xb1   :  { %1542 = vmatprep.subr.bf16.mxu0 %v7441_v48  ;;  %v7486_v0 = vld [vmem:[#allocation9 + $0x184] ss:$16 sps:$4 sm:$0xff]   ;;  %v7490_v3 = vld [vmem:[#allocation9 + $0x160] ss:$16 sps:$4 sm:$0xff]  }
  0xb2   :  { %646 = vmatpush1.bf16.msra.mxu1 %v7402_v22  ;;  %v7492_v2 = vld [vmem:[#allocation9 + $0x164] ss:$16 sps:$4 sm:$0xff]   ;;  %v7445_v42 = vld [vmem:[#allocation9 + $0x2e0] ss:$16 sps:$4 sm:$0xff]  }
  0xb3   :  { %7328 = vmatmul.mubr.msk.bf16.gmra.mxu0 %vm267_vm0, %v7381_v19  ;;  %647 = vmatprep.subr.bf16.mxu1 %v7403_v23  ;;  %v7453_v46 = vld [vmem:[#allocation9 + $0x2c4] ss:$16 sps:$4 sm:$0xff]  }
  0xb4   :  { %1543 = vmatpush1.bf16.msra.mxu0 %v7439_v49 }
  0xb5   :  { %1544 = vmatprep.subr.bf16.mxu0 %v7444_v50 }
  0xb6   :  { %648 = vmatpush1.bf16.msra.mxu1 %v7405_v24 }
  0xb7   :  { %649 = vmatprep.subr.bf16.mxu1 %v7406_v25 }
  0xb8   :  { %1545 = vmatpush1.bf16.msra.mxu0 %v7442_v51 }
  0xb9   :  { %1546 = vmatprep.subr.bf16.mxu0 %v7450_v52  ;;  %v7451_v52 = vld [vmem:[#allocation9 + $0x2c0] ss:$16 sps:$4 sm:$0xff]  }
  0xba   :  { %650 = vmatpush2.bf16.msra.mxu1 %v7408_v26 }
  0xbb   :  { %651 = vmatprep.subr.bf16.mxu1 %v7409_v27 }
  0xbc   :  { %1547 = vmatpush1.bf16.msra.mxu0 %v7448_v53 }
  0xbd   :  { %1548 = vmatprep.subr.bf16.mxu0 %v7456_v54 }
  0xbe   :  { %652 = vmatpush2.bf16.msra.mxu1 %v7411_v28 }
  0xbf   :  { %653 = vmatprep.subr.bf16.mxu1 %v7412_v29 }
  0xc0   :  { %1549 = vmatpush1.bf16.msra.mxu0 %v7454_v55  ;;  %v7459_v55 = vld [vmem:[#allocation9 + $0x2a4] ss:$16 sps:$4 sm:$0xff]  }
  0xc1   :  { %1550 = vmatprep.subr.bf16.mxu0 %v7462_v56 }
  0xc2   :  { %654 = vmatpush2.bf16.msra.mxu1 %v7414_v30 }
  0xc3   :  { %655 = vmatprep.subr.bf16.mxu1 %v7415_v31 }
  0xc4   :  { %1551 = vmatpush1.bf16.msra.mxu0 %v7460_v57 }
  0xc5   :  { %1552 = vmatprep.subr.bf16.mxu0 %v7468_v58 }
  0xc6   :  { %656 = vmatpush2.bf16.msra.mxu1 %v7417_v32 }
  0xc7   :  { %657 = vmatprep.subr.bf16.mxu1 %v7418_v33 }
  0xc8   :  { %1553 = vmatpush2.bf16.msra.mxu0 %v7466_v59 }
  0xc9   :  { %1554 = vmatprep.subr.bf16.mxu0 %v7474_v60 }
  0xca   :  { %658 = vmatpush2.bf16.msra.mxu1 %v7420_v34 }
  0xcb   :  { %659 = vmatprep.subr.bf16.mxu1 %v7421_v35 }
  0xcc   :  { %1555 = vmatpush2.bf16.msra.mxu0 %v7472_v61 }
  0xcd   :  { %1556 = vmatprep.subr.bf16.mxu0 %v7480_v62  ;;  %v7457_v62 = vld [vmem:[#allocation9 + $0x2a0] ss:$16 sps:$4 sm:$0xff]  }
  0xce   :  { %660 = vmatpush2.bf16.msra.mxu1 %v7423_v36 }
  0xcf   :  { %661 = vmatprep.subr.bf16.mxu1 %v7424_v37 }
  0xd0   :  { %1557 = vmatpush2.bf16.msra.mxu0 %v7478_v63 }
  0xd1   :  { %1558 = vmatprep.subr.bf16.mxu0 %v7486_v0 }
  0xd2   :  { %662 = vmatpush2.bf16.msra.mxu1 %v7426_v38 }
  0xd3   :  { %663 = vmatprep.subr.bf16.mxu1 %v7427_v39 }
  0xd4   :  { %1559 = vmatpush2.bf16.msra.mxu0 %v7484_v1  ;;  %v7465_v1 = vld [vmem:[#allocation9 + $0x284] ss:$16 sps:$4 sm:$0xff]  }
  0xd5   :  { %1560 = vmatprep.subr.bf16.mxu0 %v7492_v2 }
  0xd6   :  { %664 = vmatpush2.bf16.msra.mxu1 %v7429_v40 }
  0xd7   :  { %1589 = vmatprep.subr.bf16.mxu1 %v7447_v45 }
  0xd8   :  { %1561 = vmatpush2.bf16.msra.mxu0 %v7490_v3 }
 0x15b   :  { %v7317_v4 = vpop.f32.mrf.mxu0 }
 0x15c   :  { %v335_v37 = vadd.f32 %v7317_v4, %v8121_v13 }
 0x15d   :  { %v326_v5 = vpop.f32.mrf.mxu0 }
 0x15e   :  { %v327_v17 = vadd.f32 %v8121_v13, %v326_v5  ;;  %v391_v50 = vmul.f32 0.2, %v335_v37 }
 0x15f   :  { %v7318_v6 = vpop.f32.mrf.mxu0 }
 0x160   :  { %v389_v26 = vmul.f32 0.2, %v327_v17  ;;  %v338_v30 = vadd.f32 %v7318_v6, %v8121_v13  ;;  %v407_v60 = vmax.f32 %v335_v37, %v391_v50  ;;  %v7463_v6 = vld [vmem:[#allocation9 + $0x280] ss:$16 sps:$4 sm:$0xff]  }
 0x161   :  { %v329_v7 = vpop.f32.mrf.mxu0  ;;  %v7505_v37 = vld [vmem:[#allocation9 + $0x3a0] ss:$16 sps:$4 sm:$0xff]  }
 0x162   :  { %v330_v14 = vadd.f32 %v8121_v13, %v329_v7  ;;  %v405_v38 = vmax.f32 %v327_v17, %v389_v26  ;;  %v392_v43 = vmul.f32 0.2, %v338_v30  ;;  %v7469_v17 = vld [vmem:[#allocation9 + $0x260] ss:$16 sps:$4 sm:$0xff]  }
 0x163   :  { %v8117_v8 = vpop.f32.mrf.mxu0  ;;  %v7481_v26 = vld [vmem:[#allocation9 + $0x220] ss:$16 sps:$4 sm:$0xff]  }
 0x164   :  { %v390_v21 = vmul.f32 0.2, %v330_v14  ;;  %v408_v53 = vmax.f32 %v338_v30, %v392_v43  ;;  %v7498_v30 = vld [vmem:[#allocation9 + $0x144] ss:$16 sps:$4 sm:$0xff]   ;;  %v7519_v43 = vld [vmem:[#allocation9 + $0xec] ss:$16 sps:$4 sm:$0xff]  }
 0x165   :  { %v342_v9 = vpop.f32.mrf.mxu0  ;;  %1562 = vmatprep.subr.bf16.mxu0 %v7498_v30  ;;  %v7532_v50 = vld [vmem:[#allocation9 + $0x300] ss:$16 sps:$4 sm:$0xff]  }
 0x166   :  { %v406_v31 = vmax.f32 %v330_v14, %v390_v21  ;;  %v343_v61 = vadd.f32 %v8121_v13, %v342_v9  ;;  %v422_v0 = vpack.c.bf16 %v408_v53, %v407_v60  ;;  %v7471_v9 = vld [vmem:[#allocation9 + $0x264] ss:$16 sps:$4 sm:$0xff]  }
 0x167   :  { %v8119_v10 = vpop.f32.mrf.mxu0 }
 0x168   :  { %v421_v45 = vpack.c.bf16 %v406_v31, %v405_v38  ;;  %v393_v5 = vmul.f32 0.2, %v343_v61  ;;  %v354_v7 = vadd.f32 %v8119_v10, %v8121_v13  ;;  %v7475_v10 = vld [vmem:[#allocation9 + $0x240] ss:$16 sps:$4 sm:$0xff]   ;;  %v7501_v31 = vld [vmem:[#allocation9 + $0x3c4] ss:$16 sps:$4 sm:$0xff]  }
 0x169   :  { %v345_v11 = vpop.f32.mrf.mxu0  ;;  %v7510_v38 = vld [vmem:[#allocation9 + $0x104] ss:$16 sps:$4 sm:$0xff]  }
 0x16a   :  { %v346_v54 = vadd.f32 %v8121_v13, %v345_v11 }
 0x16b   :  { %v7325_v12 = vpop.f32.mrf.mxu0 }
 0x16c   :  { %v367_v19 = vadd.f32 %v7325_v12, %v8121_v13  ;;  %v394_v63 = vmul.f32 0.2, %v346_v54 }
 0x16d   :  { %v358_v15 = vpop.f32.mrf.mxu0 }
 0x16e   :  { %v359_v16 = vadd.f32 %v8121_v13, %v358_v15  ;;  %v399_v28 = vmul.f32 0.2, %v367_v19  ;;  %v410_v11 = vmax.f32 %v346_v54, %v394_v63  ;;  %v351_v15 = vadd.f32 %v8117_v8, %v8121_v13 }
 0x16f   :  { %v7326_v18 = vpop.f32.mrf.mxu0 }
 0x170   :  { %v370_v20 = vadd.f32 %v7326_v18, %v8121_v13  ;;  %v397_v23 = vmul.f32 0.2, %v359_v16  ;;  %v415_v40 = vmax.f32 %v367_v19, %v399_v28  ;;  %v396_v18 = vmul.f32 0.2, %v354_v7  ;;  %v7495_v28 = vld [vmem:[#allocation9 + $0x3e4] ss:$16 sps:$4 sm:$0xff]  }
 0x171   :  { %v361_v22 = vpop.f32.mrf.mxu0 }
 0x172   :  { %v400_v24 = vmul.f32 0.2, %v370_v20  ;;  %v362_v25 = vadd.f32 %v8121_v13, %v361_v22  ;;  %v413_v35 = vmax.f32 %v359_v16, %v397_v23  ;;  %v409_v16 = vmax.f32 %v343_v61, %v393_v5 }
 0x173   :  { %v7329_v27 = vpop.f32.mrf.mxu0  ;;  %v395_v22 = vmul.f32 0.2, %v351_v15  ;;  %v412_v23 = vmax.f32 %v354_v7, %v396_v18 }
 0x174   :  { %v398_v29 = vmul.f32 0.2, %v362_v25  ;;  %v416_v33 = vmax.f32 %v370_v20, %v400_v24  ;;  %v383_v56 = vadd.f32 %v7329_v27, %v8121_v13  ;;  %v423_v19 = vpack.c.bf16 %v410_v11, %v409_v16  ;;  %v7477_v20 = vld [vmem:[#allocation9 + $0x244] ss:$16 sps:$4 sm:$0xff]   ;;  %v7487_v27 = vld [vmem:[#allocation9 + $0x200] ss:$16 sps:$4 sm:$0xff]  }
 0x175   :  { %v374_v32 = vpop.f32.mrf.mxu0  ;;  %v7483_v24 = vld [vmem:[#allocation9 + $0x224] ss:$16 sps:$4 sm:$0xff]  }
 0x176   :  { %v375_v34 = vadd.f32 %v8121_v13, %v374_v32  ;;  %v414_v36 = vmax.f32 %v362_v25, %v398_v29  ;;  %v426_v49 = vpack.c.bf16 %v416_v33, %v415_v40  ;;  %v403_v2 = vmul.f32 0.2, %v383_v56  ;;  %v7493_v29 = vld [vmem:[#allocation9 + $0x3e0] ss:$16 sps:$4 sm:$0xff]  }
 0x177   :  { %v7330_v39 = vpop.f32.mrf.mxu0  ;;  %v411_v25 = vmax.f32 %v351_v15, %v395_v22  ;;  %v7496_v32 = vld [vmem:[#allocation9 + $0x140] ss:$16 sps:$4 sm:$0xff]  }
 0x178   :  { %v425_v41 = vpack.c.bf16 %v414_v36, %v413_v35  ;;  %v401_v47 = vmul.f32 0.2, %v375_v34  ;;  %v386_v58 = vadd.f32 %v7330_v39, %v8121_v13  ;;  %v419_v12 = vmax.f32 %v383_v56, %v403_v2  ;;  %v7499_v33 = vld [vmem:[#allocation9 + $0x3c0] ss:$16 sps:$4 sm:$0xff]   ;;  %1563 = vmatpush2.bf16.msra.mxu0 %v7496_v32  ;;  %v7507_v35 = vld [vmem:[#allocation9 + $0x3a4] ss:$16 sps:$4 sm:$0xff]  }
 0x179   :  { %v377_v44 = vpop.f32.mrf.mxu0  ;;  %v424_v8 = vpack.c.bf16 %v412_v23, %v411_v25  ;;  %v7502_v36 = vld [vmem:[#allocation9 + $0x120] ss:$16 sps:$4 sm:$0xff]   ;;  %v7513_v39 = vld [vmem:[#allocation9 + $0x384] ss:$16 sps:$4 sm:$0xff]   ;;  %v461_v56 = vld [vmem:[#allocation7] sm:$0x3] }
 0x17a   :  { %v378_v48 = vadd.f32 %v8121_v13, %v377_v44  ;;  %665 = vmatprep.mubr.bf16.mxu1 %v425_v41  ;;  %v417_v57 = vmax.f32 %v375_v34, %v401_v47  ;;  %v404_v3 = vmul.f32 0.2, %v386_v58  ;;  %v7489_v13 = vld [vmem:[#allocation9 + $0x204] ss:$16 sps:$4 sm:$0xff]   ;;  %v7508_v40 = vld [vmem:[#allocation9 + $0x100] ss:$16 sps:$4 sm:$0xff]  }
 0x17b   :  { %666 = vmatmul.mubr.bf16.vlgmr.msra.gmra.mxu1 %v421_v45  ;;  %v7504_v34 = vld [vmem:[#allocation9 + $0x124] ss:$16 sps:$4 sm:$0xff]   ;;  %v7511_v41 = vld [vmem:[#allocation9 + $0x380] ss:$16 sps:$4 sm:$0xff]   ;;  %v7525_v23 = vld [vmem:[#allocation9 + $0xcc] ss:$16 sps:$4 sm:$0xff]  }
 0x17c   :  { %v402_v51 = vmul.f32 0.2, %v378_v48  ;;  %675 = vmatprep.mubr.bf16.mxu1 %v426_v49  ;;  %1590 = vmatpush1.bf16.msra.mxu1 %v7445_v42  ;;  %v420_v14 = vmax.f32 %v386_v58, %v404_v3  ;;  %v7516_v42 = vld [vmem:[#allocation9 + $0x364] ss:$16 sps:$4 sm:$0xff]   ;;  %v7514_v44 = vld [vmem:[#allocation9 + $0x360] ss:$16 sps:$4 sm:$0xff]  }
 0x17d   :  { %1591 = vmatprep.subr.bf16.mxu1 %v7453_v46  ;;  %1564 = vmatprep.subr.bf16.mxu0 %v7504_v34  ;;  %v7522_v45 = vld [vmem:[#allocation9 + $0x344] ss:$16 sps:$4 sm:$0xff]   ;;  %v7520_v46 = vld [vmem:[#allocation9 + $0x340] ss:$16 sps:$4 sm:$0xff]  }
 0x17e   :  { %v418_v59 = vmax.f32 %v378_v48, %v402_v51  ;;  %v428_v21 = vpack.c.bf16 %v420_v14, %v419_v12  ;;  %1565 = vmatpush2.bf16.msra.mxu0 %v7502_v36  ;;  %v7528_v47 = vld [vmem:[#allocation9 + $0x324] ss:$16 sps:$4 sm:$0xff]   ;;  %v7526_v48 = vld [vmem:[#allocation9 + $0x320] ss:$16 sps:$4 sm:$0xff]   ;;  %v7543_v51 = vld [vmem:[#allocation9 + $0x2ec] ss:$16 sps:$4 sm:$0xff]  }
 0x17f   :  { %1566 = vmatprep.subr.bf16.mxu0 %v7510_v38  ;;  %v7534_v49 = vld [vmem:[#allocation9 + $0x304] ss:$16 sps:$4 sm:$0xff]  }
 0x180   :  { %1592 = vmatpush1.bf16.msra.mxu1 %v7451_v52  ;;  %v427_v4 = vpack.c.bf16 %v418_v59, %v417_v57  ;;  %v463_v52 = vlaneseq }
 0x181   :  { %1593 = vmatprep.subr.bf16.mxu1 %v7459_v55 }
 0x182   :  { %1567 = vmatpush2.bf16.msra.mxu0 %v7508_v40  ;;  %v8141_v53 = vshrl.u32 %v463_v52, 7  ;;  %v7529_v40 = vld [vmem:[#allocation9 + $0xa8] ss:$16 sps:$4 sm:$0xff]  }
 0x183   :  { %676 = vmatmul.mubr.bf16.gmra.mxu1 %v422_v0  ;;  %1642 = vmatprep.subr.bf16.mxu0 %v7519_v43  ;;  %v7537_v43 = vld [vmem:[#allocation9 + $0x8c] ss:$16 sps:$4 sm:$0xff]  }
 0x184   :  { %685 = vmatprep.mubr.bf16.mxu1 %v427_v4  ;;  %1594 = vmatpush1.bf16.msra.mxu1 %v7457_v62  ;;  %v8144_v54 = vsub.s32 1, %v8141_v53  ;;  %v8147_v55 = vsub.s32 0, %v8141_v53 }
 0x185   :  { %1595 = vmatprep.subr.bf16.mxu1 %v7465_v1 }
 0x186   :  { %v8150_v57 = vrot.slane %v461_v56, %v8144_v54  ;;  %v8153_v58 = vrot.slane %v461_v56, %v8147_v55  ;;  %v7540_v56 = vld [vmem:[#allocation9 + $0x6c] ss:$16 sps:$4 sm:$0xff]  }
 0x188   :  { %1596 = vmatpush1.bf16.msra.mxu1 %v7463_v6 }
 0x189   :  { %1597 = vmatprep.subr.bf16.mxu1 %v7471_v9 }
 0x18b   :  { %686 = vmatmul.mubr.bf16.gmra.mxu1 %v423_v19 }
 0x18c   :  { %695 = vmatprep.mubr.bf16.mxu1 %v428_v21  ;;  %1598 = vmatpush1.bf16.msra.mxu1 %v7469_v17  ;;  %v7517_v21 = vld [vmem:[#allocation9 + $0xe8] ss:$16 sps:$4 sm:$0xff]  }
 0x18d   :  { %1599 = vmatprep.subr.bf16.mxu1 %v7477_v20 }
 0x190   :  { %1600 = vmatpush1.bf16.msra.mxu1 %v7475_v10 }
 0x191   :  { %1601 = vmatprep.subr.bf16.mxu1 %v7483_v24 }
 0x193   :  { %696 = vmatmul.mubr.bf16.gmra.mxu1 %v424_v8 }
 0x194   :  { %1602 = vmatpush1.bf16.msra.mxu1 %v7481_v26 }
 0x195   :  { %1603 = vmatprep.subr.bf16.mxu1 %v7489_v13 }
 0x198   :  { %1604 = vmatpush1.bf16.msra.mxu1 %v7487_v27 }
 0x199   :  { %1605 = vmatprep.subr.bf16.mxu1 %v7495_v28  ;;  %v7523_v28 = vld [vmem:[#allocation9 + $0xc8] ss:$16 sps:$4 sm:$0xff]  }
 0x19c   :  { %1606 = vmatpush2.bf16.msra.mxu1 %v7493_v29 }
 0x19d   :  { %1607 = vmatprep.subr.bf16.mxu1 %v7501_v31  ;;  %v7531_v31 = vld [vmem:[#allocation9 + $0xac] ss:$16 sps:$4 sm:$0xff]  }
 0x1a0   :  { %1608 = vmatpush2.bf16.msra.mxu1 %v7499_v33 }
 0x1a1   :  { %1609 = vmatprep.subr.bf16.mxu1 %v7507_v35 }
 0x1a4   :  { %1610 = vmatpush2.bf16.msra.mxu1 %v7505_v37 }
 0x1a5   :  { %1611 = vmatprep.subr.bf16.mxu1 %v7513_v39 }
 0x1a8   :  { %1612 = vmatpush2.bf16.msra.mxu1 %v7511_v41 }
 0x1a9   :  { %1613 = vmatprep.subr.bf16.mxu1 %v7516_v42 }
 0x1ac   :  { %1614 = vmatpush2.bf16.msra.mxu1 %v7514_v44 }
 0x1ad   :  { %1615 = vmatprep.subr.bf16.mxu1 %v7522_v45 }
 0x1b0   :  { %1616 = vmatpush2.bf16.msra.mxu1 %v7520_v46 }
 0x1b1   :  { %1617 = vmatprep.subr.bf16.mxu1 %v7528_v47 }
 0x1b4   :  { %1618 = vmatpush2.bf16.msra.mxu1 %v7526_v48 }
 0x1b5   :  { %1619 = vmatprep.subr.bf16.mxu1 %v7534_v49 }
 0x1b8   :  { %1620 = vmatpush2.bf16.msra.mxu1 %v7532_v50  ;;  %v7535_v50 = vld [vmem:[#allocation9 + $0x88] ss:$16 sps:$4 sm:$0xff]  }
 0x1b9   :  { %1695 = vmatprep.subr.bf16.mxu1 %v7543_v51 }
 0x23b   :  { %v667_v59 = vpop.f32.mrf.mxu1 }
 0x23c   :  { %v668_v62 = vadd.f32 %v667_v59, %v8153_v58 }
 0x23d   :  { %v669_v60 = vpop.f32.mrf.mxu1 }
 0x23e   :  { %v670_v61 = vadd.f32 %v669_v60, %v8150_v57  ;;  %v706_v5 = vmul.f32 0.2, %v668_v62 }
 0x23f   :  { %v671_v63 = vpop.f32.mrf.mxu1 }
 0x240   :  { %v672_v0 = vadd.f32 %v671_v63, %v8153_v58  ;;  %v707_v2 = vmul.f32 0.2, %v670_v61  ;;  %v722_v16 = vmax.f32 %v668_v62, %v706_v5 }
 0x241   :  { %v673_v1 = vpop.f32.mrf.mxu1 }
 0x242   :  { %v708_v3 = vmul.f32 0.2, %v672_v0  ;;  %v674_v4 = vadd.f32 %v673_v1, %v8150_v57  ;;  %v723_v12 = vmax.f32 %v670_v61, %v707_v2 }
 0x243   :  { %v677_v6 = vpop.f32.mrf.mxu1 }
 0x244   :  { %v709_v7 = vmul.f32 0.2, %v674_v4  ;;  %v724_v11 = vmax.f32 %v672_v0, %v708_v3  ;;  %v678_v17 = vadd.f32 %v677_v6, %v8153_v58  ;;  %v7538_v3 = vld [vmem:[#allocation9 + $0x68] ss:$16 sps:$4 sm:$0xff]  }
 0x245   :  { %v679_v9 = vpop.f32.mrf.mxu1 }
 0x246   :  { %v725_v14 = vmax.f32 %v674_v4, %v709_v7  ;;  %v680_v15 = vadd.f32 %v679_v9, %v8150_v57  ;;  %v8162_v22 = vpack.c.bf16 %v724_v11, %v722_v16  ;;  %v710_v8 = vmul.f32 0.2, %v678_v17  ;;  %v7541_v4 = vld [vmem:[#allocation9 + $0x2e8] ss:$16 sps:$4 sm:$0xff]   ;;  %v7546_v7 = vld [vmem:[#allocation9 + $0x4c] ss:$16 sps:$4 sm:$0xff]  }
 0x247   :  { %v681_v18 = vpop.f32.mrf.mxu1  ;;  %v7549_v11 = vld [vmem:[#allocation9 + $0x2cc] ss:$16 sps:$4 sm:$0xff]  }
 0x248   :  { %v682_v19 = vadd.f32 %v681_v18, %v8153_v58  ;;  %v739_v20 = vpack.c.bf16 %v725_v14, %v723_v12  ;;  %v711_v24 = vmul.f32 0.2, %v680_v15  ;;  %v726_v35 = vmax.f32 %v678_v17, %v710_v8  ;;  %v7547_v17 = vld [vmem:[#allocation9 + $0x2c8] ss:$16 sps:$4 sm:$0xff]   ;;  %v7558_v8 = vld [vmem:[#allocation9 + $0xc] ss:$16 sps:$4 sm:$0xff]  }
 0x249   :  { %v683_v10 = vpop.f32.mrf.mxu1 }
 0x24a   :  { %v712_v25 = vmul.f32 0.2, %v682_v19  ;;  %v684_v26 = vadd.f32 %v683_v10, %v8150_v57  ;;  %1568 = vmatprep.mubr.bf16.mxu0 %v739_v20  ;;  %v727_v32 = vmax.f32 %v680_v15, %v711_v24  ;;  %v7550_v24 = vld [vmem:[#allocation9 + $0x28] ss:$16 sps:$4 sm:$0xff]  }
 0x24b   :  { %v687_v13 = vpop.f32.mrf.mxu1  ;;  %1569 = vmatmul.mubr.bf16.vlgmr.msra.gmra.mxu0 %v8162_v22 }
 0x24c   :  { %v713_v27 = vmul.f32 0.2, %v684_v26  ;;  %1643 = vmatpush1.bf16.msra.mxu0 %v7517_v21  ;;  %v728_v29 = vmax.f32 %v682_v19, %v712_v25  ;;  %v688_v36 = vadd.f32 %v687_v13, %v8153_v58  ;;  %v7552_v19 = vld [vmem:[#allocation9 + $0x2c] ss:$16 sps:$4 sm:$0xff]   ;;  %v7553_v25 = vld [vmem:[#allocation9 + $0x2a8] ss:$16 sps:$4 sm:$0xff]  }
 0x24d   :  { %v689_v30 = vpop.f32.mrf.mxu1  ;;  %1644 = vmatprep.subr.bf16.mxu0 %v7525_v23  ;;  %v7561_v13 = vld [vmem:[#allocation9 + $0x28c] ss:$16 sps:$4 sm:$0xff]  }
 0x24e   :  { %v729_v33 = vmax.f32 %v684_v26, %v713_v27  ;;  %v690_v34 = vadd.f32 %v689_v30, %v8150_v57  ;;  %v8171_v42 = vpack.c.bf16 %v728_v29, %v726_v35  ;;  %v714_v47 = vmul.f32 0.2, %v688_v36  ;;  %v7556_v27 = vld [vmem:[#allocation9 + $0x8] ss:$16 sps:$4 sm:$0xff]   ;;  %v7564_v29 = vld [vmem:[#allocation9 + $0x1ec] ss:$16 sps:$4 sm:$0xff]  }
 0x24f   :  { %v691_v37 = vpop.f32.mrf.mxu1  ;;  %v7567_v30 = vld [vmem:[#allocation9 + $0x26c] ss:$16 sps:$4 sm:$0xff]   ;;  %v7568_v35 = vld [vmem:[#allocation9 + $0x1c8] ss:$16 sps:$4 sm:$0xff]  }
 0x250   :  { %v692_v38 = vadd.f32 %v691_v37, %v8153_v58  ;;  %1645 = vmatpush1.bf16.msra.mxu0 %v7523_v28  ;;  %v8169_v39 = vpack.c.bf16 %v729_v33, %v727_v32  ;;  %v715_v44 = vmul.f32 0.2, %v690_v34  ;;  %v730_v62 = vmax.f32 %v688_v36, %v714_v47  ;;  %v7559_v28 = vld [vmem:[#allocation9 + $0x288] ss:$16 sps:$4 sm:$0xff]   ;;  %v7570_v33 = vld [vmem:[#allocation9 + $0x1cc] ss:$16 sps:$4 sm:$0xff]  }
 0x251   :  { %v693_v41 = vpop.f32.mrf.mxu1  ;;  %1646 = vmatprep.subr.bf16.mxu0 %v7531_v31  ;;  %v7562_v31 = vld [vmem:[#allocation9 + $0x1e8] ss:$16 sps:$4 sm:$0xff]   ;;  %v7576_v37 = vld [vmem:[#allocation9 + $0x1ac] ss:$16 sps:$4 sm:$0xff]  }
 0x252   :  { %v716_v45 = vmul.f32 0.2, %v692_v38  ;;  %v694_v46 = vadd.f32 %v693_v41, %v8150_v57  ;;  %1578 = vmatprep.mubr.bf16.mxu0 %v8169_v39  ;;  %v731_v59 = vmax.f32 %v690_v34, %v715_v44  ;;  %v7565_v32 = vld [vmem:[#allocation9 + $0x268] ss:$16 sps:$4 sm:$0xff]   ;;  %v7573_v34 = vld [vmem:[#allocation9 + $0x24c] ss:$16 sps:$4 sm:$0xff]  }
 0x253   :  { %v697_v48 = vpop.f32.mrf.mxu1  ;;  %1579 = vmatmul.mubr.bf16.gmra.mxu0 %v8171_v42  ;;  %v7571_v36 = vld [vmem:[#allocation9 + $0x248] ss:$16 sps:$4 sm:$0xff]   ;;  %v7585_v44 = vld [vmem:[#allocation9 + $0x20c] ss:$16 sps:$4 sm:$0xff]  }
 0x254   :  { %v717_v49 = vmul.f32 0.2, %v694_v46  ;;  %1647 = vmatpush1.bf16.msra.mxu0 %v7529_v40  ;;  %1674 = vmatprep.mubr.bf16.mxu0 %v739_v20  ;;  %v732_v51 = vmax.f32 %v692_v38, %v716_v45  ;;  %v698_v63 = vadd.f32 %v697_v48, %v8153_v58  ;;  %v7555_v20 = vld [vmem:[#allocation9 + $0x2ac] ss:$16 sps:$4 sm:$0xff]   ;;  %v7574_v40 = vld [vmem:[#allocation9 + $0x1a8] ss:$16 sps:$4 sm:$0xff]  }
 0x255   :  { %v699_v52 = vpop.f32.mrf.mxu1  ;;  %1648 = vmatprep.subr.bf16.mxu0 %v7537_v43  ;;  %v7579_v38 = vld [vmem:[#allocation9 + $0x22c] ss:$16 sps:$4 sm:$0xff]   ;;  %v7577_v41 = vld [vmem:[#allocation9 + $0x228] ss:$16 sps:$4 sm:$0xff]  }
 0x256   :  { %v733_v60 = vmax.f32 %v694_v46, %v717_v49  ;;  %v700_v61 = vadd.f32 %v699_v52, %v8150_v57  ;;  %v8179_v5 = vpack.c.bf16 %v732_v51, %v730_v62  ;;  %v718_v15 = vmul.f32 0.2, %v698_v63  ;;  %v7582_v43 = vld [vmem:[#allocation9 + $0x18c] ss:$16 sps:$4 sm:$0xff]   ;;  %v7580_v45 = vld [vmem:[#allocation9 + $0x188] ss:$16 sps:$4 sm:$0xff]  }
 0x257   :  { %v701_v0 = vpop.f32.mrf.mxu1  ;;  %v7583_v46 = vld [vmem:[#allocation9 + $0x208] ss:$16 sps:$4 sm:$0xff]   ;;  %v7588_v47 = vld [vmem:[#allocation9 + $0x16c] ss:$16 sps:$4 sm:$0xff]  }
 0x258   :  { %v702_v1 = vadd.f32 %v701_v0, %v8153_v58  ;;  %1649 = vmatpush1.bf16.msra.mxu0 %v7535_v50  ;;  %v743_v2 = vpack.c.bf16 %v733_v60, %v731_v59  ;;  %v719_v9 = vmul.f32 0.2, %v700_v61  ;;  %v7544_v58 = vld [vmem:[#allocation9 + $0x48] ss:$16 sps:$4 sm:$0xff]   ;;  %v734_v23 = vmax.f32 %v698_v63, %v718_v15  ;;  %v7591_v48 = vld [vmem:[#allocation9 + $0x3ec] ss:$16 sps:$4 sm:$0xff]  }
 0x259   :  { %v703_v6 = vpop.f32.mrf.mxu1  ;;  %1650 = vmatprep.subr.bf16.mxu0 %v7540_v56  ;;  %v7586_v49 = vld [vmem:[#allocation9 + $0x168] ss:$16 sps:$4 sm:$0xff]   ;;  %v7594_v51 = vld [vmem:[#allocation9 + $0x14c] ss:$16 sps:$4 sm:$0xff]  }
 0x25a   :  { %v720_v12 = vmul.f32 0.2, %v702_v1  ;;  %v704_v14 = vadd.f32 %v703_v6, %v8150_v57  ;;  %1621 = vmatprep.mubr.bf16.mxu1 %v743_v2  ;;  %v735_v21 = vmax.f32 %v700_v61, %v719_v9  ;;  %v7589_v50 = vld [vmem:[#allocation9 + $0x3e8] ss:$16 sps:$4 sm:$0xff]   ;;  %v7597_v52 = vld [vmem:[#allocation9 + $0x3cc] ss:$16 sps:$4 sm:$0xff]  }
 0x25b   :  { %1622 = vmatmul.mubr.bf16.vlgmr.msra.gmra.mxu1 %v8179_v5  ;;  %v7592_v56 = vld [vmem:[#allocation9 + $0x148] ss:$16 sps:$4 sm:$0xff]   ;;  %v7600_v60 = vld [vmem:[#allocation9 + $0x12c] ss:$16 sps:$4 sm:$0xff]  }
 0x25c   :  { %v721_v16 = vmul.f32 0.2, %v704_v14  ;;  %1651 = vmatpush1.bf16.msra.mxu0 %v7538_v3  ;;  %1696 = vmatpush1.bf16.msra.mxu1 %v7541_v4  ;;  %v736_v18 = vmax.f32 %v702_v1, %v720_v12  ;;  %v7595_v59 = vld [vmem:[#allocation9 + $0x3c8] ss:$16 sps:$4 sm:$0xff]   ;;  %v7603_v61 = vld [vmem:[#allocation9 + $0x3ac] ss:$16 sps:$4 sm:$0xff]  }
 0x25d   :  { %1652 = vmatprep.subr.bf16.mxu0 %v7546_v7  ;;  %1697 = vmatprep.subr.bf16.mxu1 %v7549_v11  ;;  %v7598_v62 = vld [vmem:[#allocation9 + $0x128] ss:$16 sps:$4 sm:$0xff]   ;;  %v7606_v0 = vld [vmem:[#allocation9 + $0x10c] ss:$16 sps:$4 sm:$0xff]  }
 0x25e   :  { %v737_v10 = vmax.f32 %v704_v14, %v721_v16  ;;  %v8185_v26 = vpack.c.bf16 %v736_v18, %v734_v23  ;;  %v7601_v63 = vld [vmem:[#allocation9 + $0x3a8] ss:$16 sps:$4 sm:$0xff]   ;;  %v7609_v1 = vld [vmem:[#allocation9 + $0x38c] ss:$16 sps:$4 sm:$0xff]  }
 0x25f   :  { %v1848_v3 = vld [vmem:[#allocation12 + $0x1e0] sm:$0xff]  ;;  %v7612_v7 = vld [vmem:[#allocation9 + $0x36c] ss:$16 sps:$4 sm:$0xff]  }
 0x260   :  { %1653 = vmatpush1.bf16.msra.mxu0 %v7544_v58  ;;  %1698 = vmatpush1.bf16.msra.mxu1 %v7547_v17  ;;  %v8183_v57 = vpack.c.bf16 %v737_v10, %v735_v21  ;;  %v7604_v4 = vld [vmem:[#allocation9 + $0x108] ss:$16 sps:$4 sm:$0xff]   ;;  %v7615_v15 = vld [vmem:[#allocation9 + $0x34c] ss:$16 sps:$4 sm:$0xff]  }
 0x261   :  { %1654 = vmatprep.subr.bf16.mxu0 %v7552_v19  ;;  %1699 = vmatprep.subr.bf16.mxu1 %v7555_v20  ;;  %v7607_v6 = vld [vmem:[#allocation9 + $0x388] ss:$16 sps:$4 sm:$0xff]   ;;  %v7618_v20 = vld [vmem:[#allocation9 + $0x32c] ss:$16 sps:$4 sm:$0xff]  }
 0x262   :  { %1631 = vmatprep.mubr.bf16.mxu1 %v8183_v57  ;;  %v1836_v9 = vld [vmem:[#allocation12 + $0x180] sm:$0xff] }
 0x263   :  { %1632 = vmatmul.mubr.bf16.gmra.mxu1 %v8185_v26  ;;  %v1840_v12 = vld [vmem:[#allocation12 + $0x1a0] sm:$0xff] }
 0x264   :  { %1655 = vmatpush1.bf16.msra.mxu0 %v7550_v24  ;;  %1700 = vmatpush1.bf16.msra.mxu1 %v7553_v25  ;;  %v7610_v14 = vld [vmem:[#allocation9 + $0x368] ss:$16 sps:$4 sm:$0xff]   ;;  %v6670_v58 = vcombine.high %v1836_v9, %v1840_v12  ;;  %v6669_v21 = vcombine.low %v1836_v9, %v1840_v12 }
 0x265   :  { %1727 = vmatprep.mubr.bf16.mxu1 %v743_v2  ;;  %1656 = vmatprep.subr.bf16.mxu0 %v7558_v8  ;;  %v1844_v2 = vld [vmem:[#allocation12 + $0x1c0] sm:$0xff]  ;;  %v7621_v8 = vld [vmem:[#allocation9 + $0x30c] ss:$16 sps:$4 sm:$0xff]  }
 0x266   :  { %1701 = vmatprep.subr.bf16.mxu1 %v7561_v13  ;;  %v6678_v11 = vcombine.high %v1844_v2, %v1848_v3  ;;  %v6677_v16 = vcombine.low %v1844_v2, %v1848_v3  ;;  %v1828_v17 = vld [vmem:[#allocation12 + $0x140] sm:$0xff] }
 0x267   :  { %v1832_v18 = vld [vmem:[#allocation12 + $0x160] sm:$0xff] }
 0x268   :  { %1657 = vmatpush1.bf16.msra.mxu0 %v7556_v27  ;;  %1702 = vmatpush1.bf16.msra.mxu1 %v7559_v28  ;;  %v7613_v19 = vld [vmem:[#allocation9 + $0x348] ss:$16 sps:$4 sm:$0xff]   ;;  %v6662_v10 = vcombine.high %v1828_v17, %v1832_v18 }
 0x269   :  { %1658 = vmatprep.subr.bf16.mxu0 %v7564_v29  ;;  %1703 = vmatprep.subr.bf16.mxu1 %v7567_v30  ;;  %v1820_v23 = vld [vmem:[#allocation12 + $0x100] sm:$0xff] }
 0x26a   :  { %v1824_v24 = vld [vmem:[#allocation12 + $0x120] sm:$0xff] }
 0x26b   :  { %v7616_v25 = vld [vmem:[#allocation9 + $0x328] ss:$16 sps:$4 sm:$0xff]   ;;  %v6654_v13 = vcombine.high %v1820_v23, %v1824_v24  ;;  %v6653_v29 = vcombine.low %v1820_v23, %v1824_v24 }
 0x26c   :  { %1659 = vmatpush2.bf16.msra.mxu0 %v7562_v31  ;;  %1704 = vmatpush1.bf16.msra.mxu1 %v7565_v32  ;;  %v1816_v27 = vld [vmem:[#allocation12 + $0xe0] sm:$0xff] }
 0x26d   :  { %1660 = vmatprep.subr.bf16.mxu0 %v7570_v33  ;;  %1705 = vmatprep.subr.bf16.mxu1 %v7573_v34  ;;  %v7619_v28 = vld [vmem:[#allocation9 + $0x308] ss:$16 sps:$4 sm:$0xff]  }
 0x26e   :  { %v1804_v31 = vld [vmem:[#allocation12 + $0x80] sm:$0xff] }
 0x26f   :  { %v1808_v32 = vld [vmem:[#allocation12 + $0xa0] sm:$0xff] }
 0x270   :  { %1661 = vmatpush2.bf16.msra.mxu0 %v7568_v35  ;;  %1706 = vmatpush1.bf16.msra.mxu1 %v7571_v36  ;;  %v6638_v34 = vcombine.high %v1804_v31, %v1808_v32  ;;  %v1796_v35 = vld [vmem:[#allocation12 + $0x40] sm:$0xff]  ;;  %v6637_v36 = vcombine.low %v1804_v31, %v1808_v32 }
 0x271   :  { %1662 = vmatprep.subr.bf16.mxu0 %v7576_v37  ;;  %1707 = vmatprep.subr.bf16.mxu1 %v7579_v38  ;;  %v1788_v38 = vld [vmem:[#allocation12] sm:$0xff] }
 0x272   :  { %v1960_v9 = vld [vmem:[#allocation12 + $0x560] sm:$0xff] }
 0x273   :  { %v1868_v24 = vld [vmem:[#allocation12 + $0x280] sm:$0xff] }
 0x274   :  { %1663 = vmatpush2.bf16.msra.mxu0 %v7574_v40  ;;  %1708 = vmatpush1.bf16.msra.mxu1 %v7577_v41  ;;  %v1792_v40 = vld [vmem:[#allocation12 + $0x20] sm:$0xff] }
 0x275   :  { %1664 = vmatprep.subr.bf16.mxu0 %v7582_v43  ;;  %1709 = vmatprep.subr.bf16.mxu1 %v7585_v44  ;;  %v6622_v43 = vcombine.high %v1788_v38, %v1792_v40  ;;  %v1908_v44 = vld [vmem:[#allocation12 + $0x3c0] sm:$0xff] }
 0x276   :  { %v1932_v31 = vld [vmem:[#allocation12 + $0x480] sm:$0xff] }
 0x277   :  { %v1936_v32 = vld [vmem:[#allocation12 + $0x4a0] sm:$0xff] }
 0x278   :  { %1665 = vmatpush2.bf16.msra.mxu0 %v7580_v45  ;;  %1710 = vmatpush1.bf16.msra.mxu1 %v7583_v46  ;;  %v1912_v45 = vld [vmem:[#allocation12 + $0x3e0] sm:$0xff] }
 0x279   :  { %1666 = vmatprep.subr.bf16.mxu0 %v7588_v47  ;;  %1711 = vmatprep.subr.bf16.mxu1 %v7591_v48  ;;  %v6742_v46 = vcombine.high %v1908_v44, %v1912_v45  ;;  %v1900_v47 = vld [vmem:[#allocation12 + $0x380] sm:$0xff] }
 0x27a   :  { %v1972_v48 = vld [vmem:[#allocation12 + $0x5c0] sm:$0xff] }
 0x27c   :  { %1667 = vmatpush2.bf16.msra.mxu0 %v7586_v49  ;;  %1712 = vmatpush2.bf16.msra.mxu1 %v7589_v50  ;;  %v1976_v49 = vld [vmem:[#allocation12 + $0x5e0] sm:$0xff] }
 0x27d   :  { %1668 = vmatprep.subr.bf16.mxu0 %v7594_v51  ;;  %1713 = vmatprep.subr.bf16.mxu1 %v7597_v52  ;;  %v6806_v50 = vcombine.high %v1972_v48, %v1976_v49  ;;  %v8195_v51 = vld [vmem:[#allocation12 + $0x9c0] sm:$0xff] }
 0x27e   :  { %v8197_v52 = vld [vmem:[#allocation12 + $0x9e0] sm:$0xff] }
 0x280   :  { %1669 = vmatpush2.bf16.msra.mxu0 %v7592_v56  ;;  %1714 = vmatpush2.bf16.msra.mxu1 %v7595_v59  ;;  %v6741_v56 = vcombine.low %v1908_v44, %v1912_v45  ;;  %v6805_v59 = vcombine.low %v1972_v48, %v1976_v49  ;;  %v6934_v49 = vcombine.high %v8195_v51, %v8197_v52 }
 0x281   :  { %1670 = vmatprep.subr.bf16.mxu0 %v7600_v60  ;;  %1715 = vmatprep.subr.bf16.mxu1 %v7603_v61  ;;  %v1892_v60 = vld [vmem:[#allocation12 + $0x340] sm:$0xff]  ;;  %v6933_v61 = vcombine.low %v8195_v51, %v8197_v52 }
 0x284   :  { %1671 = vmatpush2.bf16.msra.mxu0 %v7598_v62  ;;  %1716 = vmatpush2.bf16.msra.mxu1 %v7601_v63  ;;  %v1896_v62 = vld [vmem:[#allocation12 + $0x360] sm:$0xff] }
 0x285   :  { %1672 = vmatprep.subr.bf16.mxu0 %v7606_v0  ;;  %1717 = vmatprep.subr.bf16.mxu1 %v7609_v1  ;;  %v1964_v63 = vld [vmem:[#allocation12 + $0x580] sm:$0xff] }
 0x286   :  { %v1968_v0 = vld [vmem:[#allocation12 + $0x5a0] sm:$0xff] }
 0x287   :  { %v6798_v1 = vcombine.high %v1964_v63, %v1968_v0  ;;  %v6797_v3 = vcombine.low %v1964_v63, %v1968_v0 }
 0x288   :  { %1673 = vmatpush2.bf16.msra.mxu0 %v7604_v4  ;;  %1718 = vmatpush2.bf16.msra.mxu1 %v7607_v6  ;;  %v6726_v4 = vcombine.high %v1892_v60, %v1896_v62  ;;  %v1884_v6 = vld [vmem:[#allocation12 + $0x300] sm:$0xff] }
 0x289   :  { %1719 = vmatprep.subr.bf16.mxu1 %v7612_v7  ;;  %4902 = vmatprep.subr.bf16.mxu0 %v6678_v11  ;;  %v1888_v7 = vld [vmem:[#allocation12 + $0x320] sm:$0xff] }
 0x28a   :  { %v1956_v11 = vld [vmem:[#allocation12 + $0x540] sm:$0xff] }
 0x28b   :  { %1675 = vmatmul.mubr.bf16.vlgmr.msra.gmra.mxu0 %v8162_v22  ;;  %v6661_v22 = vcombine.low %v1828_v17, %v1832_v18  ;;  %v6789_v12 = vcombine.low %v1956_v11, %v1960_v9  ;;  %v1880_v17 = vld [vmem:[#allocation12 + $0x2e0] sm:$0xff] }
 0x28c   :  { %1684 = vmatprep.mubr.bf16.mxu0 %v8169_v39  ;;  %1720 = vmatpush2.bf16.msra.mxu1 %v7610_v14  ;;  %v1812_v39 = vld [vmem:[#allocation12 + $0xc0] sm:$0xff]  ;;  %v6790_v14 = vcombine.high %v1956_v11, %v1960_v9 }
 0x28d   :  { %1721 = vmatprep.subr.bf16.mxu1 %v7615_v15  ;;  %4903 = vmatpush1.bf16.msra.mxu0 %v6677_v16  ;;  %v6646_v30 = vcombine.high %v1812_v39, %v1816_v27  ;;  %v6645_v33 = vcombine.low %v1812_v39, %v1816_v27  ;;  %v6725_v15 = vcombine.low %v1892_v60, %v1896_v62  ;;  %v1948_v18 = vld [vmem:[#allocation12 + $0x500] sm:$0xff] }
 0x28e   :  { %4904 = vmatprep.subr.bf16.mxu0 %v6670_v58  ;;  %v6718_v16 = vcombine.high %v1884_v6, %v1888_v7  ;;  %v1876_v58 = vld [vmem:[#allocation12 + $0x2c0] sm:$0xff] }
 0x28f   :  { %v6710_v23 = vcombine.high %v1876_v58, %v1880_v17  ;;  %v6709_v27 = vcombine.low %v1876_v58, %v1880_v17  ;;  %v2028_v60 = vld [vmem:[#allocation12 + $0x780] sm:$0xff] }
 0x290   :  { %1722 = vmatpush2.bf16.msra.mxu1 %v7613_v19  ;;  %v1952_v19 = vld [vmem:[#allocation12 + $0x520] sm:$0xff] }
 0x291   :  { %1723 = vmatprep.subr.bf16.mxu1 %v7618_v20  ;;  %4905 = vmatpush1.bf16.msra.mxu0 %v6669_v21  ;;  %v6781_v20 = vcombine.low %v1948_v18, %v1952_v19  ;;  %v6782_v21 = vcombine.high %v1948_v18, %v1952_v19  ;;  %v2032_v62 = vld [vmem:[#allocation12 + $0x7a0] sm:$0xff] }
 0x292   :  { %4906 = vmatprep.subr.bf16.mxu0 %v6662_v10  ;;  %v6717_v10 = vcombine.low %v1884_v6, %v1888_v7  ;;  %v6862_v63 = vcombine.high %v2028_v60, %v2032_v62  ;;  %v6861_v0 = vcombine.low %v2028_v60, %v2032_v62  ;;  %v2012_v6 = vld [vmem:[#allocation12 + $0x700] sm:$0xff] }
 0x293   :  { %1685 = vmatmul.mubr.bf16.gmra.mxu0 %v8171_v42  ;;  %v1800_v42 = vld [vmem:[#allocation12 + $0x60] sm:$0xff] }
 0x294   :  { %1724 = vmatpush2.bf16.msra.mxu1 %v7616_v25  ;;  %v6630_v37 = vcombine.high %v1796_v35, %v1800_v42  ;;  %v6629_v41 = vcombine.low %v1796_v35, %v1800_v42  ;;  %v1872_v25 = vld [vmem:[#allocation12 + $0x2a0] sm:$0xff] }
 0x295   :  { %1725 = vmatprep.subr.bf16.mxu1 %v7621_v8  ;;  %4907 = vmatpush1.bf16.msra.mxu0 %v6661_v22  ;;  %v1940_v8 = vld [vmem:[#allocation12 + $0x4c0] sm:$0xff]  ;;  %v6701_v35 = vcombine.low %v1868_v24, %v1872_v25 }
 0x296   :  { %4908 = vmatprep.subr.bf16.mxu0 %v6654_v13  ;;  %v1944_v22 = vld [vmem:[#allocation12 + $0x4e0] sm:$0xff] }
 0x297   :  { %v6773_v13 = vcombine.low %v1940_v8, %v1944_v22  ;;  %v6774_v39 = vcombine.high %v1940_v8, %v1944_v22  ;;  %v2016_v7 = vld [vmem:[#allocation12 + $0x720] sm:$0xff] }
 0x298   :  { %1726 = vmatpush2.bf16.msra.mxu1 %v7619_v28  ;;  %v6702_v28 = vcombine.high %v1868_v24, %v1872_v25  ;;  %v6846_v11 = vcombine.high %v2012_v6, %v2016_v7  ;;  %v6845_v9 = vcombine.low %v2012_v6, %v2016_v7  ;;  %v1996_v58 = vld [vmem:[#allocation12 + $0x680] sm:$0xff] }
 0x299   :  { %4909 = vmatpush1.bf16.msra.mxu0 %v6653_v29  ;;  %4945 = vmatprep.subr.bf16.mxu1 %v6806_v50  ;;  %v1860_v29 = vld [vmem:[#allocation12 + $0x240] sm:$0xff] }
 0x29a   :  { %4910 = vmatprep.subr.bf16.mxu0 %v6646_v30  ;;  %v1864_v30 = vld [vmem:[#allocation12 + $0x260] sm:$0xff] }
 0x29b   :  { %1728 = vmatmul.mubr.bf16.vlgmr.msra.gmra.mxu1 %v8179_v5  ;;  %v6621_v5 = vcombine.low %v1788_v38, %v1792_v40  ;;  %v6694_v42 = vcombine.high %v1860_v29, %v1864_v30  ;;  %v1924_v38 = vld [vmem:[#allocation12 + $0x440] sm:$0xff]  ;;  %v6693_v44 = vcombine.low %v1860_v29, %v1864_v30 }
 0x29c   :  { %1737 = vmatprep.mubr.bf16.mxu1 %v8183_v57  ;;  %v1904_v57 = vld [vmem:[#allocation12 + $0x3a0] sm:$0xff]  ;;  %4946 = vmatpush1.bf16.msra.mxu1 %v6805_v59 }
 0x29d   :  { %4911 = vmatpush1.bf16.msra.mxu0 %v6645_v33  ;;  %v6733_v2 = vcombine.low %v1900_v47, %v1904_v57  ;;  %4947 = vmatprep.subr.bf16.mxu1 %v6798_v1  ;;  %v6765_v33 = vcombine.low %v1932_v31, %v1936_v32  ;;  %v1928_v40 = vld [vmem:[#allocation12 + $0x460] sm:$0xff] }
 0x29e   :  { %4912 = vmatprep.subr.bf16.mxu0 %v6638_v34  ;;  %v6766_v34 = vcombine.high %v1932_v31, %v1936_v32  ;;  %v2036_v50 = vld [vmem:[#allocation12 + $0x7c0] sm:$0xff] }
 0x29f   :  { %v2020_v1 = vld [vmem:[#allocation12 + $0x740] sm:$0xff] }
 0x2a0   :  { %4948 = vmatpush1.bf16.msra.mxu1 %v6797_v3  ;;  %v2000_v17 = vld [vmem:[#allocation12 + $0x6a0] sm:$0xff] }
 0x2a1   :  { %4913 = vmatpush1.bf16.msra.mxu0 %v6637_v36  ;;  %4949 = vmatprep.subr.bf16.mxu1 %v6790_v14  ;;  %v1852_v36 = vld [vmem:[#allocation12 + $0x200] sm:$0xff]  ;;  %v6830_v18 = vcombine.high %v1996_v58, %v2000_v17  ;;  %v6829_v19 = vcombine.low %v1996_v58, %v2000_v17 }
 0x2a2   :  { %4914 = vmatprep.subr.bf16.mxu0 %v6630_v37  ;;  %v1856_v37 = vld [vmem:[#allocation12 + $0x220] sm:$0xff] }
 0x2a3   :  { %1738 = vmatmul.mubr.bf16.gmra.mxu1 %v8185_v26  ;;  %v6734_v26 = vcombine.high %v1900_v47, %v1904_v57  ;;  %v6686_v45 = vcombine.high %v1852_v36, %v1856_v37  ;;  %v6685_v48 = vcombine.low %v1852_v36, %v1856_v37  ;;  %v2008_v14 = vld [vmem:[#allocation12 + $0x6e0] sm:$0xff] }
 0x2a4   :  { %4950 = vmatpush1.bf16.msra.mxu1 %v6789_v12  ;;  %v2004_v12 = vld [vmem:[#allocation12 + $0x6c0] sm:$0xff] }
 0x2a5   :  { %4915 = vmatpush1.bf16.msra.mxu0 %v6629_v41  ;;  %4951 = vmatprep.subr.bf16.mxu1 %v6782_v21  ;;  %v6757_v41 = vcombine.low %v1924_v38, %v1928_v40  ;;  %v1992_v21 = vld [vmem:[#allocation12 + $0x660] sm:$0xff] }
 0x2a6   :  { %4916 = vmatprep.subr.bf16.mxu0 %v6622_v43  ;;  %v6758_v43 = vcombine.high %v1924_v38, %v1928_v40  ;;  %v1980_v24 = vld [vmem:[#allocation12 + $0x600] sm:$0xff] }
 0x2a7   :  { %v1984_v25 = vld [vmem:[#allocation12 + $0x620] sm:$0xff] }
 0x2a8   :  { %4952 = vmatpush1.bf16.msra.mxu1 %v6781_v20  ;;  %v1988_v20 = vld [vmem:[#allocation12 + $0x640] sm:$0xff]  ;;  %v6814_v8 = vcombine.high %v1980_v24, %v1984_v25  ;;  %v6813_v22 = vcombine.low %v1980_v24, %v1984_v25 }
 0x2a9   :  { %4917 = vmatpush1.bf16.msra.mxu0 %v6621_v5  ;;  %4953 = vmatprep.subr.bf16.mxu1 %v6774_v39  ;;  %v1916_v5 = vld [vmem:[#allocation12 + $0x400] sm:$0xff] }
 0x2aa   :  { %4918 = vmatprep.subr.bf16.mxu0 %v6742_v46  ;;  %v1920_v46 = vld [vmem:[#allocation12 + $0x420] sm:$0xff] }
 0x2ab   :  { %v6749_v47 = vcombine.low %v1916_v5, %v1920_v46  ;;  %v6750_v57 = vcombine.high %v1916_v5, %v1920_v46  ;;  %v8205_v39 = vld [vmem:[#allocation12 + $0xde0] sm:$0xff] }
 0x2ac   :  { %4954 = vmatpush1.bf16.msra.mxu1 %v6773_v13  ;;  %v8203_v13 = vld [vmem:[#allocation12 + $0xdc0] sm:$0xff] }
 0x2ad   :  { %4919 = vmatpush2.bf16.msra.mxu0 %v6741_v56  ;;  %4955 = vmatprep.subr.bf16.mxu1 %v6766_v34  ;;  %v2040_v56 = vld [vmem:[#allocation12 + $0x7e0] sm:$0xff] }
 0x2ae   :  { %4920 = vmatprep.subr.bf16.mxu0 %v6734_v26  ;;  %v6869_v59 = vcombine.low %v2036_v50, %v2040_v56  ;;  %v6870_v26 = vcombine.high %v2036_v50, %v2040_v56  ;;  %v2092_v6 = vld [vmem:[#allocation12 + $0x980] sm:$0xff] }
 0x2af   :  { %v2096_v7 = vld [vmem:[#allocation12 + $0x9a0] sm:$0xff] }
 0x2b0   :  { %4956 = vmatpush1.bf16.msra.mxu1 %v6765_v33  ;;  %v8211_v33 = vld [vmem:[#allocation10] sm:$0xf]  ;;  %v6926_v58 = vcombine.high %v2092_v6, %v2096_v7 }
 0x2b1   :  { %4921 = vmatpush2.bf16.msra.mxu0 %v6733_v2  ;;  %4957 = vmatprep.subr.bf16.mxu1 %v6758_v43  ;;  %v2024_v2 = vld [vmem:[#allocation12 + $0x760] sm:$0xff]  ;;  %v883_v34 = vrot.slane %v8211_v33, %v8144_v54 }
 0x2b2   :  { %4922 = vmatprep.subr.bf16.mxu0 %v6726_v4  ;;  %v6854_v3 = vcombine.high %v2020_v1, %v2024_v2  ;;  %v6853_v4 = vcombine.low %v2020_v1, %v2024_v2 }
 0x2b4   :  { %4958 = vmatpush1.bf16.msra.mxu1 %v6757_v41 }
 0x2b5   :  { %4923 = vmatpush2.bf16.msra.mxu0 %v6725_v15  ;;  %4959 = vmatprep.subr.bf16.mxu1 %v6750_v57  ;;  %v6838_v15 = vcombine.high %v2004_v12, %v2008_v14 }
 0x2b6   :  { %4924 = vmatprep.subr.bf16.mxu0 %v6718_v16  ;;  %v6837_v16 = vcombine.low %v2004_v12, %v2008_v14 }
 0x2b8   :  { %4960 = vmatpush1.bf16.msra.mxu1 %v6749_v47 }
 0x2b9   :  { %4925 = vmatpush2.bf16.msra.mxu0 %v6717_v10  ;;  %4961 = vmatprep.subr.bf16.mxu1 %v6870_v26  ;;  %v6822_v10 = vcombine.high %v1988_v20, %v1992_v21 }
 0x2ba   :  { %4926 = vmatprep.subr.bf16.mxu0 %v6710_v23  ;;  %v6821_v23 = vcombine.low %v1988_v20, %v1992_v21  ;;  %v2088_v20 = vld [vmem:[#allocation12 + $0x960] sm:$0xff] }
 0x2bc   :  { %4962 = vmatpush2.bf16.msra.mxu1 %v6869_v59 }
 0x2bd   :  { %4927 = vmatpush2.bf16.msra.mxu0 %v6709_v27  ;;  %4963 = vmatprep.subr.bf16.mxu1 %v6862_v63  ;;  %v7062_v27 = vcombine.high %v8203_v13, %v8205_v39 }
 0x2be   :  { %4928 = vmatprep.subr.bf16.mxu0 %v6702_v28  ;;  %v7061_v28 = vcombine.low %v8203_v13, %v8205_v39 }
 0x2c0   :  { %4964 = vmatpush2.bf16.msra.mxu1 %v6861_v0 }
 0x2c1   :  { %4929 = vmatpush2.bf16.msra.mxu0 %v6701_v35  ;;  %4965 = vmatprep.subr.bf16.mxu1 %v6854_v3  ;;  %v8217_v35 = vrot.slane %v8211_v33, %v8147_v55 }
 0x2c2   :  { %4930 = vmatprep.subr.bf16.mxu0 %v6694_v42 }
 0x2c4   :  { %4966 = vmatpush2.bf16.msra.mxu1 %v6853_v4 }
 0x2c5   :  { %4931 = vmatpush2.bf16.msra.mxu0 %v6693_v44  ;;  %4967 = vmatprep.subr.bf16.mxu1 %v6846_v11 }
 0x2c6   :  { %4932 = vmatprep.subr.bf16.mxu0 %v6686_v45 }
 0x2c8   :  { %4968 = vmatpush2.bf16.msra.mxu1 %v6845_v9 }
 0x2c9   :  { %4933 = vmatpush2.bf16.msra.mxu0 %v6685_v48  ;;  %4969 = vmatprep.subr.bf16.mxu1 %v6838_v15 }
 0x2ca   :  { %4988 = vmatprep.subr.bf16.mxu0 %v6934_v49 }
 0x2cc   :  { %4970 = vmatpush2.bf16.msra.mxu1 %v6837_v16 }
 0x2cd   :  { %4971 = vmatprep.subr.bf16.mxu1 %v6830_v18 }
 0x2d0   :  { %4972 = vmatpush2.bf16.msra.mxu1 %v6829_v19  ;;  %v2084_v19 = vld [vmem:[#allocation12 + $0x940] sm:$0xff] }
 0x2d1   :  { %4973 = vmatprep.subr.bf16.mxu1 %v6822_v10  ;;  %v6925_v10 = vcombine.low %v2092_v6, %v2096_v7  ;;  %v2140_v6 = vld [vmem:[#allocation12 + $0xb00] sm:$0xff] }
 0x2d2   :  { %v2144_v7 = vld [vmem:[#allocation12 + $0xb20] sm:$0xff] }
 0x2d4   :  { %4974 = vmatpush2.bf16.msra.mxu1 %v6821_v23  ;;  %v6918_v23 = vcombine.high %v2084_v19, %v2088_v20 }
 0x2d5   :  { %4975 = vmatprep.subr.bf16.mxu1 %v6814_v8  ;;  %v2076_v8 = vld [vmem:[#allocation12 + $0x900] sm:$0xff] }
 0x2d8   :  { %4976 = vmatpush2.bf16.msra.mxu1 %v6813_v22  ;;  %v2080_v22 = vld [vmem:[#allocation12 + $0x920] sm:$0xff] }
 0x2d9   :  { %5031 = vmatprep.subr.bf16.mxu1 %v7062_v27  ;;  %v6909_v51 = vcombine.low %v2076_v8, %v2080_v22 }
 0x30b   :  { %v1570_v29 = vpop.f32.mrf.mxu0 }
 0x30c   :  { %v1571_v38 = vadd.f32 %v1570_v29, %v8217_v35  ;;  %v6917_v29 = vcombine.low %v2084_v19, %v2088_v20  ;;  %v6973_v19 = vcombine.low %v2140_v6, %v2144_v7  ;;  %v886_v20 = vsub.s32 2, %v8141_v53 }
 0x30d   :  { %v1572_v30 = vpop.f32.mrf.mxu0 }
 0x30e   :  { %v1573_v37 = vadd.f32 %v1572_v30, %v883_v34  ;;  %v6910_v30 = vcombine.high %v2076_v8, %v2080_v22  ;;  %v8251_v22 = vrot.slane %v8211_v33, %v886_v20 }
 0x30f   :  { %v1574_v31 = vpop.f32.mrf.mxu0 }
 0x310   :  { %v1575_v43 = vadd.f32 %v1574_v31, %v8217_v35  ;;  %v2068_v31 = vld [vmem:[#allocation12 + $0x8c0] sm:$0xff] }
 0x311   :  { %v1576_v32 = vpop.f32.mrf.mxu0 }
 0x312   :  { %v1577_v46 = vadd.f32 %v1576_v32, %v883_v34  ;;  %v2072_v32 = vld [vmem:[#allocation12 + $0x8e0] sm:$0xff] }
 0x313   :  { %v8219_v42 = vpop.f32.mrf.mxu0  ;;  %v6902_v52 = vcombine.high %v2068_v31, %v2072_v32 }
 0x315   :  { %v1582_v40 = vpop.f32.mrf.mxu0 }
 0x316   :  { %v1583_v60 = vadd.f32 %v1582_v40, %v883_v34  ;;  %v2056_v40 = vld [vmem:[#allocation12 + $0x860] sm:$0xff] }
 0x317   :  { %v8223_v57 = vpop.f32.mrf.mxu0 }
 0x319   :  { %v1586_v63 = vpop.f32.mrf.mxu0 }
 0x31a   :  { %v1587_v12 = vadd.f32 %v1586_v63, %v883_v34  ;;  %v2064_v34 = vld [vmem:[#allocation12 + $0x8a0] sm:$0xff] }
 0x31b   :  { %v1623_v36 = vpop.f32.mrf.mxu1  ;;  %v2148_v63 = vld [vmem:[#allocation12 + $0xb40] sm:$0xff] }
 0x31c   :  { %v1624_v45 = vadd.f32 %v1623_v36, %v1571_v38  ;;  %v6901_v36 = vcombine.low %v2068_v31, %v2072_v32  ;;  %v2052_v38 = vld [vmem:[#allocation12 + $0x840] sm:$0xff] }
 0x31d   :  { %v1625_v41 = vpop.f32.mrf.mxu1  ;;  %v2116_v31 = vld [vmem:[#allocation12 + $0xa40] sm:$0xff] }
 0x31e   :  { %v1626_v44 = vadd.f32 %v1625_v41, %v1573_v37  ;;  %v1748_v59 = vmul.f32 0.2, %v1624_v45  ;;  %v2120_v32 = vld [vmem:[#allocation12 + $0xa60] sm:$0xff] }
 0x31f   :  { %v1627_v5 = vpop.f32.mrf.mxu1 }
 0x320   :  { %v1628_v47 = vadd.f32 %v1627_v5, %v1575_v43  ;;  %v1749_v49 = vmul.f32 0.2, %v1626_v44  ;;  %v1764_v11 = vmax.f32 %v1624_v45, %v1748_v59  ;;  %v6886_v43 = vcombine.high %v2052_v38, %v2056_v40  ;;  %v2048_v45 = vld [vmem:[#allocation12 + $0x820] sm:$0xff] }
 0x321   :  { %v1629_v48 = vpop.f32.mrf.mxu1  ;;  %v6885_v5 = vcombine.low %v2052_v38, %v2056_v40  ;;  %v2160_v59 = vld [vmem:[#allocation12 + $0xba0] sm:$0xff] }
 0x322   :  { %v1752_v50 = vmul.f32 0.2, %v1628_v47  ;;  %v1630_v56 = vadd.f32 %v1629_v48, %v1577_v46  ;;  %v1765_v2 = vmax.f32 %v1626_v44, %v1749_v49  ;;  %v2044_v44 = vld [vmem:[#allocation12 + $0x800] sm:$0xff] }
 0x323   :  { %v8225_v26 = vpop.f32.mrf.mxu1  ;;  %v6878_v46 = vcombine.high %v2044_v44, %v2048_v45  ;;  %v2168_v48 = vld [vmem:[#allocation12 + $0xbe0] sm:$0xff]  ;;  %v6877_v49 = vcombine.low %v2044_v44, %v2048_v45 }
 0x324   :  { %v1753_v62 = vmul.f32 0.2, %v1630_v56  ;;  %v1768_v0 = vmax.f32 %v1628_v47, %v1752_v50  ;;  %v2164_v47 = vld [vmem:[#allocation12 + $0xbc0] sm:$0xff] }
 0x325   :  { %v1635_v1 = vpop.f32.mrf.mxu1  ;;  %v6998_v50 = vcombine.high %v2164_v47, %v2168_v48  ;;  %v2112_v45 = vld [vmem:[#allocation12 + $0xa20] sm:$0xff] }
 0x326   :  { %v1769_v3 = vmax.f32 %v1630_v56, %v1753_v62  ;;  %v1636_v4 = vadd.f32 %v1635_v1, %v1583_v60  ;;  %v8231_v15 = vpack.c.bf16 %v1768_v0, %v1764_v11  ;;  %v2156_v56 = vld [vmem:[#allocation12 + $0xb80] sm:$0xff]  ;;  %v6997_v60 = vcombine.low %v2164_v47, %v2168_v48 }
 0x327   :  { %v8227_v9 = vpop.f32.mrf.mxu1  ;;  %v6990_v62 = vcombine.high %v2156_v56, %v2160_v59  ;;  %v2152_v0 = vld [vmem:[#allocation12 + $0xb60] sm:$0xff] }
 0x328   :  { %v8229_v14 = vpack.c.bf16 %v1769_v3, %v1765_v2  ;;  %v1757_v17 = vmul.f32 0.2, %v1636_v4  ;;  %v6989_v2 = vcombine.low %v2156_v56, %v2160_v59  ;;  %v6981_v11 = vcombine.low %v2148_v63, %v2152_v0 }
 0x329   :  { %v1639_v16 = vpop.f32.mrf.mxu1 }
 0x32a   :  { %v1640_v18 = vadd.f32 %v1639_v16, %v1587_v12  ;;  %4934 = vmatprep.mubr.bf16.mxu0 %v8229_v14  ;;  %v1773_v24 = vmax.f32 %v1636_v4, %v1757_v17  ;;  %v6982_v4 = vcombine.high %v2148_v63, %v2152_v0  ;;  %v6974_v16 = vcombine.high %v2140_v6, %v2144_v7  ;;  %v2136_v17 = vld [vmem:[#allocation12 + $0xae0] sm:$0xff]  ;;  %v1845_v63 = vld [vmem:[#allocation12 + $0x1c8] sm:$0xff] }
 0x32b   :  { %4935 = vmatmul.mubr.bf16.vlgmr.msra.gmra.mxu0 %v8231_v15  ;;  %v1849_v0 = vld [vmem:[#allocation12 + $0x1e8] sm:$0xff] }
 0x32c   :  { %v1761_v21 = vmul.f32 0.2, %v1640_v18  ;;  %4989 = vmatpush1.bf16.msra.mxu0 %v6933_v61  ;;  %v2060_v61 = vld [vmem:[#allocation12 + $0x880] sm:$0xff] }
 0x32d   :  { %4990 = vmatprep.subr.bf16.mxu0 %v6926_v58  ;;  %v6894_v37 = vcombine.high %v2060_v61, %v2064_v34  ;;  %v6893_v41 = vcombine.low %v2060_v61, %v2064_v34  ;;  %v2132_v58 = vld [vmem:[#allocation12 + $0xac0] sm:$0xff] }
 0x32e   :  { %v1777_v25 = vmax.f32 %v1640_v18, %v1761_v21  ;;  %v890_v18 = vsub.s32 3, %v8141_v53  ;;  %v6965_v8 = vcombine.low %v2132_v58, %v2136_v17 }
 0x330   :  { %v8238_v27 = vpack.c.bf16 %v1777_v25, %v1773_v24  ;;  %4991 = vmatpush1.bf16.msra.mxu0 %v6925_v10  ;;  %v6966_v10 = vcombine.high %v2132_v58, %v2136_v17  ;;  %v2128_v24 = vld [vmem:[#allocation12 + $0xaa0] sm:$0xff]  ;;  %v8246_v25 = vrot.slane %v8211_v33, %v890_v18  ;;  %v6680_v58 = vcombine.high %v1845_v63, %v1849_v0 }
 0x331   :  { %4992 = vmatprep.subr.bf16.mxu0 %v6918_v23  ;;  %v2124_v23 = vld [vmem:[#allocation12 + $0xa80] sm:$0xff] }
 0x332   :  { %5020 = vmatprep.mubr.bf16.mxu0 %v8238_v27  ;;  %v6957_v34 = vcombine.low %v2124_v23, %v2128_v24 }
 0x334   :  { %4993 = vmatpush1.bf16.msra.mxu0 %v6917_v29 }
 0x335   :  { %4994 = vmatprep.subr.bf16.mxu0 %v6910_v30  ;;  %v6958_v30 = vcombine.high %v2124_v23, %v2128_v24  ;;  %v2224_v23 = vld [vmem:[#allocation12 + $0xda0] sm:$0xff] }
 0x338   :  { %4995 = vmatpush1.bf16.msra.mxu0 %v6909_v51  ;;  %v1585_v51 = vadd.f32 %v8223_v57, %v8217_v35  ;;  %v2108_v57 = vld [vmem:[#allocation12 + $0xa00] sm:$0xff] }
 0x339   :  { %4996 = vmatprep.subr.bf16.mxu0 %v6902_v52  ;;  %v6942_v56 = vcombine.high %v2108_v57, %v2112_v45  ;;  %v6941_v6 = vcombine.low %v2108_v57, %v2112_v45  ;;  %v1829_v57 = vld [vmem:[#allocation12 + $0x148] sm:$0xff] }
 0x33a   :  { %v1638_v33 = vadd.f32 %v8227_v9, %v1585_v51 }
 0x33c   :  { %4997 = vmatpush1.bf16.msra.mxu0 %v6901_v36  ;;  %v1581_v36 = vadd.f32 %v8219_v42, %v8217_v35  ;;  %v6949_v42 = vcombine.low %v2116_v31, %v2120_v32  ;;  %v1760_v9 = vmul.f32 0.2, %v1638_v33 }
 0x33d   :  { %4998 = vmatprep.subr.bf16.mxu0 %v6894_v37 }
 0x33e   :  { %v1776_v7 = vmax.f32 %v1638_v33, %v1760_v9 }
 0x340   :  { %4999 = vmatpush1.bf16.msra.mxu0 %v6893_v41  ;;  %v6950_v41 = vcombine.high %v2116_v31, %v2120_v32  ;;  %v1837_v31 = vld [vmem:[#allocation12 + $0x188] sm:$0xff] }
 0x341   :  { %5000 = vmatprep.subr.bf16.mxu0 %v6886_v43  ;;  %v1841_v32 = vld [vmem:[#allocation12 + $0x1a8] sm:$0xff] }
 0x344   :  { %5001 = vmatpush1.bf16.msra.mxu0 %v6885_v5  ;;  %v1634_v5 = vadd.f32 %v8225_v26, %v1581_v36 }
 0x345   :  { %5002 = vmatprep.subr.bf16.mxu0 %v6878_v46 }
 0x348   :  { %5003 = vmatpush1.bf16.msra.mxu0 %v6877_v49 }
 0x349   :  { %5004 = vmatprep.subr.bf16.mxu0 %v6998_v50 }
 0x34b   :  { %v1676_v1 = vpop.f32.mrf.mxu0 }
 0x34c   :  { %5005 = vmatpush2.bf16.msra.mxu0 %v6997_v60  ;;  %v1677_v37 = vadd.f32 %v1676_v1, %v8251_v22  ;;  %v1756_v1 = vmul.f32 0.2, %v1634_v5 }
 0x34d   :  { %v1678_v3 = vpop.f32.mrf.mxu0  ;;  %5006 = vmatprep.subr.bf16.mxu0 %v6990_v62 }
 0x34e   :  { %v1679_v61 = vadd.f32 %v1678_v3, %v8246_v25  ;;  %v1772_v24 = vmax.f32 %v1634_v5, %v1756_v1  ;;  %v1813_v1 = vld [vmem:[#allocation12 + $0xc8] sm:$0xff] }
 0x34f   :  { %v1680_v12 = vpop.f32.mrf.mxu0 }
 0x350   :  { %5007 = vmatpush2.bf16.msra.mxu0 %v6989_v2  ;;  %v1681_v43 = vadd.f32 %v1680_v12, %v8251_v22 }
 0x351   :  { %5008 = vmatprep.subr.bf16.mxu0 %v6982_v4  ;;  %v1682_v21 = vpop.f32.mrf.mxu0 }
 0x352   :  { %v1683_v48 = vadd.f32 %v1682_v21, %v8246_v25 }
 0x353   :  { %v8253_v29 = vpop.f32.mrf.mxu0 }
 0x354   :  { %5009 = vmatpush2.bf16.msra.mxu0 %v6981_v11 }
 0x355   :  { %5010 = vmatprep.subr.bf16.mxu0 %v6974_v16  ;;  %v1688_v38 = vpop.f32.mrf.mxu0 }
 0x356   :  { %v1689_v3 = vadd.f32 %v1688_v38, %v8246_v25  ;;  %v2212_v38 = vld [vmem:[#allocation12 + $0xd40] sm:$0xff] }
 0x357   :  { %v8265_v49 = vpop.f32.mrf.mxu0 }
 0x358   :  { %5011 = vmatpush2.bf16.msra.mxu0 %v6973_v19 }
 0x359   :  { %5012 = vmatprep.subr.bf16.mxu0 %v6966_v10  ;;  %v1692_v11 = vpop.f32.mrf.mxu0  ;;  %v2220_v10 = vld [vmem:[#allocation12 + $0xd80] sm:$0xff] }
 0x35a   :  { %v1693_v51 = vadd.f32 %v1692_v11, %v8246_v25  ;;  %v1833_v25 = vld [vmem:[#allocation12 + $0x168] sm:$0xff]  ;;  %v7053_v5 = vcombine.low %v2220_v10, %v2224_v23  ;;  %v2188_v11 = vld [vmem:[#allocation12 + $0xc80] sm:$0xff] }
 0x35b   :  { %v1729_v52 = vpop.f32.mrf.mxu1  ;;  %v6663_v39 = vcombine.low %v1829_v57, %v1833_v25 }
 0x35c   :  { %5013 = vmatpush2.bf16.msra.mxu0 %v6965_v8  ;;  %v1730_v46 = vadd.f32 %v1729_v52, %v1677_v37  ;;  %v7054_v37 = vcombine.high %v2220_v10, %v2224_v23  ;;  %v2180_v23 = vld [vmem:[#allocation12 + $0xc40] sm:$0xff] }
 0x35d   :  { %v1731_v40 = vpop.f32.mrf.mxu1  ;;  %5014 = vmatprep.subr.bf16.mxu0 %v6958_v30 }
 0x35e   :  { %v1732_v44 = vadd.f32 %v1731_v40, %v1679_v61  ;;  %v1750_v26 = vmul.f32 0.2, %v1730_v46  ;;  %v6679_v61 = vcombine.low %v1845_v63, %v1849_v0  ;;  %v2196_v63 = vld [vmem:[#allocation12 + $0xcc0] sm:$0xff] }
 0x35f   :  { %v1733_v47 = vpop.f32.mrf.mxu1  ;;  %v2200_v0 = vld [vmem:[#allocation12 + $0xce0] sm:$0xff] }
 0x360   :  { %v1734_v35 = vadd.f32 %v1733_v47, %v1681_v43  ;;  %5015 = vmatpush2.bf16.msra.mxu0 %v6957_v34  ;;  %v1751_v59 = vmul.f32 0.2, %v1732_v44  ;;  %v1766_v8 = vmax.f32 %v1730_v46, %v1750_v26  ;;  %v8275_v34 = vpack.c.bf16 %v1776_v7, %v1772_v24  ;;  %v1817_v26 = vld [vmem:[#allocation12 + $0xe8] sm:$0xff]  ;;  %v2184_v24 = vld [vmem:[#allocation12 + $0xc60] sm:$0xff] }
 0x361   :  { %v1735_v50 = vpop.f32.mrf.mxu1  ;;  %5016 = vmatprep.subr.bf16.mxu0 %v6950_v41  ;;  %v6672_v43 = vcombine.high %v1837_v31, %v1841_v32  ;;  %v6671_v46 = vcombine.low %v1837_v31, %v1841_v32  ;;  %v6648_v7 = vcombine.high %v1813_v1, %v1817_v26  ;;  %v1801_v31 = vld [vmem:[#allocation12 + $0x68] sm:$0xff] }
 0x362   :  { %v1754_v60 = vmul.f32 0.2, %v1734_v35  ;;  %v1736_v62 = vadd.f32 %v1735_v50, %v1683_v48  ;;  %v1767_v17 = vmax.f32 %v1732_v44, %v1751_v59  ;;  %v2216_v44 = vld [vmem:[#allocation12 + $0xd60] sm:$0xff]  ;;  %v6664_v48 = vcombine.high %v1829_v57, %v1833_v25  ;;  %v1825_v59 = vld [vmem:[#allocation12 + $0x128] sm:$0xff] }
 0x363   :  { %v8267_v2 = vpop.f32.mrf.mxu1  ;;  %v7046_v47 = vcombine.high %v2212_v38, %v2216_v44  ;;  %v2208_v50 = vld [vmem:[#allocation12 + $0xd20] sm:$0xff]  ;;  %v7045_v13 = vcombine.low %v2212_v38, %v2216_v44 }
 0x364   :  { %v1755_v4 = vmul.f32 0.2, %v1736_v62  ;;  %5017 = vmatpush2.bf16.msra.mxu0 %v6949_v42  ;;  %v1770_v12 = vmax.f32 %v1734_v35, %v1754_v60  ;;  %v2204_v35 = vld [vmem:[#allocation12 + $0xd00] sm:$0xff] }
 0x365   :  { %v1741_v16 = vpop.f32.mrf.mxu1  ;;  %5018 = vmatprep.subr.bf16.mxu0 %v6942_v56  ;;  %v1821_v56 = vld [vmem:[#allocation12 + $0x108] sm:$0xff]  ;;  %v2176_v38 = vld [vmem:[#allocation12 + $0xc20] sm:$0xff] }
 0x366   :  { %v1771_v19 = vmax.f32 %v1736_v62, %v1755_v4  ;;  %v1742_v21 = vadd.f32 %v1741_v16, %v1689_v3  ;;  %v8277_v36 = vpack.c.bf16 %v1770_v12, %v1766_v8  ;;  %v6656_v62 = vcombine.high %v1821_v56, %v1825_v59  ;;  %v2192_v12 = vld [vmem:[#allocation12 + $0xca0] sm:$0xff]  ;;  %v1805_v16 = vld [vmem:[#allocation12 + $0x88] sm:$0xff] }
 0x367   :  { %v8270_v30 = vpop.f32.mrf.mxu1  ;;  %v7037_v3 = vcombine.low %v2204_v35, %v2208_v50  ;;  %v6655_v4 = vcombine.low %v1821_v56, %v1825_v59  ;;  %v1797_v8 = vld [vmem:[#allocation12 + $0x48] sm:$0xff]  ;;  %v7021_v32 = vcombine.low %v2188_v11, %v2192_v12  ;;  %v2288_v56 = vld [vmem:[#allocation12 + $0xfa0] sm:$0xff] }
 0x368   :  { %v8273_v52 = vpack.c.bf16 %v1771_v19, %v1767_v17  ;;  %5019 = vmatpush2.bf16.msra.mxu0 %v6941_v6  ;;  %v1759_v40 = vmul.f32 0.2, %v1742_v21  ;;  %v7030_v6 = vcombine.high %v2196_v63, %v2200_v0  ;;  %v7029_v17 = vcombine.low %v2196_v63, %v2200_v0  ;;  %v1901_v59 = vld [vmem:[#allocation12 + $0x388] sm:$0xff]  ;;  %v2276_v0 = vld [vmem:[#allocation12 + $0xf40] sm:$0xff] }
 0x369   :  { %v1745_v33 = vpop.f32.mrf.mxu1  ;;  %5074 = vmatprep.subr.bf16.mxu0 %v6680_v58  ;;  %v1809_v58 = vld [vmem:[#allocation12 + $0xa8] sm:$0xff]  ;;  %v6647_v19 = vcombine.low %v1813_v1, %v1817_v26  ;;  %v6631_v44 = vcombine.low %v1797_v8, %v1801_v31  ;;  %v2280_v1 = vld [vmem:[#allocation12 + $0xf60] sm:$0xff] }
 0x36a   :  { %v1746_v41 = vadd.f32 %v1745_v33, %v1693_v51  ;;  %4977 = vmatprep.mubr.bf16.mxu1 %v8273_v52  ;;  %v1775_v42 = vmax.f32 %v1742_v21, %v1759_v40  ;;  %v7022_v21 = vcombine.high %v2188_v11, %v2192_v12  ;;  %v6640_v10 = vcombine.high %v1805_v16, %v1809_v58  ;;  %v1789_v40 = vld [vmem:[#allocation12 + $0x8] sm:$0xff]  ;;  %v2268_v12 = vld [vmem:[#allocation12 + $0xf00] sm:$0xff] }
 0x36b   :  { %4978 = vmatmul.mubr.bf16.vlgmr.msra.gmra.mxu1 %v8277_v36  ;;  %5021 = vmatmul.mubr.bf16.vlgmr.msra.gmra.mxu0 %v8275_v34  ;;  %v6639_v51 = vcombine.low %v1805_v16, %v1809_v58  ;;  %v6632_v33 = vcombine.high %v1797_v8, %v1801_v31  ;;  %v1893_v26 = vld [vmem:[#allocation12 + $0x348] sm:$0xff]  ;;  %v2272_v16 = vld [vmem:[#allocation12 + $0xf20] sm:$0xff] }
 0x36c   :  { %v1763_v45 = vmul.f32 0.2, %v1746_v41  ;;  %5032 = vmatpush1.bf16.msra.mxu1 %v7061_v28  ;;  %5075 = vmatpush1.bf16.msra.mxu0 %v6679_v61  ;;  %v7038_v28 = vcombine.high %v2204_v35, %v2208_v50  ;;  %v7014_v61 = vcombine.high %v2180_v23, %v2184_v24  ;;  %v2284_v50 = vld [vmem:[#allocation12 + $0xf80] sm:$0xff]  ;;  %v1885_v58 = vld [vmem:[#allocation12 + $0x308] sm:$0xff] }
 0x36d   :  { %5106 = vmatprep.mubr.bf16.mxu0 %v8229_v14  ;;  %5033 = vmatprep.subr.bf16.mxu1 %v7054_v37  ;;  %v2172_v37 = vld [vmem:[#allocation12 + $0xc00] sm:$0xff]  ;;  %v1877_v31 = vld [vmem:[#allocation12 + $0x2c8] sm:$0xff] }
 0x36e   :  { %v1779_v9 = vmax.f32 %v1746_v41, %v1763_v45  ;;  %5076 = vmatprep.subr.bf16.mxu0 %v6672_v43  ;;  %v1793_v41 = vld [vmem:[#allocation12 + $0x28] sm:$0xff]  ;;  %v7013_v43 = vcombine.low %v2180_v23, %v2184_v24  ;;  %v7006_v57 = vcombine.high %v2172_v37, %v2176_v38  ;;  %v2292_v45 = vld [vmem:[#allocation12 + $0xfc0] sm:$0xff] }
 0x36f   :  { %v6624_v25 = vcombine.high %v1789_v40, %v1793_v41  ;;  %v6623_v35 = vcombine.low %v1789_v40, %v1793_v41  ;;  %v2260_v24 = vld [vmem:[#allocation12 + $0xec0] sm:$0xff]  ;;  %v1869_v41 = vld [vmem:[#allocation12 + $0x288] sm:$0xff] }
 0x370   :  { %v8286_v60 = vpack.c.bf16 %v1779_v9, %v1775_v42  ;;  %5034 = vmatpush1.bf16.msra.mxu1 %v7053_v5  ;;  %5077 = vmatpush1.bf16.msra.mxu0 %v6671_v46  ;;  %v2296_v5 = vld [vmem:[#allocation12 + $0xfe0] sm:$0xff]  ;;  %v1909_v46 = vld [vmem:[#allocation12 + $0x3c8] sm:$0xff] }
 0x371   :  { %5035 = vmatprep.subr.bf16.mxu1 %v7046_v47  ;;  %5078 = vmatprep.subr.bf16.mxu0 %v6664_v48  ;;  %v1913_v47 = vld [vmem:[#allocation12 + $0x3e8] sm:$0xff]  ;;  %v7005_v48 = vcombine.low %v2172_v37, %v2176_v38  ;;  %v7126_v42 = vcombine.high %v2292_v45, %v2296_v5  ;;  %v2264_v8 = vld [vmem:[#allocation12 + $0xee0] sm:$0xff] }
 0x372   :  { %5063 = vmatprep.mubr.bf16.mxu1 %v8286_v60  ;;  %v6744_v9 = vcombine.high %v1909_v46, %v1913_v47  ;;  %v2252_v38 = vld [vmem:[#allocation12 + $0xe80] sm:$0xff] }
 0x373   :  { %v2256_v40 = vld [vmem:[#allocation12 + $0xea0] sm:$0xff] }
 0x374   :  { %5036 = vmatpush1.bf16.msra.mxu1 %v7045_v13  ;;  %5079 = vmatpush1.bf16.msra.mxu0 %v6663_v39  ;;  %v1905_v13 = vld [vmem:[#allocation12 + $0x3a8] sm:$0xff]  ;;  %v7125_v39 = vcombine.low %v2292_v45, %v2296_v5  ;;  %v2244_v5 = vld [vmem:[#allocation12 + $0xe40] sm:$0xff] }
 0x375   :  { %5037 = vmatprep.subr.bf16.mxu1 %v7038_v28  ;;  %5080 = vmatprep.subr.bf16.mxu0 %v6656_v62  ;;  %v6743_v28 = vcombine.low %v1909_v46, %v1913_v47  ;;  %v7118_v62 = vcombine.high %v2284_v50, %v2288_v56  ;;  %v6736_v63 = vcombine.high %v1901_v59, %v1905_v13  ;;  %v2248_v46 = vld [vmem:[#allocation12 + $0xe60] sm:$0xff]  ;;  %v1861_v47 = vld [vmem:[#allocation12 + $0x248] sm:$0xff] }
 0x378   :  { %5038 = vmatpush1.bf16.msra.mxu1 %v7037_v3  ;;  %5081 = vmatpush1.bf16.msra.mxu0 %v6655_v4  ;;  %v1897_v3 = vld [vmem:[#allocation12 + $0x368] sm:$0xff]  ;;  %v7117_v4 = vcombine.low %v2284_v50, %v2288_v56  ;;  %v7078_v50 = vcombine.high %v2244_v5, %v2248_v46  ;;  %v1687_v56 = vadd.f32 %v8253_v29, %v8251_v22 }
 0x379   :  { %5039 = vmatprep.subr.bf16.mxu1 %v7030_v6  ;;  %5082 = vmatprep.subr.bf16.mxu0 %v6648_v7  ;;  %v6735_v6 = vcombine.low %v1901_v59, %v1905_v13  ;;  %v7110_v7 = vcombine.high %v2276_v0, %v2280_v1  ;;  %v6728_v11 = vcombine.high %v1893_v26, %v1897_v3  ;;  %v1973_v29 = vld [vmem:[#allocation12 + $0x5c8] sm:$0xff] }
 0x37c   :  { %5040 = vmatpush1.bf16.msra.mxu1 %v7029_v17  ;;  %5083 = vmatpush1.bf16.msra.mxu0 %v6647_v19  ;;  %v1889_v17 = vld [vmem:[#allocation12 + $0x328] sm:$0xff]  ;;  %v7109_v19 = vcombine.low %v2276_v0, %v2280_v1  ;;  %v1740_v0 = vadd.f32 %v8267_v2, %v1687_v56 }
 0x37d   :  { %5041 = vmatprep.subr.bf16.mxu1 %v7022_v21  ;;  %5084 = vmatprep.subr.bf16.mxu0 %v6640_v10  ;;  %v6727_v21 = vcombine.low %v1893_v26, %v1897_v3  ;;  %v7102_v10 = vcombine.high %v2268_v12, %v2272_v16  ;;  %v6720_v23 = vcombine.high %v1885_v58, %v1889_v17  ;;  %v2073_v56 = vld [vmem:[#allocation12 + $0x8e8] sm:$0xff] }
 0x380   :  { %5042 = vmatpush1.bf16.msra.mxu1 %v7021_v32  ;;  %5085 = vmatpush1.bf16.msra.mxu0 %v6639_v51  ;;  %v1881_v32 = vld [vmem:[#allocation12 + $0x2e8] sm:$0xff]  ;;  %v7101_v51 = vcombine.low %v2268_v12, %v2272_v16 }
 0x381   :  { %5043 = vmatprep.subr.bf16.mxu1 %v7014_v61  ;;  %5086 = vmatprep.subr.bf16.mxu0 %v6632_v33  ;;  %v6719_v61 = vcombine.low %v1885_v58, %v1889_v17  ;;  %v7094_v33 = vcombine.high %v2260_v24, %v2264_v8  ;;  %v6712_v37 = vcombine.high %v1877_v31, %v1881_v32  ;;  %v1965_v17 = vld [vmem:[#allocation12 + $0x588] sm:$0xff] }
 0x384   :  { %5044 = vmatpush1.bf16.msra.mxu1 %v7013_v43  ;;  %5087 = vmatpush1.bf16.msra.mxu0 %v6631_v44  ;;  %v1873_v43 = vld [vmem:[#allocation12 + $0x2a8] sm:$0xff]  ;;  %v7093_v44 = vcombine.low %v2260_v24, %v2264_v8 }
 0x385   :  { %5045 = vmatprep.subr.bf16.mxu1 %v7006_v57  ;;  %5088 = vmatprep.subr.bf16.mxu0 %v6624_v25  ;;  %v6711_v57 = vcombine.low %v1877_v31, %v1881_v32  ;;  %v7086_v25 = vcombine.high %v2252_v38, %v2256_v40  ;;  %v6704_v45 = vcombine.high %v1869_v41, %v1873_v43 }
 0x388   :  { %5046 = vmatpush1.bf16.msra.mxu1 %v7005_v48  ;;  %5089 = vmatpush1.bf16.msra.mxu0 %v6623_v35  ;;  %v1865_v48 = vld [vmem:[#allocation12 + $0x268] sm:$0xff]  ;;  %v1691_v35 = vadd.f32 %v8265_v49, %v8251_v22  ;;  %v7077_v49 = vcombine.low %v2244_v5, %v2248_v46 }
 0x389   :  { %5047 = vmatprep.subr.bf16.mxu1 %v7126_v42  ;;  %5090 = vmatprep.subr.bf16.mxu0 %v6744_v9  ;;  %v7085_v42 = vcombine.low %v2252_v38, %v2256_v40  ;;  %v6703_v9 = vcombine.low %v1869_v41, %v1873_v43  ;;  %v6696_v13 = vcombine.high %v1861_v47, %v1865_v48  ;;  %v2089_v38 = vld [vmem:[#allocation12 + $0x968] sm:$0xff] }
 0x38a   :  { %v1744_v59 = vadd.f32 %v8270_v30, %v1691_v35  ;;  %v6695_v1 = vcombine.low %v1861_v47, %v1865_v48  ;;  %v1977_v30 = vld [vmem:[#allocation12 + $0x5e8] sm:$0xff] }
 0x38b   :  { %v6808_v2 = vcombine.high %v1973_v29, %v1977_v30  ;;  %v6807_v24 = vcombine.low %v1973_v29, %v1977_v30  ;;  %v2081_v5 = vld [vmem:[#allocation12 + $0x928] sm:$0xff] }
 0x38c   :  { %5048 = vmatpush2.bf16.msra.mxu1 %v7125_v39  ;;  %5091 = vmatpush2.bf16.msra.mxu0 %v6743_v28  ;;  %v2236_v39 = vld [vmem:[#allocation12 + $0xe00] sm:$0xff]  ;;  %v1762_v26 = vmul.f32 0.2, %v1744_v59  ;;  %v1925_v29 = vld [vmem:[#allocation12 + $0x448] sm:$0xff] }
 0x38d   :  { %5049 = vmatprep.subr.bf16.mxu1 %v7118_v62  ;;  %5092 = vmatprep.subr.bf16.mxu0 %v6736_v63  ;;  %v2240_v28 = vld [vmem:[#allocation12 + $0xe20] sm:$0xff]  ;;  %v1853_v62 = vld [vmem:[#allocation12 + $0x208] sm:$0xff] }
 0x38e   :  { %v1857_v63 = vld [vmem:[#allocation12 + $0x228] sm:$0xff]  ;;  %v7070_v3 = vcombine.high %v2236_v39, %v2240_v28  ;;  %v1778_v16 = vmax.f32 %v1744_v59, %v1762_v26 }
 0x38f   :  { %v6688_v22 = vcombine.high %v1853_v62, %v1857_v63  ;;  %v6687_v12 = vcombine.low %v1853_v62, %v1857_v63  ;;  %v1933_v62 = vld [vmem:[#allocation12 + $0x488] sm:$0xff] }
 0x390   :  { %5050 = vmatpush2.bf16.msra.mxu1 %v7117_v4  ;;  %5093 = vmatpush2.bf16.msra.mxu0 %v6735_v6  ;;  %v2101_v4 = vld [vmem:[#allocation12 + $0x9c8] sm:$0xff] }
 0x391   :  { %5051 = vmatprep.subr.bf16.mxu1 %v7110_v7  ;;  %5094 = vmatprep.subr.bf16.mxu0 %v6728_v11  ;;  %v2105_v6 = vld [vmem:[#allocation12 + $0x9e8] sm:$0xff]  ;;  %v1758_v7 = vmul.f32 0.2, %v1740_v0  ;;  %v7069_v11 = vcombine.low %v2236_v39, %v2240_v28 }
 0x392   :  { %v6936_v58 = vcombine.high %v2101_v4, %v2105_v6  ;;  %v6935_v31 = vcombine.low %v2101_v4, %v2105_v6  ;;  %v1937_v63 = vld [vmem:[#allocation12 + $0x4a8] sm:$0xff] }
 0x393   :  { %v1929_v30 = vld [vmem:[#allocation12 + $0x468] sm:$0xff] }
 0x394   :  { %5052 = vmatpush2.bf16.msra.mxu1 %v7109_v19  ;;  %5095 = vmatpush2.bf16.msra.mxu0 %v6727_v21  ;;  %v1774_v19 = vmax.f32 %v1740_v0, %v1758_v7  ;;  %v1969_v21 = vld [vmem:[#allocation12 + $0x5a8] sm:$0xff]  ;;  %v6767_v7 = vcombine.low %v1933_v62, %v1937_v63 }
 0x395   :  { %5053 = vmatprep.subr.bf16.mxu1 %v7102_v10  ;;  %5096 = vmatprep.subr.bf16.mxu0 %v6720_v23  ;;  %v2093_v10 = vld [vmem:[#allocation12 + $0x988] sm:$0xff]  ;;  %v6800_v32 = vcombine.high %v1965_v17, %v1969_v21  ;;  %v6799_v40 = vcombine.low %v1965_v17, %v1969_v21  ;;  %v6759_v21 = vcombine.low %v1925_v29, %v1929_v30 }
 0x396   :  { %v2097_v23 = vld [vmem:[#allocation12 + $0x9a8] sm:$0xff]  ;;  %v8295_v8 = vpack.c.bf16 %v1778_v16, %v1774_v19 }
 0x397   :  { %v6927_v41 = vcombine.low %v2093_v10, %v2097_v23  ;;  %v2061_v0 = vld [vmem:[#allocation12 + $0x888] sm:$0xff] }
 0x398   :  { %5054 = vmatpush2.bf16.msra.mxu1 %v7101_v51  ;;  %5097 = vmatpush2.bf16.msra.mxu0 %v6719_v61  ;;  %v6928_v51 = vcombine.high %v2093_v10, %v2097_v23  ;;  %v1957_v61 = vld [vmem:[#allocation12 + $0x548] sm:$0xff] }
 0x399   :  { %5055 = vmatprep.subr.bf16.mxu1 %v7094_v33  ;;  %5098 = vmatprep.subr.bf16.mxu0 %v6712_v37  ;;  %v1961_v33 = vld [vmem:[#allocation12 + $0x568] sm:$0xff] }
 0x39a   :  { %v2085_v37 = vld [vmem:[#allocation12 + $0x948] sm:$0xff]  ;;  %v6792_v43 = vcombine.high %v1957_v61, %v1961_v33  ;;  %v6791_v46 = vcombine.low %v1957_v61, %v1961_v33 }
 0x39b   :  { %v6919_v47 = vcombine.low %v2085_v37, %v2089_v38  ;;  %v2053_v4 = vld [vmem:[#allocation12 + $0x848] sm:$0xff] }
 0x39c   :  { %5056 = vmatpush2.bf16.msra.mxu1 %v7093_v44  ;;  %5099 = vmatpush2.bf16.msra.mxu0 %v6711_v57  ;;  %v6920_v44 = vcombine.high %v2085_v37, %v2089_v38  ;;  %v1949_v57 = vld [vmem:[#allocation12 + $0x508] sm:$0xff] }
 0x39d   :  { %5057 = vmatprep.subr.bf16.mxu1 %v7086_v25  ;;  %5100 = vmatprep.subr.bf16.mxu0 %v6704_v45  ;;  %v1953_v25 = vld [vmem:[#allocation12 + $0x528] sm:$0xff] }
 0x39e   :  { %v2077_v45 = vld [vmem:[#allocation12 + $0x908] sm:$0xff]  ;;  %v6784_v48 = vcombine.high %v1949_v57, %v1953_v25  ;;  %v6783_v59 = vcombine.low %v1949_v57, %v1953_v25 }
 0x39f   :  { %v6912_v35 = vcombine.high %v2077_v45, %v2081_v5  ;;  %v2057_v6 = vld [vmem:[#allocation12 + $0x868] sm:$0xff] }
 0x3a0   :  { %5058 = vmatpush2.bf16.msra.mxu1 %v7085_v42  ;;  %5101 = vmatpush2.bf16.msra.mxu0 %v6703_v9  ;;  %v1941_v42 = vld [vmem:[#allocation12 + $0x4c8] sm:$0xff]  ;;  %v6888_v16 = vcombine.high %v2053_v4, %v2057_v6  ;;  %v6887_v10 = vcombine.low %v2053_v4, %v2057_v6 }
 0x3a1   :  { %5059 = vmatprep.subr.bf16.mxu1 %v7078_v50  ;;  %5102 = vmatprep.subr.bf16.mxu0 %v6696_v13  ;;  %v1945_v9 = vld [vmem:[#allocation12 + $0x4e8] sm:$0xff]  ;;  %v6911_v13 = vcombine.low %v2077_v45, %v2081_v5 }
 0x3a2   :  { %v2069_v50 = vld [vmem:[#allocation12 + $0x8c8] sm:$0xff]  ;;  %v6776_v39 = vcombine.high %v1941_v42, %v1945_v9 }
 0x3a3   :  { %v6904_v28 = vcombine.high %v2069_v50, %v2073_v56  ;;  %v6903_v26 = vcombine.low %v2069_v50, %v2073_v56  ;;  %v2045_v17 = vld [vmem:[#allocation12 + $0x808] sm:$0xff] }
 0x3a4   :  { %5060 = vmatpush2.bf16.msra.mxu1 %v7077_v49  ;;  %5103 = vmatpush2.bf16.msra.mxu0 %v6695_v1  ;;  %v2065_v49 = vld [vmem:[#allocation12 + $0x8a8] sm:$0xff]  ;;  %v6775_v1 = vcombine.low %v1941_v42, %v1945_v9 }
 0x3a5   :  { %5061 = vmatprep.subr.bf16.mxu1 %v7070_v3  ;;  %5104 = vmatprep.subr.bf16.mxu0 %v6688_v22  ;;  %v6768_v3 = vcombine.high %v1933_v62, %v1937_v63  ;;  %v6896_v22 = vcombine.high %v2061_v0, %v2065_v49  ;;  %v2049_v19 = vld [vmem:[#allocation12 + $0x828] sm:$0xff] }
 0x3a6   :  { %v2169_v61 = vld [vmem:[#allocation12 + $0xbe8] sm:$0xff]  ;;  %v6879_v37 = vcombine.low %v2045_v17, %v2049_v19 }
 0x3a7   :  { %v2161_v57 = vld [vmem:[#allocation12 + $0xba8] sm:$0xff] }
 0x3a8   :  { %5062 = vmatpush2.bf16.msra.mxu1 %v7069_v11  ;;  %5105 = vmatpush2.bf16.msra.mxu0 %v6687_v12  ;;  %v6895_v11 = vcombine.low %v2061_v0, %v2065_v49  ;;  %v6760_v12 = vcombine.high %v1925_v29, %v1929_v30  ;;  %v2153_v42 = vld [vmem:[#allocation12 + $0xb68] sm:$0xff] }
 0x3a9   :  { %5117 = vmatprep.subr.bf16.mxu1 %v6808_v2  ;;  %5160 = vmatprep.subr.bf16.mxu0 %v6936_v58  ;;  %v1917_v2 = vld [vmem:[#allocation12 + $0x408] sm:$0xff] }
 0x3aa   :  { %v1921_v58 = vld [vmem:[#allocation12 + $0x428] sm:$0xff] }
 0x3ab   :  { %5064 = vmatmul.mubr.bf16.vlgmr.msra.gmra.mxu1 %v8295_v8  ;;  %5107 = vmatmul.mubr.bf16.vlgmr.msra.gmra.mxu0 %v8231_v15  ;;  %v6752_v23 = vcombine.high %v1917_v2, %v1921_v58  ;;  %v6751_v33 = vcombine.low %v1917_v2, %v1921_v58  ;;  %v2145_v62 = vld [vmem:[#allocation12 + $0xb28] sm:$0xff] }
 0x3ac   :  { %5118 = vmatpush1.bf16.msra.mxu1 %v6807_v24  ;;  %5149 = vmatprep.mubr.bf16.mxu1 %v8273_v52  ;;  %v6880_v24 = vcombine.high %v2045_v17, %v2049_v19  ;;  %v2137_v29 = vld [vmem:[#allocation12 + $0xae8] sm:$0xff] }
 0x3ad   :  { %5161 = vmatpush1.bf16.msra.mxu0 %v6935_v31  ;;  %5192 = vmatprep.mubr.bf16.mxu0 %v8238_v27  ;;  %v2037_v31 = vld [vmem:[#allocation12 + $0x7c8] sm:$0xff] }
 0x3ae   :  { %5119 = vmatprep.subr.bf16.mxu1 %v6800_v32  ;;  %5162 = vmatprep.subr.bf16.mxu0 %v6928_v51  ;;  %v2041_v32 = vld [vmem:[#allocation12 + $0x7e8] sm:$0xff] }
 0x3af   :  { %v2165_v51 = vld [vmem:[#allocation12 + $0xbc8] sm:$0xff]  ;;  %v6872_v38 = vcombine.high %v2037_v31, %v2041_v32  ;;  %v6871_v25 = vcombine.low %v2037_v31, %v2041_v32 }
 0x3b0   :  { %5120 = vmatpush1.bf16.msra.mxu1 %v6799_v40  ;;  %v7000_v40 = vcombine.high %v2165_v51, %v2169_v61  ;;  %v6999_v45 = vcombine.low %v2165_v51, %v2169_v61  ;;  %v2129_v2 = vld [vmem:[#allocation12 + $0xaa8] sm:$0xff] }
 0x3b1   :  { %5163 = vmatpush1.bf16.msra.mxu0 %v6927_v41  ;;  %5121 = vmatprep.subr.bf16.mxu1 %v6792_v43  ;;  %v2029_v41 = vld [vmem:[#allocation12 + $0x788] sm:$0xff] }
 0x3b2   :  { %5164 = vmatprep.subr.bf16.mxu0 %v6920_v44  ;;  %v2033_v43 = vld [vmem:[#allocation12 + $0x7a8] sm:$0xff] }
 0x3b3   :  { %v2157_v44 = vld [vmem:[#allocation12 + $0xb88] sm:$0xff]  ;;  %v6864_v5 = vcombine.high %v2029_v41, %v2033_v43  ;;  %v6863_v9 = vcombine.low %v2029_v41, %v2033_v43 }
 0x3b4   :  { %5122 = vmatpush1.bf16.msra.mxu1 %v6791_v46  ;;  %v6992_v46 = vcombine.high %v2157_v44, %v2161_v57  ;;  %v6991_v50 = vcombine.low %v2157_v44, %v2161_v57  ;;  %v2121_v31 = vld [vmem:[#allocation12 + $0xa68] sm:$0xff] }
 0x3b5   :  { %5165 = vmatpush1.bf16.msra.mxu0 %v6919_v47  ;;  %5123 = vmatprep.subr.bf16.mxu1 %v6784_v48  ;;  %v2021_v47 = vld [vmem:[#allocation12 + $0x748] sm:$0xff] }
 0x3b6   :  { %5166 = vmatprep.subr.bf16.mxu0 %v6912_v35  ;;  %v2025_v48 = vld [vmem:[#allocation12 + $0x768] sm:$0xff] }
 0x3b7   :  { %v2149_v35 = vld [vmem:[#allocation12 + $0xb48] sm:$0xff]  ;;  %v6856_v56 = vcombine.high %v2021_v47, %v2025_v48  ;;  %v6855_v63 = vcombine.low %v2021_v47, %v2025_v48  ;;  %v1850_v47 = vld [vmem:[#allocation12 + $0x1f0] sm:$0xff] }
 0x3b8   :  { %5124 = vmatpush1.bf16.msra.mxu1 %v6783_v59  ;;  %v6984_v59 = vcombine.high %v2149_v35, %v2153_v42  ;;  %v6983_v0 = vcombine.low %v2149_v35, %v2153_v42  ;;  %v2113_v41 = vld [vmem:[#allocation12 + $0xa28] sm:$0xff] }
 0x3b9   :  { %5167 = vmatpush1.bf16.msra.mxu0 %v6911_v13  ;;  %5125 = vmatprep.subr.bf16.mxu1 %v6776_v39  ;;  %v2013_v13 = vld [vmem:[#allocation12 + $0x708] sm:$0xff] }
 0x3ba   :  { %5168 = vmatprep.subr.bf16.mxu0 %v6904_v28  ;;  %v2017_v39 = vld [vmem:[#allocation12 + $0x728] sm:$0xff] }
 0x3bb   :  { %v2141_v28 = vld [vmem:[#allocation12 + $0xb08] sm:$0xff]  ;;  %v6848_v49 = vcombine.high %v2013_v13, %v2017_v39  ;;  %v6847_v30 = vcombine.low %v2013_v13, %v2017_v39  ;;  %v1838_v13 = vld [vmem:[#allocation12 + $0x190] sm:$0xff] }
 0x3bc   :  { %5126 = vmatpush1.bf16.msra.mxu1 %v6775_v1  ;;  %v6976_v1 = vcombine.high %v2141_v28, %v2145_v62  ;;  %v6975_v4 = vcombine.low %v2141_v28, %v2145_v62  ;;  %v1842_v39 = vld [vmem:[#allocation12 + $0x1b0] sm:$0xff] }
 0x3bd   :  { %5169 = vmatpush1.bf16.msra.mxu0 %v6903_v26  ;;  %5127 = vmatprep.subr.bf16.mxu1 %v6768_v3  ;;  %v2005_v26 = vld [vmem:[#allocation12 + $0x6c8] sm:$0xff] }
 0x3be   :  { %5170 = vmatprep.subr.bf16.mxu0 %v6896_v22  ;;  %v2009_v3 = vld [vmem:[#allocation12 + $0x6e8] sm:$0xff] }
 0x3bf   :  { %v2133_v22 = vld [vmem:[#allocation12 + $0xac8] sm:$0xff]  ;;  %v6840_v6 = vcombine.high %v2005_v26, %v2009_v3  ;;  %v6839_v58 = vcombine.low %v2005_v26, %v2009_v3  ;;  %v1834_v26 = vld [vmem:[#allocation12 + $0x170] sm:$0xff] }
 0x3c0   :  { %5128 = vmatpush1.bf16.msra.mxu1 %v6767_v7  ;;  %v6968_v7 = vcombine.high %v2133_v22, %v2137_v29  ;;  %v6967_v17 = vcombine.low %v2133_v22, %v2137_v29  ;;  %v6673_v22 = vcombine.low %v1838_v13, %v1842_v39 }
 0x3c1   :  { %5171 = vmatpush1.bf16.msra.mxu0 %v6895_v11  ;;  %5129 = vmatprep.subr.bf16.mxu1 %v6760_v12  ;;  %v1997_v11 = vld [vmem:[#allocation12 + $0x688] sm:$0xff] }
 0x3c2   :  { %5172 = vmatprep.subr.bf16.mxu0 %v6888_v16  ;;  %v2001_v12 = vld [vmem:[#allocation12 + $0x6a8] sm:$0xff] }
 0x3c3   :  { %v2125_v16 = vld [vmem:[#allocation12 + $0xa88] sm:$0xff]  ;;  %v6832_v19 = vcombine.high %v1997_v11, %v2001_v12  ;;  %v6831_v32 = vcombine.low %v1997_v11, %v2001_v12  ;;  %v1826_v11 = vld [vmem:[#allocation12 + $0x130] sm:$0xff] }
 0x3c4   :  { %5130 = vmatpush1.bf16.msra.mxu1 %v6759_v21  ;;  %v6960_v21 = vcombine.high %v2125_v16, %v2129_v2  ;;  %v6959_v51 = vcombine.low %v2125_v16, %v2129_v2 }
 0x3c5   :  { %5173 = vmatpush1.bf16.msra.mxu0 %v6887_v10  ;;  %5131 = vmatprep.subr.bf16.mxu1 %v6752_v23  ;;  %v1989_v10 = vld [vmem:[#allocation12 + $0x648] sm:$0xff] }
 0x3c6   :  { %5174 = vmatprep.subr.bf16.mxu0 %v6880_v24  ;;  %v1993_v23 = vld [vmem:[#allocation12 + $0x668] sm:$0xff] }
 0x3c7   :  { %v2117_v24 = vld [vmem:[#allocation12 + $0xa48] sm:$0xff]  ;;  %v6824_v61 = vcombine.high %v1989_v10, %v1993_v23  ;;  %v6823_v43 = vcombine.low %v1989_v10, %v1993_v23  ;;  %v1818_v10 = vld [vmem:[#allocation12 + $0xf0] sm:$0xff] }
 0x3c8   :  { %5132 = vmatpush1.bf16.msra.mxu1 %v6751_v33  ;;  %v6952_v33 = vcombine.high %v2117_v24, %v2121_v31  ;;  %v6951_v44 = vcombine.low %v2117_v24, %v2121_v31 }
 0x3c9   :  { %5175 = vmatpush1.bf16.msra.mxu0 %v6879_v37  ;;  %5133 = vmatprep.subr.bf16.mxu1 %v6872_v38  ;;  %v1981_v37 = vld [vmem:[#allocation12 + $0x608] sm:$0xff] }
 0x3ca   :  { %5176 = vmatprep.subr.bf16.mxu0 %v7000_v40  ;;  %v1985_v38 = vld [vmem:[#allocation12 + $0x628] sm:$0xff] }
 0x3cb   :  { %v2109_v40 = vld [vmem:[#allocation12 + $0xa08] sm:$0xff]  ;;  %v6816_v57 = vcombine.high %v1981_v37, %v1985_v38  ;;  %v6815_v48 = vcombine.low %v1981_v37, %v1985_v38  ;;  %v1810_v37 = vld [vmem:[#allocation12 + $0xb0] sm:$0xff] }
 0x3cc   :  { %5134 = vmatpush2.bf16.msra.mxu1 %v6871_v25  ;;  %v6944_v25 = vcombine.high %v2109_v40, %v2113_v41  ;;  %v6943_v35 = vcombine.low %v2109_v40, %v2113_v41 }
 0x3cd   :  { %5177 = vmatpush2.bf16.msra.mxu0 %v6999_v45  ;;  %5135 = vmatprep.subr.bf16.mxu1 %v6864_v5  ;;  %v2229_v45 = vld [vmem:[#allocation12 + $0xdc8] sm:$0xff] }
 0x3ce   :  { %5178 = vmatprep.subr.bf16.mxu0 %v6992_v46  ;;  %v2233_v5 = vld [vmem:[#allocation12 + $0xde8] sm:$0xff]  ;;  %v1846_v46 = vld [vmem:[#allocation12 + $0x1d0] sm:$0xff] }
 0x3cf   :  { %v7064_v42 = vcombine.high %v2229_v45, %v2233_v5  ;;  %v6681_v28 = vcombine.low %v1846_v46, %v1850_v47 }
 0x3d0   :  { %5136 = vmatpush2.bf16.msra.mxu1 %v6863_v9  ;;  %v6682_v9 = vcombine.high %v1846_v46, %v1850_v47 }
 0x3d1   :  { %5179 = vmatpush2.bf16.msra.mxu0 %v6991_v50  ;;  %5137 = vmatprep.subr.bf16.mxu1 %v6856_v56  ;;  %v2221_v50 = vld [vmem:[#allocation12 + $0xd88] sm:$0xff] }
 0x3d2   :  { %5180 = vmatprep.subr.bf16.mxu0 %v6984_v59  ;;  %v2225_v56 = vld [vmem:[#allocation12 + $0xda8] sm:$0xff]  ;;  %v7063_v59 = vcombine.low %v2229_v45, %v2233_v5  ;;  %v1802_v45 = vld [vmem:[#allocation12 + $0x70] sm:$0xff] }
 0x3d3   :  { %v7056_v62 = vcombine.high %v2221_v50, %v2225_v56  ;;  %v7055_v3 = vcombine.low %v2221_v50, %v2225_v56  ;;  %v1794_v50 = vld [vmem:[#allocation12 + $0x30] sm:$0xff] }
 0x3d4   :  { %5138 = vmatpush2.bf16.msra.mxu1 %v6855_v63  ;;  %v2213_v63 = vld [vmem:[#allocation12 + $0xd48] sm:$0xff] }
 0x3d5   :  { %5181 = vmatpush2.bf16.msra.mxu0 %v6983_v0  ;;  %5139 = vmatprep.subr.bf16.mxu1 %v6848_v49  ;;  %v2217_v0 = vld [vmem:[#allocation12 + $0xd68] sm:$0xff]  ;;  %v6674_v49 = vcombine.high %v1838_v13, %v1842_v39 }
 0x3d6   :  { %5182 = vmatprep.subr.bf16.mxu0 %v6976_v1  ;;  %v1830_v1 = vld [vmem:[#allocation12 + $0x150] sm:$0xff]  ;;  %v7048_v29 = vcombine.high %v2213_v63, %v2217_v0  ;;  %v7047_v12 = vcombine.low %v2213_v63, %v2217_v0 }
 0x3d7   :  { %v6665_v16 = vcombine.low %v1830_v1, %v1834_v26  ;;  %v1910_v63 = vld [vmem:[#allocation12 + $0x3d0] sm:$0xff] }
 0x3d8   :  { %5140 = vmatpush2.bf16.msra.mxu1 %v6847_v30  ;;  %v6666_v30 = vcombine.high %v1830_v1, %v1834_v26  ;;  %v1914_v0 = vld [vmem:[#allocation12 + $0x3f0] sm:$0xff] }
 0x3d9   :  { %5183 = vmatpush2.bf16.msra.mxu0 %v6975_v4  ;;  %5141 = vmatprep.subr.bf16.mxu1 %v6840_v6  ;;  %v2205_v4 = vld [vmem:[#allocation12 + $0xd08] sm:$0xff] }
 0x3da   :  { %5184 = vmatprep.subr.bf16.mxu0 %v6968_v7  ;;  %v2209_v6 = vld [vmem:[#allocation12 + $0xd28] sm:$0xff]  ;;  %v1822_v7 = vld [vmem:[#allocation12 + $0x110] sm:$0xff] }
 0x3db   :  { %v7040_v2 = vcombine.high %v2205_v4, %v2209_v6  ;;  %v7039_v23 = vcombine.low %v2205_v4, %v2209_v6  ;;  %v6657_v24 = vcombine.low %v1822_v7, %v1826_v11  ;;  %v1906_v4 = vld [vmem:[#allocation12 + $0x3b0] sm:$0xff] }
 0x3dc   :  { %5142 = vmatpush2.bf16.msra.mxu1 %v6839_v58  ;;  %v6658_v58 = vcombine.high %v1822_v7, %v1826_v11  ;;  %v6745_v7 = vcombine.low %v1910_v63, %v1914_v0 }
 0x3dd   :  { %5185 = vmatpush2.bf16.msra.mxu0 %v6967_v17  ;;  %5143 = vmatprep.subr.bf16.mxu1 %v6832_v19  ;;  %v2197_v17 = vld [vmem:[#allocation12 + $0xcc8] sm:$0xff] }
 0x3de   :  { %5186 = vmatprep.subr.bf16.mxu0 %v6960_v21  ;;  %v2201_v19 = vld [vmem:[#allocation12 + $0xce8] sm:$0xff]  ;;  %v1814_v21 = vld [vmem:[#allocation12 + $0xd0] sm:$0xff] }
 0x3df   :  { %v7032_v31 = vcombine.high %v2197_v17, %v2201_v19  ;;  %v7031_v38 = vcombine.low %v2197_v17, %v2201_v19  ;;  %v6649_v40 = vcombine.low %v1814_v21, %v1818_v10  ;;  %v1898_v17 = vld [vmem:[#allocation12 + $0x370] sm:$0xff] }
 0x3e0   :  { %5144 = vmatpush2.bf16.msra.mxu1 %v6831_v32  ;;  %v6650_v32 = vcombine.high %v1814_v21, %v1818_v10 }
 0x3e1   :  { %5187 = vmatpush2.bf16.msra.mxu0 %v6959_v51  ;;  %5145 = vmatprep.subr.bf16.mxu1 %v6824_v61  ;;  %v2189_v51 = vld [vmem:[#allocation12 + $0xc88] sm:$0xff] }
 0x3e2   :  { %5188 = vmatprep.subr.bf16.mxu0 %v6952_v33  ;;  %v2193_v61 = vld [vmem:[#allocation12 + $0xca8] sm:$0xff]  ;;  %v1806_v33 = vld [vmem:[#allocation12 + $0x90] sm:$0xff] }
 0x3e3   :  { %v7024_v41 = vcombine.high %v2189_v51, %v2193_v61  ;;  %v7023_v5 = vcombine.low %v2189_v51, %v2193_v61  ;;  %v6641_v46 = vcombine.low %v1806_v33, %v1810_v37  ;;  %v1890_v51 = vld [vmem:[#allocation12 + $0x330] sm:$0xff] }
 0x3e4   :  { %5146 = vmatpush2.bf16.msra.mxu1 %v6823_v43  ;;  %v6642_v43 = vcombine.high %v1806_v33, %v1810_v37 }
 0x3e5   :  { %5189 = vmatpush2.bf16.msra.mxu0 %v6951_v44  ;;  %5147 = vmatprep.subr.bf16.mxu1 %v6816_v57  ;;  %v2181_v44 = vld [vmem:[#allocation12 + $0xc48] sm:$0xff] }
 0x3e6   :  { %5190 = vmatprep.subr.bf16.mxu0 %v6944_v25  ;;  %v2185_v57 = vld [vmem:[#allocation12 + $0xc68] sm:$0xff]  ;;  %v1798_v25 = vld [vmem:[#allocation12 + $0x50] sm:$0xff] }
 0x3e7   :  { %v7016_v47 = vcombine.high %v2181_v44, %v2185_v57  ;;  %v7015_v56 = vcombine.low %v2181_v44, %v2185_v57  ;;  %v1882_v44 = vld [vmem:[#allocation12 + $0x2f0] sm:$0xff] }
 0x3e8   :  { %5148 = vmatpush2.bf16.msra.mxu1 %v6815_v48  ;;  %v6634_v48 = vcombine.high %v1798_v25, %v1802_v45 }
 0x3e9   :  { %5191 = vmatpush2.bf16.msra.mxu0 %v6943_v35  ;;  %5203 = vmatprep.subr.bf16.mxu1 %v7064_v42  ;;  %v2173_v35 = vld [vmem:[#allocation12 + $0xc08] sm:$0xff] }
 0x3ea   :  { %5246 = vmatprep.subr.bf16.mxu0 %v6682_v9  ;;  %v2177_v42 = vld [vmem:[#allocation12 + $0xc28] sm:$0xff]  ;;  %v1790_v9 = vld [vmem:[#allocation12 + $0x10] sm:$0xff] }
 0x3eb   :  { %5150 = vmatmul.mubr.bf16.vlgmr.msra.gmra.mxu1 %v8277_v36  ;;  %v7008_v13 = vcombine.high %v2173_v35, %v2177_v42  ;;  %v6626_v39 = vcombine.high %v1790_v9, %v1794_v50  ;;  %v6625_v1 = vcombine.low %v1790_v9, %v1794_v50 }
 0x3ec   :  { %5193 = vmatmul.mubr.bf16.vlgmr.msra.gmra.mxu0 %v8275_v34  ;;  %5204 = vmatpush1.bf16.msra.mxu1 %v7063_v59  ;;  %v6633_v59 = vcombine.low %v1798_v25, %v1802_v45 }
 0x3ed   :  { %5235 = vmatprep.mubr.bf16.mxu1 %v8286_v60  ;;  %5247 = vmatpush1.bf16.msra.mxu0 %v6681_v28  ;;  %v2293_v28 = vld [vmem:[#allocation12 + $0xfc8] sm:$0xff] }
 0x3ee   :  { %5278 = vmatprep.mubr.bf16.mxu0 %v8229_v14  ;;  %5205 = vmatprep.subr.bf16.mxu1 %v7056_v62  ;;  %v2297_v62 = vld [vmem:[#allocation12 + $0xfe8] sm:$0xff] }
 0x3ef   :  { %5248 = vmatprep.subr.bf16.mxu0 %v6674_v49  ;;  %v7007_v49 = vcombine.low %v2173_v35, %v2177_v42  ;;  %v7128_v26 = vcombine.high %v2293_v28, %v2297_v62  ;;  %v7127_v6 = vcombine.low %v2293_v28, %v2297_v62  ;;  %v1874_v35 = vld [vmem:[#allocation12 + $0x2b0] sm:$0xff] }
 0x3f0   :  { %5206 = vmatpush1.bf16.msra.mxu1 %v7055_v3  ;;  %v6746_v3 = vcombine.high %v1910_v63, %v1914_v0  ;;  %v1866_v28 = vld [vmem:[#allocation12 + $0x270] sm:$0xff] }
 0x3f1   :  { %5249 = vmatpush1.bf16.msra.mxu0 %v6673_v22  ;;  %5207 = vmatprep.subr.bf16.mxu1 %v7048_v29  ;;  %v2285_v22 = vld [vmem:[#allocation12 + $0xf88] sm:$0xff] }
 0x3f2   :  { %5250 = vmatprep.subr.bf16.mxu0 %v6666_v30  ;;  %v2289_v29 = vld [vmem:[#allocation12 + $0xfa8] sm:$0xff]  ;;  %v1902_v30 = vld [vmem:[#allocation12 + $0x390] sm:$0xff] }
 0x3f3   :  { %v7120_v11 = vcombine.high %v2285_v22, %v2289_v29  ;;  %v7119_v19 = vcombine.low %v2285_v22, %v2289_v29  ;;  %v6737_v21 = vcombine.low %v1902_v30, %v1906_v4  ;;  %v1858_v22 = vld [vmem:[#allocation12 + $0x230] sm:$0xff] }
 0x3f4   :  { %5208 = vmatpush1.bf16.msra.mxu1 %v7047_v12  ;;  %v6738_v12 = vcombine.high %v1902_v30, %v1906_v4 }
 0x3f5   :  { %5251 = vmatpush1.bf16.msra.mxu0 %v6665_v16  ;;  %5209 = vmatprep.subr.bf16.mxu1 %v7040_v2  ;;  %v2277_v16 = vld [vmem:[#allocation12 + $0xf48] sm:$0xff] }
 0x3f6   :  { %5252 = vmatprep.subr.bf16.mxu0 %v6658_v58  ;;  %v2281_v2 = vld [vmem:[#allocation12 + $0xf68] sm:$0xff]  ;;  %v1894_v58 = vld [vmem:[#allocation12 + $0x350] sm:$0xff] }
 0x3f7   :  { %v7112_v10 = vcombine.high %v2277_v16, %v2281_v2  ;;  %v7111_v61 = vcombine.low %v2277_v16, %v2281_v2  ;;  %v6729_v33 = vcombine.low %v1894_v58, %v1898_v17  ;;  %v2106_v16 = vld [vmem:[#allocation12 + $0x9f0] sm:$0xff] }
 0x3f8   :  { %5210 = vmatpush1.bf16.msra.mxu1 %v7039_v23  ;;  %v6730_v23 = vcombine.high %v1894_v58, %v1898_v17 }
 0x3f9   :  { %5253 = vmatpush1.bf16.msra.mxu0 %v6657_v24  ;;  %5211 = vmatprep.subr.bf16.mxu1 %v7032_v31  ;;  %v2269_v24 = vld [vmem:[#allocation12 + $0xf08] sm:$0xff] }
 0x3fa   :  { %5254 = vmatprep.subr.bf16.mxu0 %v6650_v32  ;;  %v2273_v31 = vld [vmem:[#allocation12 + $0xf28] sm:$0xff]  ;;  %v1886_v32 = vld [vmem:[#allocation12 + $0x310] sm:$0xff] }
 0x3fb   :  { %v7104_v37 = vcombine.high %v2269_v24, %v2273_v31  ;;  %v7103_v57 = vcombine.low %v2269_v24, %v2273_v31  ;;  %v6721_v25 = vcombine.low %v1886_v32, %v1890_v51  ;;  %v2094_v24 = vld [vmem:[#allocation12 + $0x990] sm:$0xff] }
 0x3fc   :  { %5212 = vmatpush1.bf16.msra.mxu1 %v7031_v38  ;;  %v6722_v38 = vcombine.high %v1886_v32, %v1890_v51  ;;  %v2098_v31 = vld [vmem:[#allocation12 + $0x9b0] sm:$0xff] }
 0x3fd   :  { %5255 = vmatpush1.bf16.msra.mxu0 %v6649_v40  ;;  %5213 = vmatprep.subr.bf16.mxu1 %v7024_v41  ;;  %v2261_v40 = vld [vmem:[#allocation12 + $0xec8] sm:$0xff] }
 0x3fe   :  { %5256 = vmatprep.subr.bf16.mxu0 %v6642_v43  ;;  %v2265_v41 = vld [vmem:[#allocation12 + $0xee8] sm:$0xff]  ;;  %v1878_v43 = vld [vmem:[#allocation12 + $0x2d0] sm:$0xff] }
 0x3ff   :  { %v7096_v45 = vcombine.high %v2261_v40, %v2265_v41  ;;  %v7095_v42 = vcombine.low %v2261_v40, %v2265_v41  ;;  %v6713_v9 = vcombine.low %v1878_v43, %v1882_v44  ;;  %v2090_v40 = vld [vmem:[#allocation12 + $0x970] sm:$0xff] }
 0x400   :  { %5214 = vmatpush1.bf16.msra.mxu1 %v7023_v5  ;;  %v6714_v5 = vcombine.high %v1878_v43, %v1882_v44  ;;  %v6929_v43 = vcombine.low %v2094_v24, %v2098_v31 }
 0x401   :  { %5257 = vmatpush1.bf16.msra.mxu0 %v6641_v46  ;;  %5215 = vmatprep.subr.bf16.mxu1 %v7016_v47  ;;  %v2253_v46 = vld [vmem:[#allocation12 + $0xe88] sm:$0xff] }
 0x402   :  { %5258 = vmatprep.subr.bf16.mxu0 %v6634_v48  ;;  %v2257_v47 = vld [vmem:[#allocation12 + $0xea8] sm:$0xff]  ;;  %v1870_v48 = vld [vmem:[#allocation12 + $0x290] sm:$0xff] }
 0x403   :  { %v7088_v50 = vcombine.high %v2253_v46, %v2257_v47  ;;  %v7087_v62 = vcombine.low %v2253_v46, %v2257_v47  ;;  %v6705_v63 = vcombine.low %v1870_v48, %v1874_v35  ;;  %v2082_v46 = vld [vmem:[#allocation12 + $0x930] sm:$0xff] }
 0x404   :  { %5216 = vmatpush1.bf16.msra.mxu1 %v7015_v56  ;;  %v6706_v56 = vcombine.high %v1870_v48, %v1874_v35 }
 0x405   :  { %5259 = vmatpush1.bf16.msra.mxu0 %v6633_v59  ;;  %5217 = vmatprep.subr.bf16.mxu1 %v7008_v13  ;;  %v2245_v59 = vld [vmem:[#allocation12 + $0xe48] sm:$0xff] }
 0x406   :  { %5260 = vmatprep.subr.bf16.mxu0 %v6626_v39  ;;  %v2249_v13 = vld [vmem:[#allocation12 + $0xe68] sm:$0xff]  ;;  %v1862_v39 = vld [vmem:[#allocation12 + $0x250] sm:$0xff] }
 0x407   :  { %v7080_v0 = vcombine.high %v2245_v59, %v2249_v13  ;;  %v7079_v29 = vcombine.low %v2245_v59, %v2249_v13  ;;  %v6697_v30 = vcombine.low %v1862_v39, %v1866_v28  ;;  %v2074_v59 = vld [vmem:[#allocation12 + $0x8f0] sm:$0xff] }
 0x408   :  { %5218 = vmatpush1.bf16.msra.mxu1 %v7007_v49  ;;  %v6698_v49 = vcombine.high %v1862_v39, %v1866_v28 }
 0x409   :  { %5261 = vmatpush1.bf16.msra.mxu0 %v6625_v1  ;;  %5219 = vmatprep.subr.bf16.mxu1 %v7128_v26  ;;  %v2237_v1 = vld [vmem:[#allocation12 + $0xe08] sm:$0xff] }
 0x40a   :  { %5262 = vmatprep.subr.bf16.mxu0 %v6746_v3  ;;  %v2241_v26 = vld [vmem:[#allocation12 + $0xe28] sm:$0xff]  ;;  %v1854_v3 = vld [vmem:[#allocation12 + $0x210] sm:$0xff] }
 0x40b   :  { %v7072_v4 = vcombine.high %v2237_v1, %v2241_v26  ;;  %v7071_v2 = vcombine.low %v2237_v1, %v2241_v26  ;;  %v6689_v58 = vcombine.low %v1854_v3, %v1858_v22  ;;  %v2066_v1 = vld [vmem:[#allocation12 + $0x8b0] sm:$0xff] }
 0x40c   :  { %5220 = vmatpush2.bf16.msra.mxu1 %v7127_v6  ;;  %v6690_v6 = vcombine.high %v1854_v3, %v1858_v22 }
 0x40d   :  { %5263 = vmatpush2.bf16.msra.mxu0 %v6745_v7  ;;  %5221 = vmatprep.subr.bf16.mxu1 %v7120_v11  ;;  %v1974_v7 = vld [vmem:[#allocation12 + $0x5d0] sm:$0xff] }
 0x40e   :  { %5264 = vmatprep.subr.bf16.mxu0 %v6738_v12  ;;  %v1978_v11 = vld [vmem:[#allocation12 + $0x5f0] sm:$0xff] }
 0x40f   :  { %v2102_v12 = vld [vmem:[#allocation12 + $0x9d0] sm:$0xff]  ;;  %v6810_v17 = vcombine.high %v1974_v7, %v1978_v11 }
 0x410   :  { %5222 = vmatpush2.bf16.msra.mxu1 %v7119_v19  ;;  %v6938_v19 = vcombine.high %v2102_v12, %v2106_v16  ;;  %v6937_v32 = vcombine.low %v2102_v12, %v2106_v16 }
 0x411   :  { %5265 = vmatpush2.bf16.msra.mxu0 %v6737_v21  ;;  %5223 = vmatprep.subr.bf16.mxu1 %v7112_v10  ;;  %v1966_v21 = vld [vmem:[#allocation12 + $0x590] sm:$0xff] }
 0x412   :  { %5266 = vmatprep.subr.bf16.mxu0 %v6730_v23  ;;  %v1970_v10 = vld [vmem:[#allocation12 + $0x5b0] sm:$0xff]  ;;  %v6809_v23 = vcombine.low %v1974_v7, %v1978_v11 }
 0x413   :  { %v6802_v51 = vcombine.high %v1966_v21, %v1970_v10  ;;  %v6801_v41 = vcombine.low %v1966_v21, %v1970_v10  ;;  %v2058_v7 = vld [vmem:[#allocation12 + $0x870] sm:$0xff] }
 0x414   :  { %5224 = vmatpush2.bf16.msra.mxu1 %v7111_v61  ;;  %v1958_v61 = vld [vmem:[#allocation12 + $0x550] sm:$0xff] }
 0x415   :  { %5267 = vmatpush2.bf16.msra.mxu0 %v6729_v33  ;;  %5225 = vmatprep.subr.bf16.mxu1 %v7104_v37  ;;  %v1962_v33 = vld [vmem:[#allocation12 + $0x570] sm:$0xff]  ;;  %v6930_v37 = vcombine.high %v2094_v24, %v2098_v31 }
 0x416   :  { %5268 = vmatprep.subr.bf16.mxu0 %v6722_v38  ;;  %v2086_v38 = vld [vmem:[#allocation12 + $0x950] sm:$0xff]  ;;  %v6794_v44 = vcombine.high %v1958_v61, %v1962_v33  ;;  %v6793_v47 = vcombine.low %v1958_v61, %v1962_v33 }
 0x417   :  { %v6921_v48 = vcombine.low %v2086_v38, %v2090_v40  ;;  %v2050_v21 = vld [vmem:[#allocation12 + $0x830] sm:$0xff] }
 0x418   :  { %5226 = vmatpush2.bf16.msra.mxu1 %v7103_v57  ;;  %v6922_v57 = vcombine.high %v2086_v38, %v2090_v40  ;;  %v2166_v61 = vld [vmem:[#allocation12 + $0xbd0] sm:$0xff] }
 0x419   :  { %5269 = vmatpush2.bf16.msra.mxu0 %v6721_v25  ;;  %5227 = vmatprep.subr.bf16.mxu1 %v7096_v45  ;;  %v1950_v25 = vld [vmem:[#allocation12 + $0x510] sm:$0xff] }
 0x41a   :  { %5270 = vmatprep.subr.bf16.mxu0 %v6714_v5  ;;  %v1954_v45 = vld [vmem:[#allocation12 + $0x530] sm:$0xff] }
 0x41b   :  { %v2078_v5 = vld [vmem:[#allocation12 + $0x910] sm:$0xff]  ;;  %v6786_v35 = vcombine.high %v1950_v25, %v1954_v45  ;;  %v6785_v13 = vcombine.low %v1950_v25, %v1954_v45 }
 0x41c   :  { %5228 = vmatpush2.bf16.msra.mxu1 %v7095_v42  ;;  %v6914_v42 = vcombine.high %v2078_v5, %v2082_v46  ;;  %v6913_v39 = vcombine.low %v2078_v5, %v2082_v46  ;;  %v2170_v33 = vld [vmem:[#allocation12 + $0xbf0] sm:$0xff] }
 0x41d   :  { %5271 = vmatpush2.bf16.msra.mxu0 %v6713_v9  ;;  %5229 = vmatprep.subr.bf16.mxu1 %v7088_v50  ;;  %v1942_v9 = vld [vmem:[#allocation12 + $0x4d0] sm:$0xff]  ;;  %v7001_v5 = vcombine.low %v2166_v61, %v2170_v33 }
 0x41e   :  { %5272 = vmatprep.subr.bf16.mxu0 %v6706_v56  ;;  %v1946_v50 = vld [vmem:[#allocation12 + $0x4f0] sm:$0xff] }
 0x41f   :  { %v2070_v56 = vld [vmem:[#allocation12 + $0x8d0] sm:$0xff]  ;;  %v6778_v28 = vcombine.high %v1942_v9, %v1946_v50  ;;  %v6777_v26 = vcombine.low %v1942_v9, %v1946_v50 }
 0x420   :  { %5230 = vmatpush2.bf16.msra.mxu1 %v7087_v62  ;;  %v6906_v62 = vcombine.high %v2070_v56, %v2074_v59  ;;  %v6905_v3 = vcombine.low %v2070_v56, %v2074_v59  ;;  %v2162_v25 = vld [vmem:[#allocation12 + $0xbb0] sm:$0xff] }
 0x421   :  { %5273 = vmatpush2.bf16.msra.mxu0 %v6705_v63  ;;  %5231 = vmatprep.subr.bf16.mxu1 %v7080_v0  ;;  %v1934_v63 = vld [vmem:[#allocation12 + $0x490] sm:$0xff] }
 0x422   :  { %5274 = vmatprep.subr.bf16.mxu0 %v6698_v49  ;;  %v1938_v0 = vld [vmem:[#allocation12 + $0x4b0] sm:$0xff] }
 0x423   :  { %v2062_v49 = vld [vmem:[#allocation12 + $0x890] sm:$0xff]  ;;  %v6770_v22 = vcombine.high %v1934_v63, %v1938_v0  ;;  %v6769_v11 = vcombine.low %v1934_v63, %v1938_v0 }
 0x424   :  { %5232 = vmatpush2.bf16.msra.mxu1 %v7079_v29  ;;  %v6898_v29 = vcombine.high %v2062_v49, %v2066_v1  ;;  %v6897_v12 = vcombine.low %v2062_v49, %v2066_v1  ;;  %v2154_v9 = vld [vmem:[#allocation12 + $0xb70] sm:$0xff] }
 0x425   :  { %5275 = vmatpush2.bf16.msra.mxu0 %v6697_v30  ;;  %5233 = vmatprep.subr.bf16.mxu1 %v7072_v4  ;;  %v1926_v30 = vld [vmem:[#allocation12 + $0x450] sm:$0xff] }
 0x426   :  { %5276 = vmatprep.subr.bf16.mxu0 %v6690_v6  ;;  %v1930_v4 = vld [vmem:[#allocation12 + $0x470] sm:$0xff] }
 0x427   :  { %v2054_v6 = vld [vmem:[#allocation12 + $0x850] sm:$0xff]  ;;  %v6762_v16 = vcombine.high %v1926_v30, %v1930_v4  ;;  %v6761_v10 = vcombine.low %v1926_v30, %v1930_v4 }
 0x428   :  { %5234 = vmatpush2.bf16.msra.mxu1 %v7071_v2  ;;  %v6890_v2 = vcombine.high %v2054_v6, %v2058_v7  ;;  %v2146_v63 = vld [vmem:[#allocation12 + $0xb30] sm:$0xff] }
 0x429   :  { %5277 = vmatpush2.bf16.msra.mxu0 %v6689_v58  ;;  %5289 = vmatprep.subr.bf16.mxu1 %v6810_v17  ;;  %v1918_v58 = vld [vmem:[#allocation12 + $0x410] sm:$0xff] }
 0x42a   :  { %5332 = vmatprep.subr.bf16.mxu0 %v6938_v19  ;;  %v1922_v17 = vld [vmem:[#allocation12 + $0x430] sm:$0xff] }
 0x42b   :  { %5236 = vmatmul.mubr.bf16.vlgmr.msra.gmra.mxu1 %v8295_v8  ;;  %v2046_v19 = vld [vmem:[#allocation12 + $0x810] sm:$0xff]  ;;  %v6754_v24 = vcombine.high %v1918_v58, %v1922_v17 }
 0x42c   :  { %5279 = vmatmul.mubr.bf16.vlgmr.msra.gmra.mxu0 %v8231_v15  ;;  %5290 = vmatpush1.bf16.msra.mxu1 %v6809_v23  ;;  %v6889_v23 = vcombine.low %v2054_v6, %v2058_v7  ;;  %v6882_v31 = vcombine.high %v2046_v19, %v2050_v21  ;;  %v6881_v38 = vcombine.low %v2046_v19, %v2050_v21  ;;  %v2138_v30 = vld [vmem:[#allocation12 + $0xaf0] sm:$0xff] }
 0x42d   :  { %5321 = vmatprep.mubr.bf16.mxu1 %v8273_v52  ;;  %5333 = vmatpush1.bf16.msra.mxu0 %v6937_v32  ;;  %v2038_v32 = vld [vmem:[#allocation12 + $0x7d0] sm:$0xff] }
 0x42e   :  { %5364 = vmatprep.mubr.bf16.mxu0 %v8238_v27  ;;  %5291 = vmatprep.subr.bf16.mxu1 %v6802_v51  ;;  %v2042_v51 = vld [vmem:[#allocation12 + $0x7f0] sm:$0xff] }
 0x42f   :  { %5334 = vmatprep.subr.bf16.mxu0 %v6930_v37  ;;  %v6753_v37 = vcombine.low %v1918_v58, %v1922_v17  ;;  %v6874_v40 = vcombine.high %v2038_v32, %v2042_v51  ;;  %v6873_v45 = vcombine.low %v2038_v32, %v2042_v51  ;;  %v2130_v58 = vld [vmem:[#allocation12 + $0xab0] sm:$0xff] }
 0x430   :  { %5292 = vmatpush1.bf16.msra.mxu1 %v6801_v41  ;;  %v7002_v41 = vcombine.high %v2166_v61, %v2170_v33  ;;  %v2122_v32 = vld [vmem:[#allocation12 + $0xa70] sm:$0xff] }
 0x431   :  { %5335 = vmatpush1.bf16.msra.mxu0 %v6929_v43  ;;  %5293 = vmatprep.subr.bf16.mxu1 %v6794_v44  ;;  %v2030_v43 = vld [vmem:[#allocation12 + $0x790] sm:$0xff] }
 0x432   :  { %5336 = vmatprep.subr.bf16.mxu0 %v6922_v57  ;;  %v2034_v44 = vld [vmem:[#allocation12 + $0x7b0] sm:$0xff] }
 0x433   :  { %v2158_v57 = vld [vmem:[#allocation12 + $0xb90] sm:$0xff]  ;;  %v6866_v46 = vcombine.high %v2030_v43, %v2034_v44  ;;  %v6865_v50 = vcombine.low %v2030_v43, %v2034_v44 }
 0x434   :  { %5294 = vmatpush1.bf16.msra.mxu1 %v6793_v47  ;;  %v6994_v47 = vcombine.high %v2158_v57, %v2162_v25  ;;  %v6993_v56 = vcombine.low %v2158_v57, %v2162_v25  ;;  %v2114_v43 = vld [vmem:[#allocation12 + $0xa30] sm:$0xff] }
 0x435   :  { %5337 = vmatpush1.bf16.msra.mxu0 %v6921_v48  ;;  %5295 = vmatprep.subr.bf16.mxu1 %v6786_v35  ;;  %v2022_v48 = vld [vmem:[#allocation12 + $0x750] sm:$0xff] }
 0x436   :  { %5338 = vmatprep.subr.bf16.mxu0 %v6914_v42  ;;  %v2026_v35 = vld [vmem:[#allocation12 + $0x770] sm:$0xff] }
 0x437   :  { %v2150_v42 = vld [vmem:[#allocation12 + $0xb50] sm:$0xff]  ;;  %v6858_v59 = vcombine.high %v2022_v48, %v2026_v35  ;;  %v6857_v0 = vcombine.low %v2022_v48, %v2026_v35  ;;  %v1851_v48 = vld [vmem:[#allocation12 + $0x1f8] sm:$0xff] }
 0x438   :  { %5296 = vmatpush1.bf16.msra.mxu1 %v6785_v13  ;;  %v6986_v13 = vcombine.high %v2150_v42, %v2154_v9  ;;  %v6985_v49 = vcombine.low %v2150_v42, %v2154_v9 }
 0x439   :  { %5339 = vmatpush1.bf16.msra.mxu0 %v6913_v39  ;;  %5297 = vmatprep.subr.bf16.mxu1 %v6778_v28  ;;  %v2014_v39 = vld [vmem:[#allocation12 + $0x710] sm:$0xff] }
 0x43a   :  { %5340 = vmatprep.subr.bf16.mxu0 %v6906_v62  ;;  %v2018_v28 = vld [vmem:[#allocation12 + $0x730] sm:$0xff] }
 0x43b   :  { %v2142_v62 = vld [vmem:[#allocation12 + $0xb10] sm:$0xff]  ;;  %v6850_v1 = vcombine.high %v2014_v39, %v2018_v28  ;;  %v6849_v4 = vcombine.low %v2014_v39, %v2018_v28  ;;  %v1839_v39 = vld [vmem:[#allocation12 + $0x198] sm:$0xff] }
 0x43c   :  { %5298 = vmatpush1.bf16.msra.mxu1 %v6777_v26  ;;  %v6978_v26 = vcombine.high %v2142_v62, %v2146_v63  ;;  %v6977_v6 = vcombine.low %v2142_v62, %v2146_v63  ;;  %v1843_v28 = vld [vmem:[#allocation12 + $0x1b8] sm:$0xff] }
 0x43d   :  { %5341 = vmatpush1.bf16.msra.mxu0 %v6905_v3  ;;  %5299 = vmatprep.subr.bf16.mxu1 %v6770_v22  ;;  %v2006_v3 = vld [vmem:[#allocation12 + $0x6d0] sm:$0xff] }
 0x43e   :  { %5342 = vmatprep.subr.bf16.mxu0 %v6898_v29  ;;  %v2010_v22 = vld [vmem:[#allocation12 + $0x6f0] sm:$0xff] }
 0x43f   :  { %v2134_v29 = vld [vmem:[#allocation12 + $0xad0] sm:$0xff]  ;;  %v6842_v7 = vcombine.high %v2006_v3, %v2010_v22  ;;  %v6841_v17 = vcombine.low %v2006_v3, %v2010_v22  ;;  %v1835_v3 = vld [vmem:[#allocation12 + $0x178] sm:$0xff] }
 0x440   :  { %5300 = vmatpush1.bf16.msra.mxu1 %v6769_v11  ;;  %v6970_v11 = vcombine.high %v2134_v29, %v2138_v30  ;;  %v6969_v19 = vcombine.low %v2134_v29, %v2138_v30  ;;  %v6675_v29 = vcombine.low %v1839_v39, %v1843_v28 }
 0x441   :  { %5343 = vmatpush1.bf16.msra.mxu0 %v6897_v12  ;;  %5301 = vmatprep.subr.bf16.mxu1 %v6762_v16  ;;  %v1998_v12 = vld [vmem:[#allocation12 + $0x690] sm:$0xff] }
 0x442   :  { %5344 = vmatprep.subr.bf16.mxu0 %v6890_v2  ;;  %v2002_v16 = vld [vmem:[#allocation12 + $0x6b0] sm:$0xff] }
 0x443   :  { %v2126_v2 = vld [vmem:[#allocation12 + $0xa90] sm:$0xff]  ;;  %v6834_v21 = vcombine.high %v1998_v12, %v2002_v16  ;;  %v6833_v51 = vcombine.low %v1998_v12, %v2002_v16  ;;  %v1827_v12 = vld [vmem:[#allocation12 + $0x138] sm:$0xff] }
 0x444   :  { %5302 = vmatpush1.bf16.msra.mxu1 %v6761_v10  ;;  %v6962_v10 = vcombine.high %v2126_v2, %v2130_v58  ;;  %v6961_v61 = vcombine.low %v2126_v2, %v2130_v58 }
 0x445   :  { %5345 = vmatpush1.bf16.msra.mxu0 %v6889_v23  ;;  %5303 = vmatprep.subr.bf16.mxu1 %v6754_v24  ;;  %v1990_v23 = vld [vmem:[#allocation12 + $0x650] sm:$0xff] }
 0x446   :  { %5346 = vmatprep.subr.bf16.mxu0 %v6882_v31  ;;  %v1994_v24 = vld [vmem:[#allocation12 + $0x670] sm:$0xff] }
 0x447   :  { %v2118_v31 = vld [vmem:[#allocation12 + $0xa50] sm:$0xff]  ;;  %v6826_v33 = vcombine.high %v1990_v23, %v1994_v24  ;;  %v6825_v44 = vcombine.low %v1990_v23, %v1994_v24  ;;  %v1819_v23 = vld [vmem:[#allocation12 + $0xf8] sm:$0xff] }
 0x448   :  { %5304 = vmatpush1.bf16.msra.mxu1 %v6753_v37  ;;  %v6954_v37 = vcombine.high %v2118_v31, %v2122_v32  ;;  %v6953_v57 = vcombine.low %v2118_v31, %v2122_v32 }
 0x449   :  { %5347 = vmatpush1.bf16.msra.mxu0 %v6881_v38  ;;  %5305 = vmatprep.subr.bf16.mxu1 %v6874_v40  ;;  %v1982_v38 = vld [vmem:[#allocation12 + $0x610] sm:$0xff] }
 0x44a   :  { %5348 = vmatprep.subr.bf16.mxu0 %v7002_v41  ;;  %v1986_v40 = vld [vmem:[#allocation12 + $0x630] sm:$0xff] }
 0x44b   :  { %v2110_v41 = vld [vmem:[#allocation12 + $0xa10] sm:$0xff]  ;;  %v6818_v25 = vcombine.high %v1982_v38, %v1986_v40  ;;  %v6817_v35 = vcombine.low %v1982_v38, %v1986_v40 }
 0x44c   :  { %5306 = vmatpush2.bf16.msra.mxu1 %v6873_v45  ;;  %v6946_v45 = vcombine.high %v2110_v41, %v2114_v43  ;;  %v6945_v42 = vcombine.low %v2110_v41, %v2114_v43 }
 0x44d   :  { %5349 = vmatpush2.bf16.msra.mxu0 %v7001_v5  ;;  %5307 = vmatprep.subr.bf16.mxu1 %v6866_v46  ;;  %v2230_v5 = vld [vmem:[#allocation12 + $0xdd0] sm:$0xff] }
 0x44e   :  { %5350 = vmatprep.subr.bf16.mxu0 %v6994_v47  ;;  %v2234_v46 = vld [vmem:[#allocation12 + $0xdf0] sm:$0xff]  ;;  %v1847_v47 = vld [vmem:[#allocation12 + $0x1d8] sm:$0xff] }
 0x44f   :  { %v7066_v9 = vcombine.high %v2230_v5, %v2234_v46  ;;  %v6683_v62 = vcombine.low %v1847_v47, %v1851_v48 }
 0x450   :  { %5308 = vmatpush2.bf16.msra.mxu1 %v6865_v50  ;;  %v6684_v50 = vcombine.high %v1847_v47, %v1851_v48 }
 0x451   :  { %5351 = vmatpush2.bf16.msra.mxu0 %v6993_v56  ;;  %5309 = vmatprep.subr.bf16.mxu1 %v6858_v59  ;;  %v2222_v56 = vld [vmem:[#allocation12 + $0xd90] sm:$0xff] }
 0x452   :  { %5352 = vmatprep.subr.bf16.mxu0 %v6986_v13  ;;  %v2226_v59 = vld [vmem:[#allocation12 + $0xdb0] sm:$0xff]  ;;  %v7065_v13 = vcombine.low %v2230_v5, %v2234_v46 }
 0x453   :  { %v7058_v63 = vcombine.high %v2222_v56, %v2226_v59  ;;  %v7057_v22 = vcombine.low %v2222_v56, %v2226_v59 }
 0x454   :  { %5310 = vmatpush2.bf16.msra.mxu1 %v6857_v0  ;;  %v2214_v0 = vld [vmem:[#allocation12 + $0xd50] sm:$0xff] }
 0x455   :  { %5353 = vmatpush2.bf16.msra.mxu0 %v6985_v49  ;;  %5311 = vmatprep.subr.bf16.mxu1 %v6850_v1  ;;  %v2218_v49 = vld [vmem:[#allocation12 + $0xd70] sm:$0xff]  ;;  %v6676_v1 = vcombine.high %v1839_v39, %v1843_v28 }
 0x456   :  { %5354 = vmatprep.subr.bf16.mxu0 %v6978_v26  ;;  %v1831_v26 = vld [vmem:[#allocation12 + $0x158] sm:$0xff]  ;;  %v7050_v30 = vcombine.high %v2214_v0, %v2218_v49  ;;  %v7049_v16 = vcombine.low %v2214_v0, %v2218_v49  ;;  %v2294_v28 = vld [vmem:[#allocation12 + $0xfd0] sm:$0xff] }
 0x457   :  { %v6667_v2 = vcombine.low %v1831_v26, %v1835_v3  ;;  %v1915_v0 = vld [vmem:[#allocation12 + $0x3f8] sm:$0xff] }
 0x458   :  { %5312 = vmatpush2.bf16.msra.mxu1 %v6849_v4  ;;  %v6668_v4 = vcombine.high %v1831_v26, %v1835_v3 }
 0x459   :  { %5355 = vmatpush2.bf16.msra.mxu0 %v6977_v6  ;;  %5313 = vmatprep.subr.bf16.mxu1 %v6842_v7  ;;  %v2206_v6 = vld [vmem:[#allocation12 + $0xd10] sm:$0xff] }
 0x45a   :  { %5356 = vmatprep.subr.bf16.mxu0 %v6970_v11  ;;  %v2210_v7 = vld [vmem:[#allocation12 + $0xd30] sm:$0xff]  ;;  %v1823_v11 = vld [vmem:[#allocation12 + $0x118] sm:$0xff] }
 0x45b   :  { %v7042_v58 = vcombine.high %v2206_v6, %v2210_v7  ;;  %v6659_v24 = vcombine.low %v1823_v11, %v1827_v12 }
 0x45c   :  { %5314 = vmatpush2.bf16.msra.mxu1 %v6841_v17  ;;  %v6660_v17 = vcombine.high %v1823_v11, %v1827_v12 }
 0x45d   :  { %5357 = vmatpush2.bf16.msra.mxu0 %v6969_v19  ;;  %5315 = vmatprep.subr.bf16.mxu1 %v6834_v21  ;;  %v2198_v19 = vld [vmem:[#allocation12 + $0xcd0] sm:$0xff] }
 0x45e   :  { %5358 = vmatprep.subr.bf16.mxu0 %v6962_v10  ;;  %v2202_v21 = vld [vmem:[#allocation12 + $0xcf0] sm:$0xff]  ;;  %v1815_v10 = vld [vmem:[#allocation12 + $0xd8] sm:$0xff] }
 0x45f   :  { %v7034_v31 = vcombine.high %v2198_v19, %v2202_v21  ;;  %v6652_v32 = vcombine.high %v1815_v10, %v1819_v23  ;;  %v7033_v38 = vcombine.low %v2198_v19, %v2202_v21  ;;  %v6651_v40 = vcombine.low %v1815_v10, %v1819_v23 }
 0x460   :  { %5316 = vmatpush2.bf16.msra.mxu1 %v6833_v51  ;;  %v2190_v51 = vld [vmem:[#allocation12 + $0xc90] sm:$0xff] }
 0x461   :  { %5359 = vmatpush2.bf16.msra.mxu0 %v6961_v61  ;;  %5317 = vmatprep.subr.bf16.mxu1 %v6826_v33  ;;  %v2194_v61 = vld [vmem:[#allocation12 + $0xcb0] sm:$0xff]  ;;  %v1807_v33 = vld [vmem:[#allocation12 + $0x98] sm:$0xff] }
 0x462   :  { %5360 = vmatprep.subr.bf16.mxu0 %v6954_v37  ;;  %v1811_v37 = vld [vmem:[#allocation12 + $0xb8] sm:$0xff]  ;;  %v7026_v41 = vcombine.high %v2190_v51, %v2194_v61  ;;  %v7025_v5 = vcombine.low %v2190_v51, %v2194_v61 }
 0x463   :  { %v6644_v43 = vcombine.high %v1807_v33, %v1811_v37  ;;  %v6643_v46 = vcombine.low %v1807_v33, %v1811_v37 }
 0x464   :  { %5318 = vmatpush2.bf16.msra.mxu1 %v6825_v44  ;;  %v2182_v44 = vld [vmem:[#allocation12 + $0xc50] sm:$0xff] }
 0x465   :  { %5361 = vmatpush2.bf16.msra.mxu0 %v6953_v57  ;;  %5319 = vmatprep.subr.bf16.mxu1 %v6818_v25  ;;  %v2186_v57 = vld [vmem:[#allocation12 + $0xc70] sm:$0xff]  ;;  %v1799_v25 = vld [vmem:[#allocation12 + $0x58] sm:$0xff] }
 0x466   :  { %5362 = vmatprep.subr.bf16.mxu0 %v6946_v45  ;;  %v1803_v45 = vld [vmem:[#allocation12 + $0x78] sm:$0xff]  ;;  %v7018_v47 = vcombine.high %v2182_v44, %v2186_v57  ;;  %v7017_v56 = vcombine.low %v2182_v44, %v2186_v57 }
 0x467   :  { %v6636_v48 = vcombine.high %v1799_v25, %v1803_v45  ;;  %v6635_v59 = vcombine.low %v1799_v25, %v1803_v45 }
 0x468   :  { %5320 = vmatpush2.bf16.msra.mxu1 %v6817_v35  ;;  %v2174_v35 = vld [vmem:[#allocation12 + $0xc10] sm:$0xff] }
 0x469   :  { %5363 = vmatpush2.bf16.msra.mxu0 %v6945_v42  ;;  %5375 = vmatprep.subr.bf16.mxu1 %v7066_v9  ;;  %v2178_v42 = vld [vmem:[#allocation12 + $0xc30] sm:$0xff]  ;;  %v1791_v9 = vld [vmem:[#allocation12 + $0x18] sm:$0xff] }
 0x46a   :  { %5418 = vmatprep.subr.bf16.mxu0 %v6684_v50  ;;  %v1795_v50 = vld [vmem:[#allocation12 + $0x38] sm:$0xff]  ;;  %v7009_v49 = vcombine.low %v2174_v35, %v2178_v42 }
 0x46b   :  { %5322 = vmatmul.mubr.bf16.vlgmr.msra.gmra.mxu1 %v8277_v36  ;;  %v6628_v39 = vcombine.high %v1791_v9, %v1795_v50 }
 0x46c   :  { %5365 = vmatmul.mubr.bf16.vlgmr.msra.gmra.mxu0 %v8275_v34  ;;  %5376 = vmatpush1.bf16.msra.mxu1 %v7065_v13  ;;  %v7010_v13 = vcombine.high %v2174_v35, %v2178_v42 }
 0x46d   :  { %5407 = vmatprep.mubr.bf16.mxu1 %v8286_v60  ;;  %5419 = vmatpush1.bf16.msra.mxu0 %v6683_v62  ;;  %v2298_v62 = vld [vmem:[#allocation12 + $0xff0] sm:$0xff] }
 0x46e   :  { %5450 = vmatprep.mubr.bf16.mxu0 %v8229_v14  ;;  %5377 = vmatprep.subr.bf16.mxu1 %v7058_v63  ;;  %v7041_v14 = vcombine.low %v2206_v6, %v2210_v7  ;;  %v1911_v63 = vld [vmem:[#allocation12 + $0x3d8] sm:$0xff]  ;;  %v7130_v26 = vcombine.high %v2294_v28, %v2298_v62  ;;  %v7129_v6 = vcombine.low %v2294_v28, %v2298_v62 }
 0x46f   :  { %5420 = vmatprep.subr.bf16.mxu0 %v6676_v1  ;;  %v6627_v1 = vcombine.low %v1791_v9, %v1795_v50  ;;  %v6748_v3 = vcombine.high %v1911_v63, %v1915_v0  ;;  %v6747_v7 = vcombine.low %v1911_v63, %v1915_v0 }
 0x470   :  { %5378 = vmatpush1.bf16.msra.mxu1 %v7057_v22  ;;  %v2286_v22 = vld [vmem:[#allocation12 + $0xf90] sm:$0xff] }
 0x471   :  { %5421 = vmatpush1.bf16.msra.mxu0 %v6675_v29  ;;  %5379 = vmatprep.subr.bf16.mxu1 %v7050_v30  ;;  %v2290_v29 = vld [vmem:[#allocation12 + $0xfb0] sm:$0xff]  ;;  %v1903_v30 = vld [vmem:[#allocation12 + $0x398] sm:$0xff] }
 0x472   :  { %5422 = vmatprep.subr.bf16.mxu0 %v6668_v4  ;;  %v1907_v4 = vld [vmem:[#allocation12 + $0x3b8] sm:$0xff]  ;;  %v7122_v11 = vcombine.high %v2286_v22, %v2290_v29  ;;  %v7121_v19 = vcombine.low %v2286_v22, %v2290_v29 }
 0x473   :  { %v6740_v12 = vcombine.high %v1903_v30, %v1907_v4  ;;  %v6739_v21 = vcombine.low %v1903_v30, %v1907_v4 }
 0x474   :  { %5380 = vmatpush1.bf16.msra.mxu1 %v7049_v16  ;;  %v2278_v16 = vld [vmem:[#allocation12 + $0xf50] sm:$0xff] }
 0x475   :  { %5423 = vmatpush1.bf16.msra.mxu0 %v6667_v2  ;;  %5381 = vmatprep.subr.bf16.mxu1 %v7042_v58  ;;  %v2282_v2 = vld [vmem:[#allocation12 + $0xf70] sm:$0xff]  ;;  %v1895_v58 = vld [vmem:[#allocation12 + $0x358] sm:$0xff] }
 0x476   :  { %5424 = vmatprep.subr.bf16.mxu0 %v6660_v17  ;;  %v1899_v17 = vld [vmem:[#allocation12 + $0x378] sm:$0xff]  ;;  %v7114_v10 = vcombine.high %v2278_v16, %v2282_v2  ;;  %v7113_v51 = vcombine.low %v2278_v16, %v2282_v2 }
 0x477   :  { %v6732_v23 = vcombine.high %v1895_v58, %v1899_v17  ;;  %v6731_v61 = vcombine.low %v1895_v58, %v1899_v17 }
 0x478   :  { %5382 = vmatpush1.bf16.msra.mxu1 %v7041_v14  ;;  %v2270_v14 = vld [vmem:[#allocation12 + $0xf10] sm:$0xff] }
 0x479   :  { %5425 = vmatpush1.bf16.msra.mxu0 %v6659_v24  ;;  %5383 = vmatprep.subr.bf16.mxu1 %v7034_v31  ;;  %v2274_v24 = vld [vmem:[#allocation12 + $0xf30] sm:$0xff]  ;;  %v1887_v31 = vld [vmem:[#allocation12 + $0x318] sm:$0xff] }
 0x47a   :  { %5426 = vmatprep.subr.bf16.mxu0 %v6652_v32  ;;  %v1891_v32 = vld [vmem:[#allocation12 + $0x338] sm:$0xff]  ;;  %v7106_v33 = vcombine.high %v2270_v14, %v2274_v24  ;;  %v7105_v44 = vcombine.low %v2270_v14, %v2274_v24 }
 0x47b   :  { %v6724_v37 = vcombine.high %v1887_v31, %v1891_v32  ;;  %v6723_v57 = vcombine.low %v1887_v31, %v1891_v32  ;;  %v2099_v14 = vld [vmem:[#allocation12 + $0x9b8] sm:$0xff] }
 0x47c   :  { %5384 = vmatpush1.bf16.msra.mxu1 %v7033_v38  ;;  %v2262_v38 = vld [vmem:[#allocation12 + $0xed0] sm:$0xff]  ;;  %v1959_v32 = vld [vmem:[#allocation12 + $0x558] sm:$0xff] }
 0x47d   :  { %5427 = vmatpush1.bf16.msra.mxu0 %v6651_v40  ;;  %5385 = vmatprep.subr.bf16.mxu1 %v7026_v41  ;;  %v2266_v40 = vld [vmem:[#allocation12 + $0xef0] sm:$0xff]  ;;  %v1879_v41 = vld [vmem:[#allocation12 + $0x2d8] sm:$0xff] }
 0x47e   :  { %5428 = vmatprep.subr.bf16.mxu0 %v6644_v43  ;;  %v1883_v43 = vld [vmem:[#allocation12 + $0x2f8] sm:$0xff]  ;;  %v7098_v25 = vcombine.high %v2262_v38, %v2266_v40  ;;  %v7097_v35 = vcombine.low %v2262_v38, %v2266_v40 }
 0x47f   :  { %v6716_v45 = vcombine.high %v1879_v41, %v1883_v43  ;;  %v6715_v42 = vcombine.low %v1879_v41, %v1883_v43 }
 0x480   :  { %5386 = vmatpush1.bf16.msra.mxu1 %v7025_v5  ;;  %v2254_v5 = vld [vmem:[#allocation12 + $0xe90] sm:$0xff] }
 0x481   :  { %5429 = vmatpush1.bf16.msra.mxu0 %v6643_v46  ;;  %5387 = vmatprep.subr.bf16.mxu1 %v7018_v47  ;;  %v2258_v46 = vld [vmem:[#allocation12 + $0xeb0] sm:$0xff]  ;;  %v1871_v47 = vld [vmem:[#allocation12 + $0x298] sm:$0xff] }
 0x482   :  { %5430 = vmatprep.subr.bf16.mxu0 %v6636_v48  ;;  %v1875_v48 = vld [vmem:[#allocation12 + $0x2b8] sm:$0xff]  ;;  %v7090_v9 = vcombine.high %v2254_v5, %v2258_v46  ;;  %v7089_v28 = vcombine.low %v2254_v5, %v2258_v46 }
 0x483   :  { %v6708_v50 = vcombine.high %v1871_v47, %v1875_v48  ;;  %v6707_v62 = vcombine.low %v1871_v47, %v1875_v48  ;;  %v1943_v47 = vld [vmem:[#allocation12 + $0x4d8] sm:$0xff] }
 0x484   :  { %5388 = vmatpush1.bf16.msra.mxu1 %v7017_v56  ;;  %v2246_v56 = vld [vmem:[#allocation12 + $0xe50] sm:$0xff]  ;;  %v1947_v48 = vld [vmem:[#allocation12 + $0x4f8] sm:$0xff] }
 0x485   :  { %5431 = vmatpush1.bf16.msra.mxu0 %v6635_v59  ;;  %5389 = vmatprep.subr.bf16.mxu1 %v7010_v13  ;;  %v2250_v59 = vld [vmem:[#allocation12 + $0xe70] sm:$0xff]  ;;  %v1863_v13 = vld [vmem:[#allocation12 + $0x258] sm:$0xff] }
 0x486   :  { %5432 = vmatprep.subr.bf16.mxu0 %v6628_v39  ;;  %v1867_v39 = vld [vmem:[#allocation12 + $0x278] sm:$0xff]  ;;  %v7082_v63 = vcombine.high %v2246_v56, %v2250_v59  ;;  %v7081_v22 = vcombine.low %v2246_v56, %v2250_v59 }
 0x487   :  { %v6700_v0 = vcombine.high %v1863_v13, %v1867_v39  ;;  %v6699_v29 = vcombine.low %v1863_v13, %v1867_v39  ;;  %v1935_v59 = vld [vmem:[#allocation12 + $0x498] sm:$0xff] }
 0x488   :  { %5390 = vmatpush1.bf16.msra.mxu1 %v7009_v49  ;;  %v2238_v49 = vld [vmem:[#allocation12 + $0xe10] sm:$0xff]  ;;  %v1939_v13 = vld [vmem:[#allocation12 + $0x4b8] sm:$0xff] }
 0x489   :  { %5433 = vmatpush1.bf16.msra.mxu0 %v6627_v1  ;;  %5391 = vmatprep.subr.bf16.mxu1 %v7130_v26  ;;  %v2242_v1 = vld [vmem:[#allocation12 + $0xe30] sm:$0xff]  ;;  %v1855_v26 = vld [vmem:[#allocation12 + $0x218] sm:$0xff] }
 0x48a   :  { %5434 = vmatprep.subr.bf16.mxu0 %v6748_v3  ;;  %v1859_v3 = vld [vmem:[#allocation12 + $0x238] sm:$0xff]  ;;  %v7074_v30 = vcombine.high %v2238_v49, %v2242_v1  ;;  %v7073_v16 = vcombine.low %v2238_v49, %v2242_v1 }
 0x48b   :  { %v6692_v4 = vcombine.high %v1855_v26, %v1859_v3  ;;  %v6691_v2 = vcombine.low %v1855_v26, %v1859_v3  ;;  %v2063_v39 = vld [vmem:[#allocation12 + $0x898] sm:$0xff] }
 0x48c   :  { %5392 = vmatpush2.bf16.msra.mxu1 %v7129_v6  ;;  %v1975_v6 = vld [vmem:[#allocation12 + $0x5d8] sm:$0xff] }
 0x48d   :  { %5435 = vmatpush2.bf16.msra.mxu0 %v6747_v7  ;;  %5393 = vmatprep.subr.bf16.mxu1 %v7122_v11  ;;  %v1979_v7 = vld [vmem:[#allocation12 + $0x5f8] sm:$0xff] }
 0x48e   :  { %5436 = vmatprep.subr.bf16.mxu0 %v6740_v12  ;;  %v2103_v11 = vld [vmem:[#allocation12 + $0x9d8] sm:$0xff]  ;;  %v6812_v58 = vcombine.high %v1975_v6, %v1979_v7 }
 0x48f   :  { %v2107_v12 = vld [vmem:[#allocation12 + $0x9f8] sm:$0xff] }
 0x490   :  { %5394 = vmatpush2.bf16.msra.mxu1 %v7121_v19  ;;  %v6940_v17 = vcombine.high %v2103_v11, %v2107_v12  ;;  %v1967_v19 = vld [vmem:[#allocation12 + $0x598] sm:$0xff]  ;;  %v6939_v24 = vcombine.low %v2103_v11, %v2107_v12 }
 0x491   :  { %5437 = vmatpush2.bf16.msra.mxu0 %v6739_v21  ;;  %5395 = vmatprep.subr.bf16.mxu1 %v7114_v10  ;;  %v1971_v21 = vld [vmem:[#allocation12 + $0x5b8] sm:$0xff]  ;;  %v6811_v10 = vcombine.low %v1975_v6, %v1979_v7 }
 0x492   :  { %5438 = vmatprep.subr.bf16.mxu0 %v6732_v23  ;;  %v2095_v23 = vld [vmem:[#allocation12 + $0x998] sm:$0xff]  ;;  %v6804_v31 = vcombine.high %v1967_v19, %v1971_v21  ;;  %v6803_v38 = vcombine.low %v1967_v19, %v1971_v21 }
 0x493   :  { %v6931_v40 = vcombine.low %v2095_v23, %v2099_v14  ;;  %v1927_v1 = vld [vmem:[#allocation12 + $0x458] sm:$0xff] }
 0x494   :  { %5396 = vmatpush2.bf16.msra.mxu1 %v7113_v51  ;;  %v1963_v51 = vld [vmem:[#allocation12 + $0x578] sm:$0xff] }
 0x495   :  { %5439 = vmatpush2.bf16.msra.mxu0 %v6731_v61  ;;  %5397 = vmatprep.subr.bf16.mxu1 %v7106_v33  ;;  %v6932_v61 = vcombine.high %v2095_v23, %v2099_v14  ;;  %v2087_v33 = vld [vmem:[#allocation12 + $0x958] sm:$0xff]  ;;  %v6796_v41 = vcombine.high %v1959_v32, %v1963_v51  ;;  %v6795_v5 = vcombine.low %v1959_v32, %v1963_v51  ;;  %v8317_v23 = vpop.f32.mrf.mxu0  ;;  %v8319_v14 = vpop.f32.mrf.mxu1 }
 0x496   :  { %5440 = vmatprep.subr.bf16.mxu0 %v6724_v37  ;;  %v2091_v37 = vld [vmem:[#allocation12 + $0x978] sm:$0xff] }
 0x497   :  { %v6924_v43 = vcombine.high %v2087_v33, %v2091_v37  ;;  %v1931_v26 = vld [vmem:[#allocation12 + $0x478] sm:$0xff] }
 0x498   :  { %5398 = vmatpush2.bf16.msra.mxu1 %v7105_v44  ;;  %v1951_v44 = vld [vmem:[#allocation12 + $0x518] sm:$0xff] }
 0x499   :  { %5441 = vmatpush2.bf16.msra.mxu0 %v6723_v57  ;;  %5399 = vmatprep.subr.bf16.mxu1 %v7098_v25  ;;  %v1955_v57 = vld [vmem:[#allocation12 + $0x538] sm:$0xff] }
 0x49a   :  { %5442 = vmatprep.subr.bf16.mxu0 %v6716_v45  ;;  %v2079_v25 = vld [vmem:[#allocation12 + $0x918] sm:$0xff]  ;;  %v6788_v46 = vcombine.high %v1951_v44, %v1955_v57 }
 0x49b   :  { %v2083_v45 = vld [vmem:[#allocation12 + $0x938] sm:$0xff] }
 0x49c   :  { %5400 = vmatpush2.bf16.msra.mxu1 %v7097_v35  ;;  %v2071_v35 = vld [vmem:[#allocation12 + $0x8d8] sm:$0xff] }
 0x49d   :  { %5443 = vmatpush2.bf16.msra.mxu0 %v6715_v42  ;;  %5401 = vmatprep.subr.bf16.mxu1 %v7090_v9  ;;  %v2075_v42 = vld [vmem:[#allocation12 + $0x8f8] sm:$0xff]  ;;  %v6915_v9 = vcombine.low %v2079_v25, %v2083_v45 }
 0x49e   :  { %5444 = vmatprep.subr.bf16.mxu0 %v6708_v50  ;;  %v6780_v50 = vcombine.high %v1943_v47, %v1947_v48  ;;  %v6908_v56 = vcombine.high %v2071_v35, %v2075_v42  ;;  %v2055_v3 = vld [vmem:[#allocation12 + $0x858] sm:$0xff] }
 0x49f   :  { %v1919_v7 = vld [vmem:[#allocation12 + $0x418] sm:$0xff] }
 0x4a0   :  { %5402 = vmatpush2.bf16.msra.mxu1 %v7089_v28  ;;  %v2067_v28 = vld [vmem:[#allocation12 + $0x8b8] sm:$0xff] }
 0x4a1   :  { %5445 = vmatpush2.bf16.msra.mxu0 %v6707_v62  ;;  %5403 = vmatprep.subr.bf16.mxu1 %v7082_v63  ;;  %v6779_v62 = vcombine.low %v1943_v47, %v1947_v48  ;;  %v6907_v63 = vcombine.low %v2071_v35, %v2075_v42  ;;  %v6900_v49 = vcombine.high %v2063_v39, %v2067_v28  ;;  %v1923_v11 = vld [vmem:[#allocation12 + $0x438] sm:$0xff] }
 0x4a2   :  { %5446 = vmatprep.subr.bf16.mxu0 %v6700_v0  ;;  %v6772_v0 = vcombine.high %v1935_v59, %v1939_v13  ;;  %v2047_v12 = vld [vmem:[#allocation12 + $0x818] sm:$0xff]  ;;  %v6755_v32 = vcombine.low %v1919_v7, %v1923_v11 }
 0x4a3   :  { %v2039_v21 = vld [vmem:[#allocation12 + $0x7d8] sm:$0xff] }
 0x4a4   :  { %5404 = vmatpush2.bf16.msra.mxu1 %v7081_v22  ;;  %v2059_v22 = vld [vmem:[#allocation12 + $0x878] sm:$0xff] }
 0x4a5   :  { %5447 = vmatpush2.bf16.msra.mxu0 %v6699_v29  ;;  %5405 = vmatprep.subr.bf16.mxu1 %v7074_v30  ;;  %v6771_v29 = vcombine.low %v1935_v59, %v1939_v13  ;;  %v6899_v30 = vcombine.low %v2063_v39, %v2067_v28  ;;  %v6892_v6 = vcombine.high %v2055_v3, %v2059_v22  ;;  %v2151_v48 = vld [vmem:[#allocation12 + $0xb58] sm:$0xff] }
 0x4a6   :  { %5448 = vmatprep.subr.bf16.mxu0 %v6692_v4  ;;  %v6764_v4 = vcombine.high %v1927_v1, %v1931_v26  ;;  %v2155_v35 = vld [vmem:[#allocation12 + $0xb78] sm:$0xff] }
 0x4a7   :  { %v2019_v59 = vld [vmem:[#allocation12 + $0x738] sm:$0xff] }
 0x4a8   :  { %5406 = vmatpush2.bf16.msra.mxu1 %v7073_v16  ;;  %v2051_v16 = vld [vmem:[#allocation12 + $0x838] sm:$0xff] }
 0x4a9   :  { %5449 = vmatpush2.bf16.msra.mxu0 %v6691_v2  ;;  %5461 = vmatprep.subr.bf16.mxu1 %v6812_v58  ;;  %v6763_v2 = vcombine.low %v1927_v1, %v1931_v26  ;;  %v6891_v58 = vcombine.low %v2055_v3, %v2059_v22  ;;  %v6884_v19 = vcombine.high %v2047_v12, %v2051_v16  ;;  %v2143_v28 = vld [vmem:[#allocation12 + $0xb18] sm:$0xff] }
 0x4aa   :  { %5504 = vmatprep.subr.bf16.mxu0 %v6940_v17  ;;  %v6756_v17 = vcombine.high %v1919_v7, %v1923_v11  ;;  %v6883_v51 = vcombine.low %v2047_v12, %v2051_v16  ;;  %v6987_v1 = vcombine.low %v2151_v48, %v2155_v35  ;;  %v2007_v22 = vld [vmem:[#allocation12 + $0x6d8] sm:$0xff]  ;;  %v8333_v7 = vld [vmem:[#allocation13] sm:$0xff] }
 0x4ab   :  { %5408 = vmatmul.mubr.bf16.vlgmr.msra.gmra.mxu1 %v8295_v8 }
 0x4ac   :  { %5451 = vmatmul.mubr.bf16.vlgmr.msra.gmra.mxu0 %v8231_v15  ;;  %5462 = vmatpush1.bf16.msra.mxu1 %v6811_v10  ;;  %v6923_v15 = vcombine.low %v2087_v33, %v2091_v37  ;;  %v2043_v10 = vld [vmem:[#allocation12 + $0x7f8] sm:$0xff] }
 0x4ad   :  { %5493 = vmatprep.mubr.bf16.mxu1 %v8273_v52  ;;  %5505 = vmatpush1.bf16.msra.mxu0 %v6939_v24  ;;  %v6916_v52 = vcombine.high %v2079_v25, %v2083_v45  ;;  %v2167_v24 = vld [vmem:[#allocation12 + $0xbd8] sm:$0xff] }
 0x4ae   :  { %5536 = vmatprep.mubr.bf16.mxu0 %v8238_v27  ;;  %5463 = vmatprep.subr.bf16.mxu1 %v6804_v31  ;;  %v6787_v27 = vcombine.low %v1951_v44, %v1955_v57  ;;  %v2171_v31 = vld [vmem:[#allocation12 + $0xbf8] sm:$0xff]  ;;  %v6875_v57 = vcombine.low %v2039_v21, %v2043_v10 }
 0x4af   :  { %5506 = vmatprep.subr.bf16.mxu0 %v6932_v61  ;;  %v6876_v61 = vcombine.high %v2039_v21, %v2043_v10  ;;  %v7004_v33 = vcombine.high %v2167_v24, %v2171_v31  ;;  %v2031_v37 = vld [vmem:[#allocation12 + $0x798] sm:$0xff]  ;;  %v7003_v25 = vcombine.low %v2167_v24, %v2171_v31 }
 0x4b0   :  { %5464 = vmatpush1.bf16.msra.mxu1 %v6803_v38  ;;  %v2035_v38 = vld [vmem:[#allocation12 + $0x7b8] sm:$0xff] }
 0x4b1   :  { %5507 = vmatpush1.bf16.msra.mxu0 %v6931_v40  ;;  %5465 = vmatprep.subr.bf16.mxu1 %v6796_v41  ;;  %v8321_v40 = vpop.f32.mrf.mxu0  ;;  %v8323_v41 = vpop.f32.mrf.mxu1  ;;  %v2163_v44 = vld [vmem:[#allocation12 + $0xbb8] sm:$0xff]  ;;  %v6868_v45 = vcombine.high %v2031_v37, %v2035_v38  ;;  %v6867_v42 = vcombine.low %v2031_v37, %v2035_v38 }
 0x4b2   :  { %5508 = vmatprep.subr.bf16.mxu0 %v6924_v43  ;;  %v2159_v43 = vld [vmem:[#allocation12 + $0xb98] sm:$0xff] }
 0x4b3   :  { %v8327_v47 = vpop.f32.mrf.mxu1  ;;  %v2003_v21 = vld [vmem:[#allocation12 + $0x6b8] sm:$0xff] }
 0x4b4   :  { %5466 = vmatpush1.bf16.msra.mxu1 %v6795_v5  ;;  %v6996_v5 = vcombine.high %v2159_v43, %v2163_v44  ;;  %v2127_v10 = vld [vmem:[#allocation12 + $0xa98] sm:$0xff] }
 0x4b5   :  { %5509 = vmatpush1.bf16.msra.mxu0 %v6923_v15  ;;  %5467 = vmatprep.subr.bf16.mxu1 %v6788_v46  ;;  %v2023_v15 = vld [vmem:[#allocation12 + $0x758] sm:$0xff]  ;;  %v4985_v39 = vpop.f32.mrf.mxu1 }
 0x4b6   :  { %5510 = vmatprep.subr.bf16.mxu0 %v6916_v52  ;;  %v2027_v46 = vld [vmem:[#allocation12 + $0x778] sm:$0xff]  ;;  %v8325_v52 = vpop.f32.mrf.mxu0 }
 0x4b7   :  { %v2131_v24 = vld [vmem:[#allocation12 + $0xab8] sm:$0xff] }
 0x4b8   :  { %5468 = vmatpush1.bf16.msra.mxu1 %v6787_v27  ;;  %v6995_v27 = vcombine.low %v2159_v43, %v2163_v44  ;;  %v4942_v13 = vpop.f32.mrf.mxu0  ;;  %v6964_v43 = vcombine.high %v2127_v10, %v2131_v24  ;;  %v1991_v44 = vld [vmem:[#allocation12 + $0x658] sm:$0xff] }
 0x4b9   :  { %5511 = vmatpush1.bf16.msra.mxu0 %v6915_v9  ;;  %5469 = vmatprep.subr.bf16.mxu1 %v6780_v50  ;;  %v6860_v9 = vcombine.high %v2023_v15, %v2027_v46  ;;  %v6988_v50 = vcombine.high %v2151_v48, %v2155_v35  ;;  %v6963_v35 = vcombine.low %v2127_v10, %v2131_v24 }
 0x4ba   :  { %5512 = vmatprep.subr.bf16.mxu0 %v6908_v56  ;;  %v2015_v56 = vld [vmem:[#allocation12 + $0x718] sm:$0xff] }
 0x4bb   :  { %v6852_v26 = vcombine.high %v2015_v56, %v2019_v59 }
 0x4bc   :  { %5470 = vmatpush1.bf16.msra.mxu1 %v6779_v62  ;;  %v2147_v62 = vld [vmem:[#allocation12 + $0xb38] sm:$0xff] }
 0x4bd   :  { %5513 = vmatpush1.bf16.msra.mxu0 %v6907_v63  ;;  %5471 = vmatprep.subr.bf16.mxu1 %v6772_v0  ;;  %v6859_v63 = vcombine.low %v2023_v15, %v2027_v46  ;;  %v8329_v0 = vpop.f32.mrf.mxu0  ;;  %v6980_v3 = vcombine.high %v2143_v28, %v2147_v62  ;;  %v6979_v16 = vcombine.low %v2143_v28, %v2147_v62 }
 0x4be   :  { %5514 = vmatprep.subr.bf16.mxu0 %v6900_v49  ;;  %v8331_v49 = vpop.f32.mrf.mxu1 }
 0x4bf   :  { %v5024_v11 = vpop.f32.mrf.mxu0 }
 0x4c0   :  { %5472 = vmatpush1.bf16.msra.mxu1 %v6771_v29  ;;  %v2011_v29 = vld [vmem:[#allocation12 + $0x6f8] sm:$0xff]  ;;  %v5067_v12 = vpop.f32.mrf.mxu1 }
 0x4c1   :  { %5515 = vmatpush1.bf16.msra.mxu0 %v6899_v30  ;;  %5473 = vmatprep.subr.bf16.mxu1 %v6764_v4  ;;  %v2135_v30 = vld [vmem:[#allocation12 + $0xad8] sm:$0xff] }
 0x4c2   :  { %5516 = vmatprep.subr.bf16.mxu0 %v6892_v6  ;;  %v2139_v4 = vld [vmem:[#allocation12 + $0xaf8] sm:$0xff]  ;;  %v6851_v6 = vcombine.low %v2015_v56, %v2019_v59 }
 0x4c3   :  { %v2111_v56 = vld [vmem:[#allocation12 + $0xa18] sm:$0xff] }
 0x4c4   :  { %5474 = vmatpush1.bf16.msra.mxu1 %v6763_v2  ;;  %v6844_v2 = vcombine.high %v2007_v22, %v2011_v29  ;;  %v2115_v59 = vld [vmem:[#allocation12 + $0xa38] sm:$0xff] }
 0x4c5   :  { %5517 = vmatpush1.bf16.msra.mxu0 %v6891_v58  ;;  %5475 = vmatprep.subr.bf16.mxu1 %v6756_v17  ;;  %v2309_v58 = vrot.slane %v8333_v7, %v8144_v54  ;;  %v6972_v17 = vcombine.high %v2135_v30, %v2139_v4 }
 0x4c6   :  { %5518 = vmatprep.subr.bf16.mxu0 %v6884_v19  ;;  %v1999_v19 = vld [vmem:[#allocation12 + $0x698] sm:$0xff] }
 0x4c7   :  { %v4943_v31 = vadd.f32 %v4942_v13, %v2309_v58  ;;  %v6836_v37 = vcombine.high %v1999_v19, %v2003_v21  ;;  %v4939_v38 = vadd.f32 %v8321_v40, %v2309_v58  ;;  %v6835_v15 = vcombine.low %v1999_v19, %v2003_v21  ;;  %v2227_v19 = vld [vmem:[#allocation12 + $0xdb8] sm:$0xff] }
 0x4c8   :  { %5476 = vmatpush1.bf16.msra.mxu1 %v6755_v32  ;;  %v6843_v32 = vcombine.low %v2007_v22, %v2011_v29  ;;  %v2231_v22 = vld [vmem:[#allocation12 + $0xdd8] sm:$0xff] }
 0x4c9   :  { %5519 = vmatpush1.bf16.msra.mxu0 %v6883_v51  ;;  %5477 = vmatprep.subr.bf16.mxu1 %v6876_v61  ;;  %v8337_v51 = vpop.f32.mrf.mxu0  ;;  %v8339_v61 = vpop.f32.mrf.mxu1  ;;  %v4986_v54 = vadd.f32 %v4985_v39, %v4943_v31  ;;  %v2235_v29 = vld [vmem:[#allocation12 + $0xdf8] sm:$0xff]  ;;  %v7623_v31 = vld [vmem:[#allocation15 + $0x38] sm:$0xff]  }
 0x4ca   :  { %5520 = vmatprep.subr.bf16.mxu0 %v7004_v33  ;;  %v6971_v33 = vcombine.low %v2135_v30, %v2139_v4  ;;  %v7067_v24 = vcombine.low %v2231_v22, %v2235_v29 }
 0x4cb   :  { %v5028_v46 = vpop.f32.mrf.mxu0  ;;  %v5071_v48 = vpop.f32.mrf.mxu1 }
 0x4cc   :  { %5478 = vmatpush2.bf16.msra.mxu1 %v6875_v57  ;;  %v1995_v57 = vld [vmem:[#allocation12 + $0x678] sm:$0xff] }
 0x4cd   :  { %5521 = vmatpush2.bf16.msra.mxu0 %v7003_v25  ;;  %5479 = vmatprep.subr.bf16.mxu1 %v6868_v45  ;;  %v2119_v25 = vld [vmem:[#allocation12 + $0xa58] sm:$0xff]  ;;  %v8343_v39 = vpop.f32.mrf.mxu0 }
 0x4ce   :  { %5522 = vmatprep.subr.bf16.mxu0 %v6996_v5  ;;  %v2123_v45 = vld [vmem:[#allocation12 + $0xa78] sm:$0xff]  ;;  %v4982_v5 = vadd.f32 %v8323_v41, %v4939_v38  ;;  %v6827_v41 = vcombine.low %v1991_v44, %v1995_v57 }
 0x4cf   :  { %v6956_v40 = vcombine.high %v2119_v25, %v2123_v45  ;;  %v6955_v62 = vcombine.low %v2119_v25, %v2123_v45  ;;  %v8347_v30 = vpop.f32.mrf.mxu0  ;;  %v2215_v38 = vld [vmem:[#allocation12 + $0xd58] sm:$0xff] }
 0x4d0   :  { %5480 = vmatpush2.bf16.msra.mxu1 %v6867_v42  ;;  %v6828_v42 = vcombine.high %v1991_v44, %v1995_v57  ;;  %v5025_v13 = vadd.f32 %v5024_v11, %v4982_v5  ;;  %v6947_v11 = vcombine.low %v2111_v56, %v2115_v59  ;;  %v7625_v45 = vld [vmem:[#allocation15 + $0x30] sm:$0xff]  }
 0x4d1   :  { %5523 = vmatpush2.bf16.msra.mxu0 %v6995_v27  ;;  %5481 = vmatprep.subr.bf16.mxu1 %v6860_v9  ;;  %v5029_v27 = vadd.f32 %v5028_v46, %v4986_v54  ;;  %v1983_v9 = vld [vmem:[#allocation12 + $0x618] sm:$0xff]  ;;  %v8351_v21 = vpop.f32.mrf.mxu0 }
 0x4d2   :  { %5524 = vmatprep.subr.bf16.mxu0 %v6988_v50  ;;  %v1987_v50 = vld [vmem:[#allocation12 + $0x638] sm:$0xff] }
 0x4d3   :  { %v5072_v28 = vadd.f32 %v5071_v48, %v5029_v27  ;;  %v2219_v54 = vld [vmem:[#allocation12 + $0xd78] sm:$0xff]  ;;  %v5114_v44 = vpop.f32.mrf.mxu0  ;;  %v7626_v48 = vld [vmem:[#allocation15 + $0x68] sm:$0xff]  }
 0x4d4   :  { %5482 = vmatpush2.bf16.msra.mxu1 %v6859_v63  ;;  %v6820_v63 = vcombine.high %v1983_v9, %v1987_v50  ;;  %v7052_v5 = vcombine.high %v2215_v38, %v2219_v54  ;;  %v7627_v27 = vld [vmem:[#allocation15 + $0x28] sm:$0xff]  }
 0x4d5   :  { %5525 = vmatpush2.bf16.msra.mxu0 %v6987_v1  ;;  %5483 = vmatprep.subr.bf16.mxu1 %v6852_v26  ;;  %v5068_v1 = vadd.f32 %v5067_v12, %v5025_v13  ;;  %v8345_v26 = vpop.f32.mrf.mxu1  ;;  %v5599_v4 = vmul.f32 0.2, %v5072_v28  ;;  %v7622_v12 = vld [vmem:[#allocation15 + $0x78] sm:$0xff]  }
 0x4d6   :  { %5526 = vmatprep.subr.bf16.mxu0 %v6980_v3  ;;  %v6948_v3 = vcombine.high %v2111_v56, %v2115_v59  ;;  %v2203_v56 = vld [vmem:[#allocation12 + $0xcf8] sm:$0xff]  ;;  %v2305_v59 = vrot.slane %v8333_v7, %v8147_v55 }
 0x4d7   :  { %v8349_v58 = vpop.f32.mrf.mxu1  ;;  %v5615_v10 = vmax.f32 %v5072_v28, %v5599_v4  ;;  %v2195_v4 = vld [vmem:[#allocation12 + $0xcb8] sm:$0xff] }
 0x4d8   :  { %5484 = vmatpush2.bf16.msra.mxu1 %v6851_v6  ;;  %v6819_v6 = vcombine.low %v1983_v9, %v1987_v50  ;;  %v7628_v9 = vld [vmem:[#allocation15 + $0x60] sm:$0xff]   ;;  %v2199_v50 = vld [vmem:[#allocation12 + $0xcd8] sm:$0xff] }
 0x4d9   :  { %5527 = vmatpush2.bf16.msra.mxu0 %v6979_v16  ;;  %5485 = vmatprep.subr.bf16.mxu1 %v6844_v2  ;;  %v7068_v16 = vcombine.high %v2231_v22, %v2235_v29  ;;  %v5591_v2 = vmul.f32 0.2, %v5068_v1  ;;  %v7630_v22 = vld [vmem:[#allocation15 + $0x58] sm:$0xff]   ;;  %v2191_v29 = vld [vmem:[#allocation12 + $0xc98] sm:$0xff] }
 0x4da   :  { %5528 = vmatprep.subr.bf16.mxu0 %v6972_v17  ;;  %v2223_v17 = vld [vmem:[#allocation12 + $0xd98] sm:$0xff] }
 0x4db   :  { %v7059_v25 = vcombine.low %v2223_v17, %v2227_v19 }
 0x4dc   :  { %5486 = vmatpush2.bf16.msra.mxu1 %v6843_v32  ;;  %v5607_v32 = vmax.f32 %v5068_v1, %v5591_v2  ;;  %v4941_v1 = vadd.f32 %v8325_v52, %v2305_v59  ;;  %v7631_v52 = vld [vmem:[#allocation15 + $0x18] sm:$0xff]  }
 0x4dd   :  { %5529 = vmatpush2.bf16.msra.mxu0 %v6971_v33  ;;  %5487 = vmatprep.subr.bf16.mxu1 %v6836_v37  ;;  %v8353_v33 = vpop.f32.mrf.mxu1  ;;  %v7060_v37 = vcombine.high %v2223_v17, %v2227_v19  ;;  %v7028_v17 = vcombine.high %v2191_v29, %v2195_v4 }
 0x4de   :  { %5530 = vmatprep.subr.bf16.mxu0 %v6964_v43  ;;  %v7624_v43 = vld [vmem:[#allocation15 + $0x70] sm:$0xff]   ;;  %v5623_v57 = vpack.c.bf16 %v5615_v10, %v5607_v32 }
 0x4df   :  { %v5157_v46 = vpop.f32.mrf.mxu1 }
 0x4e0   :  { %5488 = vmatpush2.bf16.msra.mxu1 %v6835_v15  ;;  %v8358_v15 = vpop.f32.mrf.mxu0 }
 0x4e1   :  { %5531 = vmatpush2.bf16.msra.mxu0 %v6963_v35  ;;  %5489 = vmatprep.subr.bf16.mxu1 %v6828_v42  ;;  %v2207_v35 = vld [vmem:[#allocation12 + $0xd18] sm:$0xff] }
 0x4e2   :  { %5532 = vmatprep.subr.bf16.mxu0 %v6956_v40  ;;  %v5196_v40 = vpop.f32.mrf.mxu0 }
 0x4e4   :  { %5490 = vmatpush2.bf16.msra.mxu1 %v6827_v41  ;;  %v2317_v41 = vrot.slane %v8333_v7, %v890_v18  ;;  %v7035_v18 = vcombine.low %v2199_v50, %v2203_v56 }
 0x4e5   :  { %5533 = vmatpush2.bf16.msra.mxu0 %v6955_v62  ;;  %5491 = vmatprep.subr.bf16.mxu1 %v6820_v63  ;;  %v7629_v62 = vld [vmem:[#allocation15 + $0x20] sm:$0xff]   ;;  %v7036_v63 = vcombine.high %v2199_v50, %v2203_v56 }
 0x4e6   :  { %5534 = vmatprep.subr.bf16.mxu0 %v6948_v3  ;;  %v8368_v3 = vpop.f32.mrf.mxu0  ;;  %v5115_v55 = vadd.f32 %v5114_v44, %v2317_v41  ;;  %v5111_v2 = vadd.f32 %v8347_v30, %v2317_v41  ;;  %v2287_v41 = vld [vmem:[#allocation12 + $0xf98] sm:$0xff] }
 0x4e8   :  { %5492 = vmatpush2.bf16.msra.mxu1 %v6819_v6  ;;  %v4937_v6 = vadd.f32 %v8317_v23, %v2305_v59  ;;  %v5200_v10 = vpop.f32.mrf.mxu0  ;;  %v2187_v23 = vld [vmem:[#allocation12 + $0xc78] sm:$0xff] }
 0x4e9   :  { %5535 = vmatpush2.bf16.msra.mxu0 %v6947_v11  ;;  %5547 = vmatprep.subr.bf16.mxu1 %v7068_v16  ;;  %v4984_v11 = vadd.f32 %v8327_v47, %v4941_v1  ;;  %v5154_v47 = vadd.f32 %v8349_v58, %v5111_v2 }
 0x4ea   :  { %7216 = vmatprep.subr.bf16.mxu0 %v7622_v12  ;;  %v5158_v12 = vadd.f32 %v5157_v46, %v5115_v55  ;;  %v4980_v19 = vadd.f32 %v8319_v14, %v4937_v6  ;;  %v7640_v6 = vld [vmem:[#allocation15 + $0xf0] sm:$0xff]  }
 0x4eb   :  { %5494 = vmatmul.mubr.bf16.vlgmr.msra.gmra.mxu1 %v8277_v36  ;;  %v2211_v36 = vld [vmem:[#allocation12 + $0xd38] sm:$0xff]  ;;  %v8360_v42 = vpop.f32.mrf.mxu1  ;;  %v5027_v32 = vadd.f32 %v8337_v51, %v4984_v11 }
 0x4ec   :  { %5537 = vmatmul.mubr.bf16.vlgmr.msra.gmra.mxu0 %v8275_v34  ;;  %5548 = vmatpush1.bf16.msra.mxu1 %v7067_v24  ;;  %v7051_v34 = vcombine.low %v2215_v38, %v2219_v54  ;;  %v7043_v28 = vcombine.low %v2207_v35, %v2211_v36  ;;  %v7632_v24 = vld [vmem:[#allocation15 + $0x50] sm:$0xff]   ;;  %v7027_v38 = vcombine.low %v2191_v29, %v2195_v4  ;;  %v7639_v29 = vld [vmem:[#allocation15 + $0xb8] sm:$0xff]  }
 0x4ed   :  { %5579 = vmatprep.mubr.bf16.mxu1 %v8286_v60  ;;  %7217 = vmatpush3.bf16.msra.mxu0 %v7623_v31  ;;  %v7044_v60 = vcombine.high %v2207_v35, %v2211_v36  ;;  %v5239_v13 = vpop.f32.mrf.mxu1  ;;  %v2183_v31 = vld [vmem:[#allocation12 + $0xc58] sm:$0xff]  ;;  %v5201_v30 = vadd.f32 %v5200_v10, %v5158_v12  ;;  %v5023_v44 = vadd.f32 %v8329_v0, %v4980_v19  ;;  %v7635_v35 = vld [vmem:[#allocation15 + $0x8] sm:$0xff]   ;;  %v7636_v0 = vld [vmem:[#allocation15 + $0x40] sm:$0xff]  }
 0x4ee   :  { %6181 = vmatprep.mubr.bf16.mxu0 %v5623_v57  ;;  %5549 = vmatprep.subr.bf16.mxu1 %v7060_v37  ;;  %v7633_v54 = vld [vmem:[#allocation15 + $0x10] sm:$0xff]   ;;  %v5070_v14 = vadd.f32 %v8339_v61, %v5027_v32  ;;  %v7634_v57 = vld [vmem:[#allocation15 + $0x48] sm:$0xff]   ;;  %v7019_v46 = vcombine.low %v2183_v31, %v2187_v23  ;;  %v7644_v32 = vld [vmem:[#allocation15 + $0xe0] sm:$0xff]  }
 0x4ef   :  { %7218 = vmatprep.subr.bf16.mxu0 %v7624_v43  ;;  %v8372_v16 = vpop.f32.mrf.mxu1  ;;  %v7020_v43 = vcombine.high %v2183_v31, %v2187_v23  ;;  %v5066_v51 = vadd.f32 %v8331_v49, %v5023_v44  ;;  %v2299_v61 = vld [vmem:[#allocation12 + $0xff8] sm:$0xff]  ;;  %v7637_v49 = vld [vmem:[#allocation15] sm:$0xff]   ;;  %v7642_v19 = vld [vmem:[#allocation15 + $0xe8] sm:$0xff]  }
 0x4f0   :  { %5550 = vmatpush1.bf16.msra.mxu1 %v7059_v25  ;;  %v2175_v25 = vld [vmem:[#allocation12 + $0xc18] sm:$0xff]  ;;  %v7643_v23 = vld [vmem:[#allocation15 + $0xa8] sm:$0xff]  }
 0x4f1   :  { %7219 = vmatpush3.bf16.msra.mxu0 %v7625_v45  ;;  %5551 = vmatprep.subr.bf16.mxu1 %v7052_v5  ;;  %v5243_v37 = vpop.f32.mrf.mxu1  ;;  %v2179_v45 = vld [vmem:[#allocation12 + $0xc38] sm:$0xff]  ;;  %v5197_v5 = vadd.f32 %v5196_v40, %v5154_v47 }
 0x4f2   :  { %7220 = vmatprep.subr.bf16.mxu0 %v7626_v48  ;;  %v5244_v58 = vadd.f32 %v5243_v37, %v5201_v30  ;;  %v7012_v36 = vcombine.high %v2175_v25, %v2179_v45  ;;  %v7011_v50 = vcombine.low %v2175_v25, %v2179_v45  ;;  %v2279_v11 = vld [vmem:[#allocation12 + $0xf58] sm:$0xff]  ;;  %v2313_v30 = vrot.slane %v8333_v7, %v886_v20  ;;  %v7647_v20 = vld [vmem:[#allocation15 + $0x98] sm:$0xff]  }
 0x4f3   :  { %v5240_v48 = vadd.f32 %v5239_v13, %v5197_v5  ;;  %v7638_v13 = vld [vmem:[#allocation15 + $0xf8] sm:$0xff]   ;;  %v2271_v10 = vld [vmem:[#allocation12 + $0xf18] sm:$0xff] }
 0x4f4   :  { %5552 = vmatpush1.bf16.msra.mxu1 %v7051_v34  ;;  %v5598_v34 = vmul.f32 0.2, %v5070_v14  ;;  %v2263_v37 = vld [vmem:[#allocation12 + $0xed8] sm:$0xff]  ;;  %v5109_v5 = vadd.f32 %v8343_v39, %v2313_v30 }
 0x4f5   :  { %7221 = vmatpush3.bf16.msra.mxu0 %v7627_v27  ;;  %5553 = vmatprep.subr.bf16.mxu1 %v7044_v60  ;;  %v2295_v27 = vld [vmem:[#allocation12 + $0xfd8] sm:$0xff]  ;;  %v5601_v60 = vmul.f32 0.2, %v5244_v58  ;;  %v5593_v40 = vmul.f32 0.2, %v5240_v48 }
 0x4f6   :  { %7222 = vmatprep.subr.bf16.mxu0 %v7628_v9  ;;  %v5590_v9 = vmul.f32 0.2, %v5066_v51  ;;  %v7132_v56 = vcombine.high %v2295_v27, %v2299_v61  ;;  %v5614_v59 = vmax.f32 %v5070_v14, %v5598_v34  ;;  %v7131_v1 = vcombine.low %v2295_v27, %v2299_v61  ;;  %v2255_v25 = vld [vmem:[#allocation12 + $0xe98] sm:$0xff] }
 0x4f7   :  { %v5113_v14 = vadd.f32 %v8351_v21, %v2313_v30  ;;  %v2259_v45 = vld [vmem:[#allocation12 + $0xeb8] sm:$0xff]  ;;  %v7675_v30 = vld [vmem:[#allocation15 + $0x1a8] sm:$0xff]  }
 0x4f8   :  { %5554 = vmatpush1.bf16.msra.mxu1 %v7043_v28  ;;  %v5617_v28 = vmax.f32 %v5244_v58, %v5601_v60  ;;  %v2251_v21 = vld [vmem:[#allocation12 + $0xe78] sm:$0xff]  ;;  %v7650_v60 = vld [vmem:[#allocation15 + $0xc8] sm:$0xff]  }
 0x4f9   :  { %7223 = vmatpush3.bf16.msra.mxu0 %v7629_v62  ;;  %5555 = vmatprep.subr.bf16.mxu1 %v7036_v63  ;;  %v2291_v62 = vld [vmem:[#allocation12 + $0xfb8] sm:$0xff]  ;;  %v5606_v63 = vmax.f32 %v5066_v51, %v5590_v9  ;;  %v5156_v58 = vadd.f32 %v8353_v33, %v5113_v14  ;;  %v2320_v14 = vsub.s32 4, %v8141_v53 }
 0x4fa   :  { %7224 = vmatprep.subr.bf16.mxu0 %v7630_v22  ;;  %v5609_v22 = vmax.f32 %v5240_v48, %v5593_v40  ;;  %v7124_v55 = vcombine.high %v2287_v41, %v2291_v62  ;;  %v7123_v12 = vcombine.low %v2287_v41, %v2291_v62  ;;  %v5152_v48 = vadd.f32 %v8345_v26, %v5109_v5  ;;  %v7649_v39 = vld [vmem:[#allocation15 + $0x90] sm:$0xff]  }
 0x4fb   :  { %v5622_v4 = vpack.c.bf16 %v5614_v59, %v5606_v63  ;;  %v5199_v34 = vadd.f32 %v8368_v3, %v5156_v58  ;;  %v2239_v9 = vld [vmem:[#allocation12 + $0xe18] sm:$0xff]  ;;  %v7651_v3 = vld [vmem:[#allocation15 + $0x88] sm:$0xff]   ;;  %v7652_v59 = vld [vmem:[#allocation15 + $0xc0] sm:$0xff]  }
 0x4fc   :  { %5556 = vmatpush1.bf16.msra.mxu1 %v7035_v18  ;;  %v2283_v18 = vld [vmem:[#allocation12 + $0xf78] sm:$0xff]  ;;  %v5625_v2 = vpack.c.bf16 %v5617_v28, %v5609_v22  ;;  %v5195_v27 = vadd.f32 %v8358_v15, %v5152_v48  ;;  %v7654_v28 = vld [vmem:[#allocation15 + $0x178] sm:$0xff]  }
 0x4fd   :  { %7225 = vmatpush3.bf16.msra.mxu0 %v7631_v52  ;;  %5557 = vmatprep.subr.bf16.mxu1 %v7028_v17  ;;  %v7641_v52 = vld [vmem:[#allocation15 + $0xb0] sm:$0xff]   ;;  %v7116_v17 = vcombine.high %v2279_v11, %v2283_v18  ;;  %v7115_v31 = vcombine.low %v2279_v11, %v2283_v18  ;;  %v5242_v61 = vadd.f32 %v8372_v16, %v5199_v34  ;;  %v7653_v16 = vld [vmem:[#allocation15 + $0x80] sm:$0xff]   ;;  %v7662_v11 = vld [vmem:[#allocation15 + $0x158] sm:$0xff]  }
 0x4fe   :  { %7226 = vmatprep.subr.bf16.mxu0 %v7632_v24  ;;  %v2275_v24 = vld [vmem:[#allocation12 + $0xf38] sm:$0xff]  ;;  %v7663_v18 = vld [vmem:[#allocation15 + $0x118] sm:$0xff]  }
 0x4ff   :  { %v7108_v47 = vcombine.high %v2271_v10, %v2275_v24  ;;  %v2243_v26 = vld [vmem:[#allocation12 + $0xe38] sm:$0xff] }
 0x500   :  { %5558 = vmatpush1.bf16.msra.mxu1 %v7027_v38  ;;  %v2267_v38 = vld [vmem:[#allocation12 + $0xef8] sm:$0xff]  ;;  %v7075_v15 = vcombine.low %v2239_v9, %v2243_v26 }
 0x501   :  { %7227 = vmatpush3.bf16.msra.mxu0 %v7633_v54  ;;  %5559 = vmatprep.subr.bf16.mxu1 %v7020_v43  ;;  %v7107_v54 = vcombine.low %v2271_v10, %v2275_v24  ;;  %v7645_v43 = vld [vmem:[#allocation15 + $0xa0] sm:$0xff]   ;;  %v7100_v44 = vcombine.high %v2263_v37, %v2267_v38  ;;  %v7099_v51 = vcombine.low %v2263_v37, %v2267_v38  ;;  %v7656_v63 = vld [vmem:[#allocation15 + $0x170] sm:$0xff]   ;;  %v5280_v10 = vpop.f32.mrf.mxu0  ;;  %v7670_v24 = vld [vmem:[#allocation15 + $0x1f8] sm:$0xff]  }
 0x502   :  { %7228 = vmatprep.subr.bf16.mxu0 %v7634_v57  ;;  %v7646_v57 = vld [vmem:[#allocation15 + $0xd8] sm:$0xff]   ;;  %v7657_v22 = vld [vmem:[#allocation15 + $0x130] sm:$0xff]   ;;  %v7674_v37 = vld [vmem:[#allocation15 + $0x1e8] sm:$0xff]  }
 0x504   :  { %5560 = vmatpush1.bf16.msra.mxu1 %v7019_v46  ;;  %v7092_v46 = vcombine.high %v2255_v25, %v2259_v45 }
 0x505   :  { %7229 = vmatpush3.bf16.msra.mxu0 %v7635_v35  ;;  %5561 = vmatprep.subr.bf16.mxu1 %v7012_v36  ;;  %v7648_v35 = vld [vmem:[#allocation15 + $0xd0] sm:$0xff]  }
 0x506   :  { %7230 = vmatprep.subr.bf16.mxu0 %v7636_v0  ;;  %v2247_v36 = vld [vmem:[#allocation12 + $0xe58] sm:$0xff]  ;;  %v7091_v0 = vcombine.low %v2255_v25, %v2259_v45  ;;  %v7677_v25 = vld [vmem:[#allocation15 + $0x1a0] sm:$0xff]  }
 0x507   :  { %v7084_v33 = vcombine.high %v2247_v36, %v2251_v21  ;;  %v7083_v40 = vcombine.low %v2247_v36, %v2251_v21 }
 0x508   :  { %5562 = vmatpush1.bf16.msra.mxu1 %v7011_v50  ;;  %v5238_v50 = vadd.f32 %v8360_v42, %v5195_v27  ;;  %v7655_v42 = vld [vmem:[#allocation15 + $0x138] sm:$0xff]  }
 0x509   :  { %7231 = vmatpush3.bf16.msra.mxu0 %v7637_v49  ;;  %5563 = vmatprep.subr.bf16.mxu1 %v7132_v56  ;;  %v7076_v49 = vcombine.high %v2239_v9, %v2243_v26  ;;  %v5600_v56 = vmul.f32 0.2, %v5242_v61  ;;  %v7679_v9 = vld [vmem:[#allocation15 + $0x198] sm:$0xff]  }
 0x50a   :  { %7238 = vmatprep.subr.bf16.mxu0 %v7638_v13  ;;  %v5592_v13 = vmul.f32 0.2, %v5238_v50 }
 0x50b   :  { %v5616_v41 = vmax.f32 %v5242_v61, %v5600_v56  ;;  %v7678_v61 = vld [vmem:[#allocation15 + $0x1d8] sm:$0xff]  }
 0x50c   :  { %5564 = vmatpush2.bf16.msra.mxu1 %v7131_v1  ;;  %6182 = vmatmul.mubr.bf16.vlgmr.msra.gmra.mxu0 %v5622_v4  ;;  %v5608_v62 = vmax.f32 %v5238_v50, %v5592_v13  ;;  %v7659_v4 = vld [vmem:[#allocation15 + $0x128] sm:$0xff]   ;;  %v7680_v13 = vld [vmem:[#allocation15 + $0x1d0] sm:$0xff]  }
 0x50d   :  { %7239 = vmatpush3.bf16.msra.mxu0 %v7639_v29  ;;  %6222 = vmatprep.mubr.bf16.mxu0 %v5625_v2  ;;  %v7658_v29 = vld [vmem:[#allocation15 + $0x168] sm:$0xff]   ;;  %v7664_v2 = vld [vmem:[#allocation15 + $0x150] sm:$0xff]  }
 0x50e   :  { %5565 = vmatprep.subr.bf16.mxu1 %v7124_v55  ;;  %7240 = vmatprep.subr.bf16.mxu0 %v7640_v6  ;;  %v5624_v1 = vpack.c.bf16 %v5616_v41, %v5608_v62  ;;  %v7660_v55 = vld [vmem:[#allocation15 + $0x160] sm:$0xff]  }
 0x50f   :  { %v7661_v6 = vld [vmem:[#allocation15 + $0x120] sm:$0xff]  }
 0x510   :  { %5566 = vmatpush2.bf16.msra.mxu1 %v7123_v12  ;;  %v7665_v12 = vld [vmem:[#allocation15 + $0x110] sm:$0xff]  }
 0x511   :  { %7241 = vmatpush3.bf16.msra.mxu0 %v7641_v52  ;;  %5567 = vmatprep.subr.bf16.mxu1 %v7116_v17  ;;  %v7667_v52 = vld [vmem:[#allocation15 + $0x108] sm:$0xff]   ;;  %v7668_v17 = vld [vmem:[#allocation15 + $0x140] sm:$0xff]  }
 0x512   :  { %7242 = vmatprep.subr.bf16.mxu0 %v7642_v19  ;;  %v7669_v19 = vld [vmem:[#allocation15 + $0x100] sm:$0xff]  }
 0x514   :  { %5568 = vmatpush2.bf16.msra.mxu1 %v7115_v31  ;;  %v7671_v31 = vld [vmem:[#allocation15 + $0x1b8] sm:$0xff]  }
 0x515   :  { %7243 = vmatpush3.bf16.msra.mxu0 %v7643_v23  ;;  %5569 = vmatprep.subr.bf16.mxu1 %v7108_v47  ;;  %v7672_v23 = vld [vmem:[#allocation15 + $0x1f0] sm:$0xff]   ;;  %v5282_v47 = vpop.f32.mrf.mxu0 }
 0x516   :  { %7244 = vmatprep.subr.bf16.mxu0 %v7644_v32  ;;  %v7673_v32 = vld [vmem:[#allocation15 + $0x1b0] sm:$0xff]  }
 0x517   :  { %v5284_v38 = vpop.f32.mrf.mxu0 }
 0x518   :  { %5570 = vmatpush2.bf16.msra.mxu1 %v7107_v54 }
 0x519   :  { %7245 = vmatpush3.bf16.msra.mxu0 %v7645_v43  ;;  %5571 = vmatprep.subr.bf16.mxu1 %v7100_v44  ;;  %v7676_v43 = vld [vmem:[#allocation15 + $0x1e0] sm:$0xff]   ;;  %v2324_v44 = vsub.s32 5, %v8141_v53 }
 0x51a   :  { %7246 = vmatprep.subr.bf16.mxu0 %v7646_v57  ;;  %v5286_v57 = vpop.f32.mrf.mxu0 }
 0x51b   :  { %v2325_v58 = vrot.slane %v8333_v7, %v2324_v44 }
 0x51c   :  { %5572 = vmatpush2.bf16.msra.mxu1 %v7099_v51  ;;  %v2321_v51 = vrot.slane %v8333_v7, %v2320_v14 }
 0x51d   :  { %7247 = vmatpush3.bf16.msra.mxu0 %v7647_v20  ;;  %5573 = vmatprep.subr.bf16.mxu1 %v7092_v46  ;;  %v5283_v48 = vadd.f32 %v5282_v47, %v2325_v58  ;;  %v7689_v47 = vld [vmem:[#allocation18 + $0x20] sm:$0xff]  }
 0x51e   :  { %7248 = vmatprep.subr.bf16.mxu0 %v7648_v35  ;;  %v5281_v35 = vadd.f32 %v5280_v10, %v2321_v51  ;;  %v5285_v36 = vadd.f32 %v5284_v38, %v2321_v51  ;;  %v7686_v10 = vld [vmem:[#allocation18 + $0x38] sm:$0xff]  }
 0x520   :  { %5574 = vmatpush2.bf16.msra.mxu1 %v7091_v0 }
 0x521   :  { %7249 = vmatpush3.bf16.msra.mxu0 %v7649_v39  ;;  %5575 = vmatprep.subr.bf16.mxu1 %v7084_v33  ;;  %v5287_v33 = vadd.f32 %v5286_v57, %v2325_v58 }
 0x522   :  { %7250 = vmatprep.subr.bf16.mxu0 %v7650_v60 }
 0x524   :  { %5576 = vmatpush2.bf16.msra.mxu1 %v7083_v40 }
 0x525   :  { %7251 = vmatpush3.bf16.msra.mxu0 %v7651_v3  ;;  %5577 = vmatprep.subr.bf16.mxu1 %v7076_v49 }
 0x526   :  { %7252 = vmatprep.subr.bf16.mxu0 %v7652_v59 }
 0x528   :  { %5578 = vmatpush2.bf16.msra.mxu1 %v7075_v15 }
 0x529   :  { %7253 = vmatpush3.bf16.msra.mxu0 %v7653_v16  ;;  %7260 = vmatprep.subr.bf16.mxu1 %v7654_v28  ;;  %v7681_v28 = vld [vmem:[#allocation15 + $0x190] sm:$0xff]  }
 0x52a   :  { %7282 = vmatprep.subr.bf16.mxu0 %v7670_v24  ;;  %v7968_v24 = vmov 0.0  }
 0x52b   :  { %5580 = vmatmul.mubr.bf16.vlgmr.msra.gmra.mxu1 %v8295_v8  ;;  %v7666_v8 = vld [vmem:[#allocation15 + $0x148] sm:$0xff]   ;;  %v5323_v54 = vpop.f32.mrf.mxu1 }
 0x52c   :  { %6223 = vmatmul.mubr.bf16.vlgmr.msra.gmra.mxu0 %v5624_v1  ;;  %7261 = vmatpush3.bf16.msra.mxu1 %v7655_v42  ;;  %v5366_v45 = vpop.f32.mrf.mxu0  ;;  %v5324_v34 = vadd.f32 %v5323_v54, %v5281_v35  ;;  %v2332_v54 = vsub.s32 7, %v8141_v53 }
 0x52d   :  { %7262 = vmatprep.subr.bf16.mxu1 %v7656_v63  ;;  %7283 = vmatpush3.bf16.msra.mxu0 %v7671_v31  ;;  %v5325_v5 = vpop.f32.mrf.mxu1  ;;  %v7687_v31 = vld [vmem:[#allocation18 + $0x30] sm:$0xff]  }
 0x52e   :  { %7284 = vmatprep.subr.bf16.mxu0 %v7672_v23  ;;  %v5368_v20 = vpop.f32.mrf.mxu0  ;;  %v5326_v21 = vadd.f32 %v5325_v5, %v5283_v48  ;;  %v5367_v40 = vadd.f32 %v5366_v45, %v5324_v34  ;;  %v7688_v23 = vld [vmem:[#allocation18 + $0x28] sm:$0xff]  }
 0x52f   :  { %v5327_v46 = vpop.f32.mrf.mxu1 }
 0x530   :  { %7263 = vmatpush3.bf16.msra.mxu1 %v7657_v22  ;;  %v5370_v0 = vpop.f32.mrf.mxu0  ;;  %v5328_v27 = vadd.f32 %v5327_v46, %v5285_v36  ;;  %v5369_v26 = vadd.f32 %v5368_v20, %v5326_v21 }
 0x531   :  { %7264 = vmatprep.subr.bf16.mxu1 %v7658_v29  ;;  %7285 = vmatpush3.bf16.msra.mxu0 %v7673_v32  ;;  %v5329_v39 = vpop.f32.mrf.mxu1  ;;  %v7682_v29 = vld [vmem:[#allocation15 + $0x1c8] sm:$0xff]  }
 0x532   :  { %7286 = vmatprep.subr.bf16.mxu0 %v7674_v37  ;;  %v5330_v50 = vadd.f32 %v5329_v39, %v5287_v33  ;;  %v5372_v3 = vpop.f32.mrf.mxu0  ;;  %v5371_v56 = vadd.f32 %v5370_v0, %v5328_v27 }
 0x534   :  { %7265 = vmatpush3.bf16.msra.mxu1 %v7659_v4  ;;  %v5373_v41 = vadd.f32 %v5372_v3, %v5330_v50 }
 0x535   :  { %7266 = vmatprep.subr.bf16.mxu1 %v7660_v55  ;;  %7287 = vmatpush3.bf16.msra.mxu0 %v7675_v30  ;;  %v7683_v55 = vld [vmem:[#allocation15 + $0x188] sm:$0xff]  }
 0x536   :  { %7288 = vmatprep.subr.bf16.mxu0 %v7676_v43  ;;  %v2328_v43 = vsub.s32 6, %v8141_v53 }
 0x538   :  { %7267 = vmatpush3.bf16.msra.mxu1 %v7661_v6  ;;  %v2329_v45 = vrot.slane %v8333_v7, %v2328_v43 }
 0x539   :  { %7268 = vmatprep.subr.bf16.mxu1 %v7662_v11  ;;  %7289 = vmatpush3.bf16.msra.mxu0 %v7677_v25  ;;  %v2333_v25 = vrot.slane %v8333_v7, %v2332_v54 }
 0x53a   :  { %7290 = vmatprep.subr.bf16.mxu0 %v7678_v61 }
 0x53c   :  { %7269 = vmatpush3.bf16.msra.mxu1 %v7663_v18 }
 0x53d   :  { %7270 = vmatprep.subr.bf16.mxu1 %v7664_v2  ;;  %7291 = vmatpush3.bf16.msra.mxu0 %v7679_v9 }
 0x53e   :  { %7292 = vmatprep.subr.bf16.mxu0 %v7680_v13 }
 0x540   :  { %7271 = vmatpush3.bf16.msra.mxu1 %v7665_v12  ;;  %v7684_v12 = vld [vmem:[#allocation15 + $0x1c0] sm:$0xff]  }
 0x541   :  { %7272 = vmatprep.subr.bf16.mxu1 %v7666_v8  ;;  %7293 = vmatpush3.bf16.msra.mxu0 %v7681_v28  ;;  %v7685_v8 = vld [vmem:[#allocation15 + $0x180] sm:$0xff]  }
 0x542   :  { %7294 = vmatprep.subr.bf16.mxu0 %v7682_v29  ;;  %v7691_v29 = vld [vmem:[#allocation18 + $0x10] sm:$0xff]  }
 0x544   :  { %7273 = vmatpush3.bf16.msra.mxu1 %v7667_v52 }
 0x545   :  { %7274 = vmatprep.subr.bf16.mxu1 %v7668_v17  ;;  %7295 = vmatpush3.bf16.msra.mxu0 %v7683_v55  ;;  %v7693_v55 = vld [vmem:[#allocation18] sm:$0xff]  }
 0x546   :  { %7296 = vmatprep.subr.bf16.mxu0 %v7684_v12 }
 0x548   :  { %7275 = vmatpush3.bf16.msra.mxu1 %v7669_v19 }
 0x549   :  { %7297 = vmatpush3.bf16.msra.mxu0 %v7685_v8  ;;  %7331 = vmatprep.subr.bf16.mxu1 %v7968_v24 }
 0x56b   :  { %v5409_v60 = vpop.f32.mrf.mxu1 }
 0x56c   :  { %v5410_v15 = vadd.f32 %v5409_v60, %v5367_v40  ;;  %v5452_v32 = vpop.f32.mrf.mxu0 }
 0x56d   :  { %v5411_v49 = vpop.f32.mrf.mxu1  ;;  %v5453_v20 = vadd.f32 %v5452_v32, %v2329_v45 }
 0x56e   :  { %v5412_v59 = vadd.f32 %v5411_v49, %v5369_v26  ;;  %v5594_v4 = vmul.f32 0.2, %v5410_v15  ;;  %v5454_v37 = vpop.f32.mrf.mxu0 }
 0x56f   :  { %v5413_v16 = vpop.f32.mrf.mxu1  ;;  %v5455_v51 = vadd.f32 %v5454_v37, %v2333_v25 }
 0x570   :  { %v5414_v62 = vadd.f32 %v5413_v16, %v5371_v56  ;;  %v5595_v63 = vmul.f32 0.2, %v5412_v59  ;;  %v5610_v52 = vmax.f32 %v5410_v15, %v5594_v4  ;;  %v5456_v38 = vpop.f32.mrf.mxu0  ;;  %v7692_v4 = vld [vmem:[#allocation18 + $0x8] sm:$0xff]  }
 0x571   :  { %v5415_v42 = vpop.f32.mrf.mxu1  ;;  %v5457_v46 = vadd.f32 %v5456_v38, %v2329_v45 }
 0x572   :  { %v5602_v1 = vmul.f32 0.2, %v5414_v62  ;;  %v5416_v22 = vadd.f32 %v5415_v42, %v5373_v41  ;;  %v5611_v18 = vmax.f32 %v5412_v59, %v5595_v63  ;;  %v5458_v44 = vpop.f32.mrf.mxu0 }
 0x573   :  { %v5459_v34 = vadd.f32 %v5458_v44, %v2333_v25 }
 0x574   :  { %v5603_v6 = vmul.f32 0.2, %v5416_v22  ;;  %v5618_v11 = vmax.f32 %v5414_v62, %v5602_v1 }
 0x576   :  { %v5619_v2 = vmax.f32 %v5416_v22, %v5603_v6  ;;  %v5626_v19 = vpack.c.bf16 %v5618_v11, %v5610_v52  ;;  %v7690_v22 = vld [vmem:[#allocation18 + $0x18] sm:$0xff]  }
 0x578   :  { %v5627_v17 = vpack.c.bf16 %v5619_v2, %v5611_v18 }
 0x57a   :  { %6263 = vmatprep.mubr.bf16.mxu1 %v5627_v17 }
 0x57b   :  { %6264 = vmatmul.mubr.bf16.vlgmr.msra.gmra.mxu1 %v5626_v19 }
 0x57c   :  { %7332 = vmatpush3.bf16.msra.mxu1 %v7686_v10  ;;  %7347 = vmatprep.mubr.msk.bf16.mxu1 %vm7969_vm1, %v7968_v24 }
 0x57d   :  { %7333 = vmatprep.subr.bf16.mxu1 %v7968_v24 }
 0x580   :  { %7334 = vmatpush3.bf16.msra.mxu1 %v7687_v31  ;;  %v7133_v31 = vld [vmem:[#allocation16] ss:$0 sm:$0xff] }
 0x581   :  { %7335 = vmatprep.subr.bf16.mxu1 %v7968_v24 }
 0x584   :  { %7336 = vmatpush3.bf16.msra.mxu1 %v7688_v23 }
 0x585   :  { %7337 = vmatprep.subr.bf16.mxu1 %v7968_v24 }
 0x588   :  { %7338 = vmatpush3.bf16.msra.mxu1 %v7689_v47 }
 0x589   :  { %7339 = vmatprep.subr.bf16.mxu1 %v7968_v24 }
 0x58c   :  { %7340 = vmatpush3.bf16.msra.mxu1 %v7690_v22 }
 0x58d   :  { %7341 = vmatprep.subr.bf16.mxu1 %v7968_v24 }
 0x590   :  { %7342 = vmatpush3.bf16.msra.mxu1 %v7691_v29 }
 0x591   :  { %7343 = vmatprep.subr.bf16.mxu1 %v7968_v24 }
 0x594   :  { %7344 = vmatpush3.bf16.msra.mxu1 %v7692_v4 }
 0x595   :  { %7345 = vmatprep.subr.bf16.mxu1 %v7968_v24 }
 0x598   :  { %7346 = vmatpush3.bf16.msra.mxu1 %v7693_v55 }
 0x5ab   :  { %v5495_v30 = vpop.f32.mrf.mxu1 }
 0x5ac   :  { %v5538_v14 = vpop.f32.mrf.mxu0  ;;  %v5496_v35 = vadd.f32 %v5495_v30, %v5453_v20 }
 0x5ad   :  { %v5497_v57 = vpop.f32.mrf.mxu1 }
 0x5ae   :  { %v5540_v5 = vpop.f32.mrf.mxu0  ;;  %v5498_v48 = vadd.f32 %v5497_v57, %v5455_v51  ;;  %v5539_v27 = vadd.f32 %v5538_v14, %v5496_v35 }
 0x5af   :  { %v5499_v58 = vpop.f32.mrf.mxu1 }
 0x5b0   :  { %v5542_v36 = vpop.f32.mrf.mxu0  ;;  %v5500_v0 = vadd.f32 %v5499_v58, %v5457_v46  ;;  %v5541_v53 = vadd.f32 %v5540_v5, %v5498_v48 }
 0x5b1   :  { %v5501_v21 = vpop.f32.mrf.mxu1 }
 0x5b2   :  { %v5502_v33 = vadd.f32 %v5501_v21, %v5459_v34  ;;  %v5544_v61 = vpop.f32.mrf.mxu0  ;;  %v5543_v9 = vadd.f32 %v5542_v36, %v5500_v0 }
 0x5b4   :  { %v5545_v40 = vadd.f32 %v5544_v61, %v5502_v33  ;;  %v7198_v33 = vld [vmem:[#allocation19] ss:$0 sm:$0xff] }
 0x5cc   :  { %v7232_v6 = vpop.f32.mrf.mxu0 }
 0x5ce   :  { %v7233_v11 = vpop.f32.mrf.mxu0 }
 0x5cf   :  { %v7234_v10 = vadd.f32 %v7233_v11, %v7232_v6 }
 0x5d0   :  { %v7235_v18 = vpop.f32.mrf.mxu0 }
 0x5d1   :  { %v6184_v37 = vadd.f32 %v7234_v10, %v7133_v31 }
 0x5d2   :  { %v7236_v2 = vpop.f32.mrf.mxu0 }
 0x5d3   :  { %v7237_v38 = vadd.f32 %v7236_v2, %v7235_v18 }
 0x5d5   :  { %v6187_v57 = vadd.f32 %v7237_v38, %v7133_v31 }
 0x5eb   :  { %v5581_v39 = vpop.f32.mrf.mxu1 }
 0x5ec   :  { %v5582_v7 = vadd.f32 %v5581_v39, %v5539_v27  ;;  %v7254_v12 = vpop.f32.mrf.mxu0 }
 0x5ed   :  { %v5583_v60 = vpop.f32.mrf.mxu1 }
 0x5ee   :  { %v5584_v26 = vadd.f32 %v5583_v60, %v5541_v53  ;;  %v5596_v15 = vmul.f32 0.2, %v5582_v7  ;;  %v7255_v52 = vpop.f32.mrf.mxu0 }
 0x5ef   :  { %v5585_v50 = vpop.f32.mrf.mxu1  ;;  %v7256_v47 = vadd.f32 %v7255_v52, %v7254_v12 }
 0x5f0   :  { %v5586_v3 = vadd.f32 %v5585_v50, %v5543_v9  ;;  %v5597_v56 = vmul.f32 0.2, %v5584_v26  ;;  %v5612_v42 = vmax.f32 %v5582_v7, %v5596_v15  ;;  %v7257_v19 = vpop.f32.mrf.mxu0 }
 0x5f1   :  { %v5587_v49 = vpop.f32.mrf.mxu1  ;;  %v6225_v24 = vadd.f32 %v7256_v47, %v6184_v37 }
 0x5f2   :  { %v5604_v59 = vmul.f32 0.2, %v5586_v3  ;;  %v5588_v13 = vadd.f32 %v5587_v49, %v5545_v40  ;;  %v5613_v41 = vmax.f32 %v5584_v26, %v5597_v56  ;;  %v7258_v32 = vpop.f32.mrf.mxu0 }
 0x5f3   :  { %v7259_v44 = vadd.f32 %v7258_v32, %v7257_v19 }
 0x5f4   :  { %v5605_v16 = vmul.f32 0.2, %v5588_v13  ;;  %v5620_v28 = vmax.f32 %v5586_v3, %v5604_v59 }
 0x5f5   :  { %v6228_v51 = vadd.f32 %v7259_v44, %v6187_v57 }
 0x5f6   :  { %v5621_v62 = vmax.f32 %v5588_v13, %v5605_v16  ;;  %v5628_v1 = vpack.c.bf16 %v5620_v28, %v5612_v42 }
 0x5f8   :  { %v5629_v63 = vpack.c.bf16 %v5621_v62, %v5613_v41 }
 0x5fa   :  { %6304 = vmatprep.mubr.bf16.mxu0 %v5629_v63 }
 0x5fb   :  { %6305 = vmatmul.mubr.bf16.vlgmr.msra.gmra.mxu0 %v5628_v1 }
 0x63b   :  { %v7276_v8 = vpop.f32.mrf.mxu1 }
 0x63d   :  { %v7277_v17 = vpop.f32.mrf.mxu1 }
 0x63e   :  { %v7278_v30 = vadd.f32 %v7277_v17, %v7276_v8 }
 0x63f   :  { %v7279_v23 = vpop.f32.mrf.mxu1 }
 0x640   :  { %v6266_v25 = vadd.f32 %v7278_v30, %v6225_v24 }
 0x641   :  { %v7280_v54 = vpop.f32.mrf.mxu1 }
 0x642   :  { %v7281_v45 = vadd.f32 %v7280_v54, %v7279_v23 }
 0x644   :  { %v6269_v48 = vadd.f32 %v7281_v45, %v6228_v51 }
 0x6bb   :  { %v7298_v43 = vpop.f32.mrf.mxu0 }
 0x6bd   :  { %v7299_v14 = vpop.f32.mrf.mxu0 }
 0x6be   :  { %v7300_v5 = vadd.f32 %v7299_v14, %v7298_v43 }
 0x6bf   :  { %v7301_v58 = vpop.f32.mrf.mxu0 }
 0x6c0   :  { %v6307_v20 = vadd.f32 %v7300_v5, %v6266_v25 }
 0x6c1   :  { %v7302_v46 = vpop.f32.mrf.mxu0 }
 0x6c2   :  { %v7303_v35 = vadd.f32 %v7302_v46, %v7301_v58  ;;  %v6313_v36 = vmul.f32 0.2, %v6307_v20 }
 0x6c4   :  { %v6310_v21 = vadd.f32 %v7303_v35, %v6269_v48  ;;  %v6315_v0 = vmax.f32 %v6307_v20, %v6313_v36 }
 0x6c6   :  { %v6314_v34 = vmul.f32 0.2, %v6310_v21 }
 0x6c8   :  { %v6316_v39 = vmax.f32 %v6310_v21, %v6314_v34 }
 0x6ca   :  { %v6317_v53 = vpack.c.bf16 %v6316_v39, %v6315_v0 }
 0x6cc   :  { %7348 = vmatmul.mubr.bf16.vlgmr.msra.gmra.mxu1 %v6317_v53 }
 0x78c   :  { %v6423_v27 = vpop.f32.mrf.mxu1 }
 0x78d   :  { %v6424_v61 = vadd.f32 %v7198_v33, %v6423_v27 }
 0x78e   :  { %v7349_v60 = vpop.f32.mrf.mxu1 }
 0x78f   :  { %6430 = vst [vmem:[%s8429_s13] sm:$0xff] %v6424_v61 }
 0x790   :  { %v6426_v9 = vpop.f32.mrf.mxu1 }
 0x791   :  { %v6427_v26 = vadd.f32 %v7198_v33, %v6426_v9 }
 0x792   :  { %v7350_v7 = vpop.f32.mrf.mxu1 }
 0x793   :  { %6431 = vst [vmem:[%s8429_s13 + $0x8] sm:$0xff] %v6427_v26 }
 0x794   :  { %6436 = vsyncpa [#allocation3], 1 }
 0x795   :  { %6437 = vsyncpa [#allocation5], 1 }
 0x796   :  { %6438 = vsyncpa [#allocation8], 1 }
 0x797   :  { %6439 = vsyncpa [#allocation11], 1 }
 0x798   :  { %6440 = vsyncpa [#allocation14], 1 }
 0x799   :  { %6441 = vsyncpa [#allocation17], 1 }
 0x79a   :  { %6442 = vsyncpa [#allocation20], 1 }

</bundles_post_ra>
